<compile_context>
chip_gen: v7x
topology: tpu7x:2x2x1
jax: 0.10.0
libtpu: 0.0.40
codegen_flags: <defaults>
</compile_context>

<pallas_src>
import math

import jax
import jax.numpy as jnp
from jax.experimental import pallas as pl
from jax.experimental.pallas import tpu as pltpu


def make_resblock_kernel(H, W, C):
    HW = H * W

    def kernel(x_ref, w1_ref, b1_ref, w2_ref, b2_ref, o_ref, xpad_ref, col_ref):
        # x_ref   : (1, H, W, C)     input tile (NHWC)
        # w*_ref  : (9*C, C)         3x3 HWIO weights flattened tap-major
        # b*_ref  : (1, C)           bias
        # o_ref   : (1, H, W, C)     output tile
        # xpad_ref: (H+2, W+2, C)    VMEM scratch: zero halo + activation interior
        # col_ref : (H*W, 9*C)       VMEM im2col patch matrix (reused for both convs)

        # In-kernel zero padding: zero the whole buffer (cheap), fill interior.
        xpad_ref[...] = jnp.zeros_like(xpad_ref)
        xpad_ref[1:H + 1, 1:W + 1, :] = x_ref[0]

        def build_im2col():
            for dy in range(3):
                for dx in range(3):
                    t = dy * 3 + dx
                    patch = xpad_ref[dy:dy + H, dx:dx + W, :]        # (H, W, C)
                    col_ref[:, t * C:(t + 1) * C] = patch.reshape(HW, C)

        # ---- conv1 + bias + residual add + ReLU (all fused, VMEM-resident) ----
        build_im2col()
        h = jnp.dot(col_ref[...], w1_ref[...], preferred_element_type=jnp.float32)
        h = h + b1_ref[...].astype(jnp.float32)
        h = jnp.maximum(x_ref[0].reshape(HW, C).astype(jnp.float32) + h, 0.0)

        # Keep the intermediate in VMEM: overwrite the padded interior
        # (the 1-element halo remains zero for conv2's SAME padding).
        xpad_ref[1:H + 1, 1:W + 1, :] = h.reshape(H, W, C).astype(xpad_ref.dtype)

        # ---- conv2 + bias ----
        build_im2col()
        out = jnp.dot(col_ref[...], w2_ref[...], preferred_element_type=jnp.float32)
        out = out + b2_ref[...].astype(jnp.float32)
        o_ref[0] = out.reshape(H, W, C).astype(o_ref.dtype)

    return kernel


def residual_block_pallas(x_nchw, params):
    """x_nchw: (N, C, H, W) f32; params = ((w1, b1), (w2, b2)), w: (3,3,C,C) HWIO."""
    (w1, b1), (w2, b2) = params
    N, C, H, W = x_nchw.shape
    assert w1.shape == (3, 3, C, C) and w2.shape == (3, 3, C, C), \
        "ResidualBlock skip connection requires Cin == Cout"

    x = jnp.transpose(x_nchw, (0, 2, 3, 1))          # NCHW -> NHWC
    # Flatten weights tap-major / cin-minor to match the im2col column order.
    w1m = w1.reshape(9 * C, C)
    w2m = w2.reshape(9 * C, C)

    kernel = make_resblock_kernel(H, W, C)
    out = pl.pallas_call(
        kernel,
        out_shape=jax.ShapeDtypeStruct((N, H, W, C), x.dtype),
        grid=(N,),
        in_specs=[
            pl.BlockSpec((1, H, W, C), lambda n: (n, 0, 0, 0)),
            pl.BlockSpec((9 * C, C), lambda n: (0, 0)),
            pl.BlockSpec((1, C), lambda n: (0, 0)),
            pl.BlockSpec((9 * C, C), lambda n: (0, 0)),
            pl.BlockSpec((1, C), lambda n: (0, 0)),
        ],
        out_specs=pl.BlockSpec((1, H, W, C), lambda n: (n, 0, 0, 0)),
        scratch_shapes=[
            pltpu.VMEM((H + 2, W + 2, C), jnp.float32),   # zero-haloed activation
            pltpu.VMEM((H * W, 9 * C), jnp.float32),      # im2col patch matrix
        ],
        compiler_params=pltpu.CompilerParams(
            dimension_semantics=("parallel",)),           # batch over v7x's 2 TCs
    )(x, w1m, b1, w2m, b2)
    return jnp.transpose(out, (0, 3, 1, 2))              # NHWC -> NCHW


# ------------------------- parameter init ----------------------------------
def init_conv(key, cin, cout):
    k1, k2 = jax.random.split(key)
    fan_in = cin * 9
    w = jax.random.normal(k1, (3, 3, cin, cout), jnp.float32) / math.sqrt(fan_in)
    b = 0.01 * jax.random.normal(k2, (1, cout), jnp.float32)
    return w, b


def init_params(key, feat=64):
    k1, k2 = jax.random.split(key)
    return (init_conv(k1, feat, feat), init_conv(k2, feat, feat))


# ---------------- pure-JAX reference (for correctness check) ----------------
def _conv_ref(x, w, b):
    y = jax.lax.conv_general_dilated(
        x, w, window_strides=(1, 1), padding="SAME",
        dimension_numbers=("NHWC", "HWIO", "NHWC"))
    return y + b.reshape(1, 1, 1, -1)


def residual_block_ref(x_nchw, params):
    (w1, b1), (w2, b2) = params
    x = jnp.transpose(x_nchw, (0, 2, 3, 1))
    h = jax.nn.relu(x + _conv_ref(x, w1, b1))
    out = _conv_ref(h, w2, b2)
    return jnp.transpose(out, (0, 3, 1, 2))


if __name__ == "__main__":
    key = jax.random.PRNGKey(0)
    k_param, k_x = jax.random.split(key)

    N, C, H, W = 2, 64, 16, 16                 # channels fixed at 64 by the module
    params = init_params(k_param, C)
    x = jax.random.normal(k_x, (N, C, H, W), jnp.float32)

    out = jax.block_until_ready(residual_block_pallas(x, params))
    ref = residual_block_ref(x, params)

    assert out.shape == (N, C, H, W)
    assert jnp.max(jnp.abs(out - ref)) < 1e-4, "mismatch vs reference conv"
    print("KERNEL_OK")
</pallas_src>

<mosaic_0001>
module attributes {stable_mosaic.version = 11 : i64} {
  func.func @kernel(%arg0: i32, %arg1: memref<1x16x16x64xf32, #tpu.memory_space<vmem>>, %arg2: memref<576x64xf32, #tpu.memory_space<vmem>>, %arg3: memref<1x64xf32, #tpu.memory_space<vmem>>, %arg4: memref<576x64xf32, #tpu.memory_space<vmem>>, %arg5: memref<1x64xf32, #tpu.memory_space<vmem>>, %arg6: memref<1x16x16x64xf32, #tpu.memory_space<vmem>>, %arg7: memref<18x18x64xf32, #tpu.memory_space<vmem>>, %arg8: memref<256x576xf32, #tpu.memory_space<vmem>>) attributes {dimension_semantics = [#tpu.dimension_semantics<parallel>], iteration_bounds = array<i64: 2>, scalar_prefetch = 0 : i64, scratch_operands = 2 : i64, tpu.core_type = #tpu.core_type<tc>, window_params = [{transform_indices = @transform_0, window_bounds = array<i64: 1, 16, 16, 64>}, {pipeline_mode = #tpu.pipeline_mode<synchronous>, transform_indices = @transform_1, window_bounds = array<i64: 576, 64>}, {pipeline_mode = #tpu.pipeline_mode<synchronous>, transform_indices = @transform_2, window_bounds = array<i64: 1, 64>}, {pipeline_mode = #tpu.pipeline_mode<synchronous>, transform_indices = @transform_3, window_bounds = array<i64: 576, 64>}, {pipeline_mode = #tpu.pipeline_mode<synchronous>, transform_indices = @transform_4, window_bounds = array<i64: 1, 64>}, {transform_indices = @transform_5, window_bounds = array<i64: 1, 16, 16, 64>}]} {
    %cst = arith.constant 0.000000e+00 : f32
    %0 = vector.broadcast %cst : f32 to vector<18x18x64xf32>
    %c0 = arith.constant 0 : index
    %c0_0 = arith.constant 0 : index
    %c0_1 = arith.constant 0 : index
    %1 = vector.load %arg7[%c0, %c0_0, %c0_1] : memref<18x18x64xf32, #tpu.memory_space<vmem>>, vector<18x18x64xf32>
    tpu.vector_store %arg7[%c0, %c0_0, %c0_1], %0 {strides = array<i32>} : memref<18x18x64xf32, #tpu.memory_space<vmem>>, vector<18x18x64xf32>,
    %c0_2 = arith.constant 0 : index
    %c0_3 = arith.constant 0 : index
    %c0_4 = arith.constant 0 : index
    %c0_5 = arith.constant 0 : index
    %2 = vector.load %arg1[%c0_2, %c0_3, %c0_4, %c0_5] : memref<1x16x16x64xf32, #tpu.memory_space<vmem>>, vector<1x16x16x64xf32>
    %3 = vector.shape_cast %2 : vector<1x16x16x64xf32> to vector<16x16x64xf32>
    %c1 = arith.constant 1 : index
    %c1_6 = arith.constant 1 : index
    %c0_7 = arith.constant 0 : index
    %4 = vector.load %arg7[%c1, %c1_6, %c0_7] : memref<18x18x64xf32, #tpu.memory_space<vmem>>, vector<16x16x64xf32>
    tpu.vector_store %arg7[%c1, %c1_6, %c0_7], %3 {strides = array<i32>} : memref<18x18x64xf32, #tpu.memory_space<vmem>>, vector<16x16x64xf32>,
    %c0_8 = arith.constant 0 : index
    %c0_9 = arith.constant 0 : index
    %c0_10 = arith.constant 0 : index
    %5 = vector.load %arg7[%c0_8, %c0_9, %c0_10] : memref<18x18x64xf32, #tpu.memory_space<vmem>>, vector<16x16x64xf32>
    %6 = vector.shape_cast %5 : vector<16x16x64xf32> to vector<256x64xf32>
    %c0_11 = arith.constant 0 : index
    %c0_12 = arith.constant 0 : index
    %7 = vector.load %arg8[%c0_11, %c0_12] : memref<256x576xf32, #tpu.memory_space<vmem>>, vector<256x64xf32>
    tpu.vector_store %arg8[%c0_11, %c0_12], %6 {strides = array<i32>} : memref<256x576xf32, #tpu.memory_space<vmem>>, vector<256x64xf32>,
    %c0_13 = arith.constant 0 : index
    %c1_14 = arith.constant 1 : index
    %c0_15 = arith.constant 0 : index
    %8 = vector.load %arg7[%c0_13, %c1_14, %c0_15] : memref<18x18x64xf32, #tpu.memory_space<vmem>>, vector<16x16x64xf32>
    %9 = vector.shape_cast %8 : vector<16x16x64xf32> to vector<256x64xf32>
    %c0_16 = arith.constant 0 : index
    %c64 = arith.constant 64 : index
    %10 = vector.load %arg8[%c0_16, %c64] : memref<256x576xf32, #tpu.memory_space<vmem>>, vector<256x64xf32>
    tpu.vector_store %arg8[%c0_16, %c64], %9 {strides = array<i32>} : memref<256x576xf32, #tpu.memory_space<vmem>>, vector<256x64xf32>,
    %c0_17 = arith.constant 0 : index
    %c2 = arith.constant 2 : index
    %c0_18 = arith.constant 0 : index
    %11 = vector.load %arg7[%c0_17, %c2, %c0_18] : memref<18x18x64xf32, #tpu.memory_space<vmem>>, vector<16x16x64xf32>
    %12 = vector.shape_cast %11 : vector<16x16x64xf32> to vector<256x64xf32>
    %c0_19 = arith.constant 0 : index
    %c128 = arith.constant 128 : index
    %13 = vector.load %arg8[%c0_19, %c128] : memref<256x576xf32, #tpu.memory_space<vmem>>, vector<256x64xf32>
    tpu.vector_store %arg8[%c0_19, %c128], %12 {strides = array<i32>} : memref<256x576xf32, #tpu.memory_space<vmem>>, vector<256x64xf32>,
    %c1_20 = arith.constant 1 : index
    %c0_21 = arith.constant 0 : index
    %c0_22 = arith.constant 0 : index
    %14 = vector.load %arg7[%c1_20, %c0_21, %c0_22] : memref<18x18x64xf32, #tpu.memory_space<vmem>>, vector<16x16x64xf32>
    %15 = vector.shape_cast %14 : vector<16x16x64xf32> to vector<256x64xf32>
    %c0_23 = arith.constant 0 : index
    %c192 = arith.constant 192 : index
    %16 = vector.load %arg8[%c0_23, %c192] : memref<256x576xf32, #tpu.memory_space<vmem>>, vector<256x64xf32>
    tpu.vector_store %arg8[%c0_23, %c192], %15 {strides = array<i32>} : memref<256x576xf32, #tpu.memory_space<vmem>>, vector<256x64xf32>,
    %c1_24 = arith.constant 1 : index
    %c1_25 = arith.constant 1 : index
    %c0_26 = arith.constant 0 : index
    %17 = vector.load %arg7[%c1_24, %c1_25, %c0_26] : memref<18x18x64xf32, #tpu.memory_space<vmem>>, vector<16x16x64xf32>
    %18 = vector.shape_cast %17 : vector<16x16x64xf32> to vector<256x64xf32>
    %c0_27 = arith.constant 0 : index
    %c256 = arith.constant 256 : index
    %19 = vector.load %arg8[%c0_27, %c256] : memref<256x576xf32, #tpu.memory_space<vmem>>, vector<256x64xf32>
    tpu.vector_store %arg8[%c0_27, %c256], %18 {strides = array<i32>} : memref<256x576xf32, #tpu.memory_space<vmem>>, vector<256x64xf32>,
    %c1_28 = arith.constant 1 : index
    %c2_29 = arith.constant 2 : index
    %c0_30 = arith.constant 0 : index
    %20 = vector.load %arg7[%c1_28, %c2_29, %c0_30] : memref<18x18x64xf32, #tpu.memory_space<vmem>>, vector<16x16x64xf32>
    %21 = vector.shape_cast %20 : vector<16x16x64xf32> to vector<256x64xf32>
    %c0_31 = arith.constant 0 : index
    %c320 = arith.constant 320 : index
    %22 = vector.load %arg8[%c0_31, %c320] : memref<256x576xf32, #tpu.memory_space<vmem>>, vector<256x64xf32>
    tpu.vector_store %arg8[%c0_31, %c320], %21 {strides = array<i32>} : memref<256x576xf32, #tpu.memory_space<vmem>>, vector<256x64xf32>,
    %c2_32 = arith.constant 2 : index
    %c0_33 = arith.constant 0 : index
    %c0_34 = arith.constant 0 : index
    %23 = vector.load %arg7[%c2_32, %c0_33, %c0_34] : memref<18x18x64xf32, #tpu.memory_space<vmem>>, vector<16x16x64xf32>
    %24 = vector.shape_cast %23 : vector<16x16x64xf32> to vector<256x64xf32>
    %c0_35 = arith.constant 0 : index
    %c384 = arith.constant 384 : index
    %25 = vector.load %arg8[%c0_35, %c384] : memref<256x576xf32, #tpu.memory_space<vmem>>, vector<256x64xf32>
    tpu.vector_store %arg8[%c0_35, %c384], %24 {strides = array<i32>} : memref<256x576xf32, #tpu.memory_space<vmem>>, vector<256x64xf32>,
    %c2_36 = arith.constant 2 : index
    %c1_37 = arith.constant 1 : index
    %c0_38 = arith.constant 0 : index
    %26 = vector.load %arg7[%c2_36, %c1_37, %c0_38] : memref<18x18x64xf32, #tpu.memory_space<vmem>>, vector<16x16x64xf32>
    %27 = vector.shape_cast %26 : vector<16x16x64xf32> to vector<256x64xf32>
    %c0_39 = arith.constant 0 : index
    %c448 = arith.constant 448 : index
    %28 = vector.load %arg8[%c0_39, %c448] : memref<256x576xf32, #tpu.memory_space<vmem>>, vector<256x64xf32>
    tpu.vector_store %arg8[%c0_39, %c448], %27 {strides = array<i32>} : memref<256x576xf32, #tpu.memory_space<vmem>>, vector<256x64xf32>,
    %c2_40 = arith.constant 2 : index
    %c2_41 = arith.constant 2 : index
    %c0_42 = arith.constant 0 : index
    %29 = vector.load %arg7[%c2_40, %c2_41, %c0_42] : memref<18x18x64xf32, #tpu.memory_space<vmem>>, vector<16x16x64xf32>
    %30 = vector.shape_cast %29 : vector<16x16x64xf32> to vector<256x64xf32>
    %c0_43 = arith.constant 0 : index
    %c512 = arith.constant 512 : index
    %31 = vector.load %arg8[%c0_43, %c512] : memref<256x576xf32, #tpu.memory_space<vmem>>, vector<256x64xf32>
    tpu.vector_store %arg8[%c0_43, %c512], %30 {strides = array<i32>} : memref<256x576xf32, #tpu.memory_space<vmem>>, vector<256x64xf32>,
    %c0_44 = arith.constant 0 : index
    %c0_45 = arith.constant 0 : index
    %32 = vector.load %arg8[%c0_44, %c0_45] : memref<256x576xf32, #tpu.memory_space<vmem>>, vector<256x576xf32>
    %c0_46 = arith.constant 0 : index
    %c0_47 = arith.constant 0 : index
    %33 = vector.load %arg2[%c0_46, %c0_47] : memref<576x64xf32, #tpu.memory_space<vmem>>, vector<576x64xf32>
    %cst_48 = arith.constant dense<0.000000e+00> : vector<256x64xf32>
    %34 = tpu.matmul %32, %33, %cst_48 {dimension_numbers = #tpu.dot_dimension_numbers<[1], [0], [0], [1], [0, 0, 1, 1], [], []>} : vector<256x576xf32>, vector<576x64xf32>, vector<256x64xf32> -> vector<256x64xf32>
    %c0_49 = arith.constant 0 : index
    %c0_50 = arith.constant 0 : index
    %35 = vector.load %arg3[%c0_49, %c0_50] : memref<1x64xf32, #tpu.memory_space<vmem>>, vector<1x64xf32>
    %36 = vector.broadcast %35 : vector<1x64xf32> to vector<256x64xf32>
    %37 = arith.addf %34, %36 : vector<256x64xf32>
    %c0_51 = arith.constant 0 : index
    %c0_52 = arith.constant 0 : index
    %c0_53 = arith.constant 0 : index
    %c0_54 = arith.constant 0 : index
    %38 = vector.load %arg1[%c0_51, %c0_52, %c0_53, %c0_54] : memref<1x16x16x64xf32, #tpu.memory_space<vmem>>, vector<1x16x16x64xf32>
    %39 = vector.shape_cast %38 : vector<1x16x16x64xf32> to vector<16x16x64xf32>
    %40 = vector.shape_cast %39 : vector<16x16x64xf32> to vector<256x64xf32>
    %41 = arith.addf %40, %37 : vector<256x64xf32>
    %cst_55 = arith.constant 0.000000e+00 : f32
    %42 = vector.broadcast %cst_55 : f32 to vector<256x64xf32>
    %43 = arith.maximumf %41, %42 : vector<256x64xf32>
    %44 = vector.shape_cast %43 : vector<256x64xf32> to vector<16x16x64xf32>
    %c1_56 = arith.constant 1 : index
    %c1_57 = arith.constant 1 : index
    %c0_58 = arith.constant 0 : index
    %45 = vector.load %arg7[%c1_56, %c1_57, %c0_58] : memref<18x18x64xf32, #tpu.memory_space<vmem>>, vector<16x16x64xf32>
    tpu.vector_store %arg7[%c1_56, %c1_57, %c0_58], %44 {strides = array<i32>} : memref<18x18x64xf32, #tpu.memory_space<vmem>>, vector<16x16x64xf32>,
    %c0_59 = arith.constant 0 : index
    %c0_60 = arith.constant 0 : index
    %c0_61 = arith.constant 0 : index
    %46 = vector.load %arg7[%c0_59, %c0_60, %c0_61] : memref<18x18x64xf32, #tpu.memory_space<vmem>>, vector<16x16x64xf32>
    %47 = vector.shape_cast %46 : vector<16x16x64xf32> to vector<256x64xf32>
    %c0_62 = arith.constant 0 : index
    %c0_63 = arith.constant 0 : index
    %48 = vector.load %arg8[%c0_62, %c0_63] : memref<256x576xf32, #tpu.memory_space<vmem>>, vector<256x64xf32>
    tpu.vector_store %arg8[%c0_62, %c0_63], %47 {strides = array<i32>} : memref<256x576xf32, #tpu.memory_space<vmem>>, vector<256x64xf32>,
    %c0_64 = arith.constant 0 : index
    %c1_65 = arith.constant 1 : index
    %c0_66 = arith.constant 0 : index
    %49 = vector.load %arg7[%c0_64, %c1_65, %c0_66] : memref<18x18x64xf32, #tpu.memory_space<vmem>>, vector<16x16x64xf32>
    %50 = vector.shape_cast %49 : vector<16x16x64xf32> to vector<256x64xf32>
    %c0_67 = arith.constant 0 : index
    %c64_68 = arith.constant 64 : index
    %51 = vector.load %arg8[%c0_67, %c64_68] : memref<256x576xf32, #tpu.memory_space<vmem>>, vector<256x64xf32>
    tpu.vector_store %arg8[%c0_67, %c64_68], %50 {strides = array<i32>} : memref<256x576xf32, #tpu.memory_space<vmem>>, vector<256x64xf32>,
    %c0_69 = arith.constant 0 : index
    %c2_70 = arith.constant 2 : index
    %c0_71 = arith.constant 0 : index
    %52 = vector.load %arg7[%c0_69, %c2_70, %c0_71] : memref<18x18x64xf32, #tpu.memory_space<vmem>>, vector<16x16x64xf32>
    %53 = vector.shape_cast %52 : vector<16x16x64xf32> to vector<256x64xf32>
    %c0_72 = arith.constant 0 : index
    %c128_73 = arith.constant 128 : index
    %54 = vector.load %arg8[%c0_72, %c128_73] : memref<256x576xf32, #tpu.memory_space<vmem>>, vector<256x64xf32>
    tpu.vector_store %arg8[%c0_72, %c128_73], %53 {strides = array<i32>} : memref<256x576xf32, #tpu.memory_space<vmem>>, vector<256x64xf32>,
    %c1_74 = arith.constant 1 : index
    %c0_75 = arith.constant 0 : index
    %c0_76 = arith.constant 0 : index
    %55 = vector.load %arg7[%c1_74, %c0_75, %c0_76] : memref<18x18x64xf32, #tpu.memory_space<vmem>>, vector<16x16x64xf32>
    %56 = vector.shape_cast %55 : vector<16x16x64xf32> to vector<256x64xf32>
    %c0_77 = arith.constant 0 : index
    %c192_78 = arith.constant 192 : index
    %57 = vector.load %arg8[%c0_77, %c192_78] : memref<256x576xf32, #tpu.memory_space<vmem>>, vector<256x64xf32>
    tpu.vector_store %arg8[%c0_77, %c192_78], %56 {strides = array<i32>} : memref<256x576xf32, #tpu.memory_space<vmem>>, vector<256x64xf32>,
    %c1_79 = arith.constant 1 : index
    %c1_80 = arith.constant 1 : index
    %c0_81 = arith.constant 0 : index
    %58 = vector.load %arg7[%c1_79, %c1_80, %c0_81] : memref<18x18x64xf32, #tpu.memory_space<vmem>>, vector<16x16x64xf32>
    %59 = vector.shape_cast %58 : vector<16x16x64xf32> to vector<256x64xf32>
    %c0_82 = arith.constant 0 : index
    %c256_83 = arith.constant 256 : index
    %60 = vector.load %arg8[%c0_82, %c256_83] : memref<256x576xf32, #tpu.memory_space<vmem>>, vector<256x64xf32>
    tpu.vector_store %arg8[%c0_82, %c256_83], %59 {strides = array<i32>} : memref<256x576xf32, #tpu.memory_space<vmem>>, vector<256x64xf32>,
    %c1_84 = arith.constant 1 : index
    %c2_85 = arith.constant 2 : index
    %c0_86 = arith.constant 0 : index
    %61 = vector.load %arg7[%c1_84, %c2_85, %c0_86] : memref<18x18x64xf32, #tpu.memory_space<vmem>>, vector<16x16x64xf32>
    %62 = vector.shape_cast %61 : vector<16x16x64xf32> to vector<256x64xf32>
    %c0_87 = arith.constant 0 : index
    %c320_88 = arith.constant 320 : index
    %63 = vector.load %arg8[%c0_87, %c320_88] : memref<256x576xf32, #tpu.memory_space<vmem>>, vector<256x64xf32>
    tpu.vector_store %arg8[%c0_87, %c320_88], %62 {strides = array<i32>} : memref<256x576xf32, #tpu.memory_space<vmem>>, vector<256x64xf32>,
    %c2_89 = arith.constant 2 : index
    %c0_90 = arith.constant 0 : index
    %c0_91 = arith.constant 0 : index
    %64 = vector.load %arg7[%c2_89, %c0_90, %c0_91] : memref<18x18x64xf32, #tpu.memory_space<vmem>>, vector<16x16x64xf32>
    %65 = vector.shape_cast %64 : vector<16x16x64xf32> to vector<256x64xf32>
    %c0_92 = arith.constant 0 : index
    %c384_93 = arith.constant 384 : index
    %66 = vector.load %arg8[%c0_92, %c384_93] : memref<256x576xf32, #tpu.memory_space<vmem>>, vector<256x64xf32>
    tpu.vector_store %arg8[%c0_92, %c384_93], %65 {strides = array<i32>} : memref<256x576xf32, #tpu.memory_space<vmem>>, vector<256x64xf32>,
    %c2_94 = arith.constant 2 : index
    %c1_95 = arith.constant 1 : index
    %c0_96 = arith.constant 0 : index
    %67 = vector.load %arg7[%c2_94, %c1_95, %c0_96] : memref<18x18x64xf32, #tpu.memory_space<vmem>>, vector<16x16x64xf32>
    %68 = vector.shape_cast %67 : vector<16x16x64xf32> to vector<256x64xf32>
    %c0_97 = arith.constant 0 : index
    %c448_98 = arith.constant 448 : index
    %69 = vector.load %arg8[%c0_97, %c448_98] : memref<256x576xf32, #tpu.memory_space<vmem>>, vector<256x64xf32>
    tpu.vector_store %arg8[%c0_97, %c448_98], %68 {strides = array<i32>} : memref<256x576xf32, #tpu.memory_space<vmem>>, vector<256x64xf32>,
    %c2_99 = arith.constant 2 : index
    %c2_100 = arith.constant 2 : index
    %c0_101 = arith.constant 0 : index
    %70 = vector.load %arg7[%c2_99, %c2_100, %c0_101] : memref<18x18x64xf32, #tpu.memory_space<vmem>>, vector<16x16x64xf32>
    %71 = vector.shape_cast %70 : vector<16x16x64xf32> to vector<256x64xf32>
    %c0_102 = arith.constant 0 : index
    %c512_103 = arith.constant 512 : index
    %72 = vector.load %arg8[%c0_102, %c512_103] : memref<256x576xf32, #tpu.memory_space<vmem>>, vector<256x64xf32>
    tpu.vector_store %arg8[%c0_102, %c512_103], %71 {strides = array<i32>} : memref<256x576xf32, #tpu.memory_space<vmem>>, vector<256x64xf32>,
    %c0_104 = arith.constant 0 : index
    %c0_105 = arith.constant 0 : index
    %73 = vector.load %arg8[%c0_104, %c0_105] : memref<256x576xf32, #tpu.memory_space<vmem>>, vector<256x576xf32>
    %c0_106 = arith.constant 0 : index
    %c0_107 = arith.constant 0 : index
    %74 = vector.load %arg4[%c0_106, %c0_107] : memref<576x64xf32, #tpu.memory_space<vmem>>, vector<576x64xf32>
    %cst_108 = arith.constant dense<0.000000e+00> : vector<256x64xf32>
    %75 = tpu.matmul %73, %74, %cst_108 {dimension_numbers = #tpu.dot_dimension_numbers<[1], [0], [0], [1], [0, 0, 1, 1], [], []>} : vector<256x576xf32>, vector<576x64xf32>, vector<256x64xf32> -> vector<256x64xf32>
    %c0_109 = arith.constant 0 : index
    %c0_110 = arith.constant 0 : index
    %76 = vector.load %arg5[%c0_109, %c0_110] : memref<1x64xf32, #tpu.memory_space<vmem>>, vector<1x64xf32>
    %77 = vector.broadcast %76 : vector<1x64xf32> to vector<256x64xf32>
    %78 = arith.addf %75, %77 : vector<256x64xf32>
    %79 = vector.shape_cast %78 : vector<256x64xf32> to vector<16x16x64xf32>
    %c0_111 = arith.constant 0 : index
    %c0_112 = arith.constant 0 : index
    %c0_113 = arith.constant 0 : index
    %c0_114 = arith.constant 0 : index
    %80 = vector.load %arg6[%c0_111, %c0_112, %c0_113, %c0_114] : memref<1x16x16x64xf32, #tpu.memory_space<vmem>>, vector<1x16x16x64xf32>
    %81 = vector.shape_cast %80 : vector<1x16x16x64xf32> to vector<16x16x64xf32>
    %82 = vector.shape_cast %79 : vector<16x16x64xf32> to vector<1x16x16x64xf32>
    tpu.vector_store %arg6[%c0_111, %c0_112, %c0_113, %c0_114], %82 {strides = array<i32>} : memref<1x16x16x64xf32, #tpu.memory_space<vmem>>, vector<1x16x16x64xf32>,
    return
  }
  func.func @transform_0(%arg0: i32) -> (i32, i32, i32, i32) {
    %c0_i32 = arith.constant 0 : i32
    %c0_i32_0 = arith.constant 0 : i32
    %c0_i32_1 = arith.constant 0 : i32
    %c0_i32_2 = arith.constant 0 : i32
    return %arg0, %c0_i32, %c0_i32_0, %c0_i32_1 : i32, i32, i32, i32
  }
  func.func @transform_1(%arg0: i32) -> (i32, i32) {
    %c0_i32 = arith.constant 0 : i32
    %c0_i32_0 = arith.constant 0 : i32
    %c0_i32_1 = arith.constant 0 : i32
    return %c0_i32, %c0_i32_0 : i32, i32
  }
  func.func @transform_2(%arg0: i32) -> (i32, i32) {
    %c0_i32 = arith.constant 0 : i32
    %c0_i32_0 = arith.constant 0 : i32
    %c0_i32_1 = arith.constant 0 : i32
    return %c0_i32, %c0_i32_0 : i32, i32
  }
  func.func @transform_3(%arg0: i32) -> (i32, i32) {
    %c0_i32 = arith.constant 0 : i32
    %c0_i32_0 = arith.constant 0 : i32
    %c0_i32_1 = arith.constant 0 : i32
    return %c0_i32, %c0_i32_0 : i32, i32
  }
  func.func @transform_4(%arg0: i32) -> (i32, i32) {
    %c0_i32 = arith.constant 0 : i32
    %c0_i32_0 = arith.constant 0 : i32
    %c0_i32_1 = arith.constant 0 : i32
    return %c0_i32, %c0_i32_0 : i32, i32
  }
  func.func @transform_5(%arg0: i32) -> (i32, i32, i32, i32) {
    %c0_i32 = arith.constant 0 : i32
    %c0_i32_0 = arith.constant 0 : i32
    %c0_i32_1 = arith.constant 0 : i32
    %c0_i32_2 = arith.constant 0 : i32
    return %arg0, %c0_i32, %c0_i32_0, %c0_i32_1 : i32, i32, i32, i32
  }
}

</mosaic_0001>

<bundles_post_ra>
// kernel: tpu_custom_call.1
= control target key start
LH: loop header
LB: loop body
LE: loop exit
PB: predicated region body
PF: predicated region fallthrough
CT: control target
= control target key end

     0   :  { %10 = vsyncpa [#allocation5], 0  ;;  %s8140_s0 = inlined_call_operand.vmem [shape: f32[2,16,16,64], index: 0, kind: input, shape index: {}]   ;;  %s8141_s1 = inlined_call_operand.vmem [shape: f32[576,64], index: 1, kind: input, shape index: {}]   ;;  %s8142_s2 = inlined_call_operand.vmem [shape: f32[1,64], index: 2, kind: input, shape index: {}]   ;;  %s8143_s3 = inlined_call_operand.vmem [shape: f32[576,64], index: 3, kind: input, shape index: {}]   ;;  %s8144_s4 = inlined_call_operand.vmem [shape: f32[1,64], index: 4, kind: input, shape index: {}]   ;;  %s8145_s5 = inlined_call_operand.hbm [shape: f32[2,16,16,64], index: 5, kind: output, shape index: {}]  }
   0x1   :  { %12 = vsyncpa [#allocation5 + $0x1], 0  ;;  %s5643_s18 = smov 0   ;;  %s5645_s19 = smov 0  }
   0x2   :  { %s5647_s20 = smov 0   ;;  %s5649_s21 = smov 0  }
   0x3 LB: > { %s5664_s22 = sadd.s32 4294967295, %s5605_s21   ;;  %s4778_s23 = sadd.s32 4294967294, %s5605_s21   ;;  %s5605_s21 = sphi %s5649_s21, %s8175_s21   ;;  %s5601_s20 = sphi %s5647_s20, %s8174_s20   ;;  %s5597_s19 = sphi %s5645_s19, %s8173_s19   ;;  %s5593_s18 = sphi %s5643_s18, %s8172_s18  }
   0x4   : > { %s5668_s24 = sadd.s32 1, %s5605_s21   ;;  %s135_s25 = sadd.s32 1, %s5601_s20 }
   0x5   : > { %s132_s26 = ssub.s32 %s5605_s21, %s5668_s24  ;;  %p145_p0 = scmp.ne.s32.totalorder %s5601_s20, %s5597_s19 }
   0x6   : > { %p133_p1 = scmp.eq.s32.totalorder %s132_s26, 0  ;;  %p146_p2 = scmp.eq.s32.totalorder %s5664_s22, 1 }
   0x7   : > { %p151_p3 = scmp.ne.s32.totalorder %s5597_s19, %s5593_s18  ;;  %p152_p4 = scmp.eq.s32.totalorder %s4778_s23, 1 }
   0x8   : > { %s5679_s27 = scalar_select %p133_p1, %s5601_s20, %s135_s25  }
   0x9   : > { %p5681_p5 = por %p146_p2, %p145_p0  ;;  %p5685_p6 = por %p152_p4, %p151_p3 }
   0xa   : > { %p4781_p7 = scmp.ge.s32.totalorder %s5605_s21, 1  ;;  %p190_p8 = scmp.lt.s32.totalorder %s5605_s21, 3 }
   0xc   : > { %p191_p9 = pnand %p4781_p7, %p190_p8 }
   0xe   : > { %194 = sbr.rel (%p191_p9) target bundleno = 1175 (0x497), region = 40 }
  0x15   : > { %p218_p10 = scmp.lt.s32.totalorder %s5664_s22, 1  ;;  %vm223_vm0 = vcmask 523264   ;;  %vm226_vm1 = vcmask 517120   ;;  %v5607_v0 = vmov 0.0   ;;  %v8146_v1 = vmov 0.0|0.0   ;;  %v1594_v2 = vld [vmem:[%s8141_s1] sm:$0xff] }
  0x16   : > { %228 = vst.msk [vmem:[#allocation2 + $0x18] sm:$0xff] %vm223_vm0, %v5607_v0  ;;  %229 = vst.msk [vmem:[#allocation2 + $0x20] sm:$0xff] %vm223_vm0, %v5607_v0  ;;  %5066 = vmatprep.subr.bf16.mxu0 %v8146_v1  ;;  %v1595_v3 = vld [vmem:[%s8141_s1 + $0x8] sm:$0xff]  ;;  %v1596_v4 = vld [vmem:[%s8141_s1 + $0x10] sm:$0xff]  ;;  %vm568_vm2 = vcmask 1048064   ;;  %s4857_s30 = sshll.u32 %s5664_s22, 12 }
  0x17   : > { %224 = vst.msk [vmem:[#allocation2] sm:$0xff] %vm223_vm0, %v5607_v0  ;;  %225 = vst.msk [vmem:[#allocation2 + $0x8] sm:$0xff] %vm223_vm0, %v5607_v0  ;;  %s219_s11 = scalar_select %p218_p10, %s5664_s22, 1  ;;  %v5067_v5 = vpack.c.bf16 %v1595_v3, %v1594_v2  ;;  %v1597_v6 = vld [vmem:[%s8141_s1 + $0x18] sm:$0xff]  ;;  %v1598_v8 = vld [vmem:[%s8141_s1 + $0x20] sm:$0xff] }
  0x18   : > { %231 = vst.msk [vmem:[#allocation2 + $0x30] sm:$0xff] %vm223_vm0, %v5607_v0  ;;  %232 = vst.msk [vmem:[#allocation2 + $0x38] sm:$0xff] %vm223_vm0, %v5607_v0  ;;  %v5070_v7 = vpack.c.bf16 %v1597_v6, %v1596_v4  ;;  %v1599_v9 = vld [vmem:[%s8141_s1 + $0x28] sm:$0xff]  ;;  %v1600_v18 = vld [vmem:[%s8141_s1 + $0x30] sm:$0xff]  ;;  %s8089_s9 = scalar_lea.hbm %s8145_s5, %s4857_s30 }
  0x19   : > { %234 = vst.msk [vmem:[#allocation2 + $0x48] sm:$0xff] %vm223_vm0, %v5607_v0  ;;  %235 = vst.msk [vmem:[#allocation2 + $0x50] sm:$0xff] %vm223_vm0, %v5607_v0  ;;  %s4856_s14 = sshll.u32 %s219_s11, 8  ;;  %5068 = vmatpush1.bf16.msra.mxu0 %v5067_v5  ;;  %v5073_v17 = vpack.c.bf16 %v1599_v9, %v1598_v8  ;;  %v1601_v19 = vld [vmem:[%s8141_s1 + $0x38] sm:$0xff]  ;;  %v1602_v29 = vld [vmem:[%s8141_s1 + $0x40] sm:$0xff]  ;;  %s5610_s11 = smov [#allocation4]  }
  0x1a   : > { %237 = vst.msk [vmem:[#allocation2 + $0x60] sm:$0xff] %vm223_vm0, %v5607_v0  ;;  %238 = vst.msk [vmem:[#allocation2 + $0x68] sm:$0xff] %vm223_vm0, %v5607_v0  ;;  %s5765_s17 = scalar_lea.vmem %s8140_s0, %s4856_s14  ;;  %5069 = vmatprep.subr.bf16.mxu0 %v8146_v1  ;;  %v1603_v30 = vld [vmem:[%s8141_s1 + $0x48] sm:$0xff]  ;;  %v5076_v33 = vpack.c.bf16 %v1601_v19, %v1600_v18  ;;  %s5609_s14 = smov 64   ;;  %v1604_v48 = vld [vmem:[%s8141_s1 + $0x50] sm:$0xff] }
  0x1b   : > { %240 = vst.msk [vmem:[#allocation2 + $0x78] sm:$0xff] %vm223_vm0, %v5607_v0  ;;  %241 = vst.msk [vmem:[#allocation2 + $0x80] sm:$0xff] %vm223_vm0, %v5607_v0  ;;  %v279_v10 = vld [vmem:[%s5765_s17] sm:$0xff]  ;;  %v280_v11 = vld [vmem:[%s5765_s17 + $0x8] sm:$0xff]  ;;  %v5079_v46 = vpack.c.bf16 %v1603_v30, %v1602_v29 }
  0x1c   : > { %243 = vst.msk [vmem:[#allocation2 + $0x90] sm:$0xff] %vm223_vm0, %v5607_v0  ;;  %244 = vst.msk [vmem:[#allocation2 + $0x98] sm:$0xff] %vm223_vm0, %v5607_v0  ;;  %v281_v12 = vld [vmem:[%s5765_s17 + $0x10] sm:$0xff]  ;;  %v282_v13 = vld [vmem:[%s5765_s17 + $0x18] sm:$0xff] }
  0x1d   : > { %246 = vst.msk [vmem:[#allocation2 + $0xa8] sm:$0xff] %vm223_vm0, %v5607_v0  ;;  %247 = vst.msk [vmem:[#allocation2 + $0xb0] sm:$0xff] %vm223_vm0, %v5607_v0  ;;  %v283_v14 = vld [vmem:[%s5765_s17 + $0x20] sm:$0xff]  ;;  %v284_v15 = vld [vmem:[%s5765_s17 + $0x28] sm:$0xff]  ;;  %5071 = vmatpush1.bf16.msra.mxu0 %v5070_v7 }
  0x1e   : > { %249 = vst.msk [vmem:[#allocation2 + $0xc0] sm:$0xff] %vm223_vm0, %v5607_v0  ;;  %250 = vst.msk [vmem:[#allocation2 + $0xc8] sm:$0xff] %vm223_vm0, %v5607_v0  ;;  %v285_v16 = vld [vmem:[%s5765_s17 + $0x30] sm:$0xff]  ;;  %v286_v20 = vld [vmem:[%s5765_s17 + $0x38] sm:$0xff]  ;;  %5072 = vmatprep.subr.bf16.mxu0 %v8146_v1 }
  0x1f   : > { %252 = vst.msk [vmem:[#allocation2 + $0xd8] sm:$0xff] %vm223_vm0, %v5607_v0  ;;  %253 = vst.msk [vmem:[#allocation2 + $0xe0] sm:$0xff] %vm223_vm0, %v5607_v0  ;;  %v287_v21 = vld [vmem:[%s5765_s17 + $0x40] sm:$0xff]  ;;  %v288_v22 = vld [vmem:[%s5765_s17 + $0x48] sm:$0xff] }
  0x20   : > { %255 = vst.msk [vmem:[#allocation2 + $0xf0] sm:$0xff] %vm223_vm0, %v5607_v0  ;;  %256 = vst.msk [vmem:[#allocation2 + $0xf8] sm:$0xff] %vm223_vm0, %v5607_v0  ;;  %v289_v23 = vld [vmem:[%s5765_s17 + $0x50] sm:$0xff]  ;;  %v290_v24 = vld [vmem:[%s5765_s17 + $0x58] sm:$0xff] }
  0x21   : > { %258 = vst.msk [vmem:[#allocation2 + $0x108] sm:$0xff] %vm223_vm0, %v5607_v0  ;;  %259 = vst.msk [vmem:[#allocation2 + $0x110] sm:$0xff] %vm223_vm0, %v5607_v0  ;;  %v291_v25 = vld [vmem:[%s5765_s17 + $0x60] sm:$0xff]  ;;  %v292_v26 = vld [vmem:[%s5765_s17 + $0x68] sm:$0xff]  ;;  %5074 = vmatpush1.bf16.msra.mxu0 %v5073_v17 }
  0x22   : > { %261 = vst.msk [vmem:[#allocation2 + $0x120] sm:$0xff] %vm223_vm0, %v5607_v0  ;;  %262 = vst.msk [vmem:[#allocation2 + $0x128] sm:$0xff] %vm223_vm0, %v5607_v0  ;;  %v293_v27 = vld [vmem:[%s5765_s17 + $0x70] sm:$0xff]  ;;  %v294_v28 = vld [vmem:[%s5765_s17 + $0x78] sm:$0xff]  ;;  %5075 = vmatprep.subr.bf16.mxu0 %v8146_v1 }
  0x23   : > { %264 = vst.msk [vmem:[#allocation2 + $0x138] sm:$0xff] %vm223_vm0, %v5607_v0  ;;  %265 = vst.msk [vmem:[#allocation2 + $0x140] sm:$0xff] %vm223_vm0, %v5607_v0  ;;  %v295_v31 = vld [vmem:[%s5765_s17 + $0x80] sm:$0xff]  ;;  %v296_v32 = vld [vmem:[%s5765_s17 + $0x88] sm:$0xff] }
  0x24   : > { %267 = vst.msk [vmem:[#allocation2 + $0x150] sm:$0xff] %vm223_vm0, %v5607_v0  ;;  %268 = vst.msk [vmem:[#allocation2 + $0x158] sm:$0xff] %vm223_vm0, %v5607_v0  ;;  %v297_v34 = vld [vmem:[%s5765_s17 + $0x90] sm:$0xff]  ;;  %v298_v35 = vld [vmem:[%s5765_s17 + $0x98] sm:$0xff] }
  0x25   : > { %270 = vst.msk [vmem:[#allocation2 + $0x168] sm:$0xff] %vm223_vm0, %v5607_v0  ;;  %271 = vst.msk [vmem:[#allocation2 + $0x170] sm:$0xff] %vm223_vm0, %v5607_v0  ;;  %v299_v36 = vld [vmem:[%s5765_s17 + $0xa0] sm:$0xff]  ;;  %v300_v37 = vld [vmem:[%s5765_s17 + $0xa8] sm:$0xff]  ;;  %5077 = vmatpush1.bf16.msra.mxu0 %v5076_v33 }
  0x26   : > { %273 = vst.msk [vmem:[#allocation2 + $0x180] sm:$0xff] %vm223_vm0, %v5607_v0  ;;  %274 = vst.msk [vmem:[#allocation2 + $0x188] sm:$0xff] %vm223_vm0, %v5607_v0  ;;  %v408_v41 = vld [vmem:[#allocation2 + $0x1] sm:$0xff]  ;;  %5078 = vmatprep.subr.bf16.mxu0 %v8146_v1  ;;  %v1605_v49 = vld [vmem:[%s8141_s1 + $0x58] sm:$0xff] }
  0x27   : > { %276 = vst.msk [vmem:[#allocation2 + $0x198] sm:$0xff] %vm223_vm0, %v5607_v0  ;;  %277 = vst.msk [vmem:[#allocation2 + $0x1a0] sm:$0xff] %vm223_vm0, %v5607_v0  ;;  %v5082_v56 = vpack.c.bf16 %v1605_v49, %v1604_v48  ;;  %v1606_v58 = vld [vmem:[%s8141_s1 + $0x60] sm:$0xff]  ;;  %v1607_v59 = vld [vmem:[%s8141_s1 + $0x68] sm:$0xff] }
  0x28   : > { %230 = vst.msk [vmem:[#allocation2 + $0x28] sm:$0x3] %vm226_vm1, %v5607_v0  ;;  %227 = vst.msk [vmem:[#allocation2 + $0x10] sm:$0x3] %vm226_vm1, %v5607_v0  ;;  %v5085_v3 = vpack.c.bf16 %v1607_v59, %v1606_v58  ;;  %v1608_v7 = vld [vmem:[%s8141_s1 + $0x70] sm:$0xff]  ;;  %v1609_v9 = vld [vmem:[%s8141_s1 + $0x78] sm:$0xff] }
  0x29   : > { %233 = vst.msk [vmem:[#allocation2 + $0x40] sm:$0x3] %vm226_vm1, %v5607_v0  ;;  %236 = vst.msk [vmem:[#allocation2 + $0x58] sm:$0x3] %vm226_vm1, %v5607_v0  ;;  %5080 = vmatpush1.bf16.msra.mxu0 %v5079_v46  ;;  %v304_v19 = vld [vmem:[%s5765_s17 + $0xc8] sm:$0xff]  ;;  %v1614_v29 = vld [vmem:[%s8141_s1 + $0xa0] sm:$0xff] }
  0x2a   : > { %239 = vst.msk [vmem:[#allocation2 + $0x70] sm:$0x3] %vm226_vm1, %v5607_v0  ;;  %242 = vst.msk [vmem:[#allocation2 + $0x88] sm:$0x3] %vm226_vm1, %v5607_v0  ;;  %5081 = vmatprep.subr.bf16.mxu0 %v8146_v1  ;;  %v1615_v30 = vld [vmem:[%s8141_s1 + $0xa8] sm:$0xff] }
  0x2b   : > { %245 = vst.msk [vmem:[#allocation2 + $0xa0] sm:$0x3] %vm226_vm1, %v5607_v0  ;;  %248 = vst.msk [vmem:[#allocation2 + $0xb8] sm:$0x3] %vm226_vm1, %v5607_v0 }
  0x2c   : > { %251 = vst.msk [vmem:[#allocation2 + $0xd0] sm:$0x3] %vm226_vm1, %v5607_v0  ;;  %254 = vst.msk [vmem:[#allocation2 + $0xe8] sm:$0x3] %vm226_vm1, %v5607_v0 }
  0x2d   : > { %257 = vst.msk [vmem:[#allocation2 + $0x100] sm:$0x3] %vm226_vm1, %v5607_v0  ;;  %260 = vst.msk [vmem:[#allocation2 + $0x118] sm:$0x3] %vm226_vm1, %v5607_v0  ;;  %5083 = vmatpush1.bf16.msra.mxu0 %v5082_v56  ;;  %v1621_v56 = vld [vmem:[%s8141_s1 + $0xd8] sm:$0xff] }
  0x2e   : > { %263 = vst.msk [vmem:[#allocation2 + $0x130] sm:$0x3] %vm226_vm1, %v5607_v0  ;;  %266 = vst.msk [vmem:[#allocation2 + $0x148] sm:$0x3] %vm226_vm1, %v5607_v0  ;;  %5084 = vmatprep.subr.bf16.mxu0 %v8146_v1 }
  0x2f   : > { %269 = vst.msk [vmem:[#allocation2 + $0x160] sm:$0x3] %vm226_vm1, %v5607_v0  ;;  %272 = vst.msk [vmem:[#allocation2 + $0x178] sm:$0x3] %vm226_vm1, %v5607_v0  ;;  %v409_v43 = vld [vmem:[#allocation2 + $0x9] sm:$0xff] }
  0x30   : > { %275 = vst.msk [vmem:[#allocation2 + $0x190] sm:$0x3] %vm226_vm1, %v5607_v0  ;;  %278 = vst.msk [vmem:[#allocation2 + $0x1a8] sm:$0x3] %vm226_vm1, %v5607_v0 }
  0x31   : > { %312 = vst.msk [vmem:[#allocation2 + $0x19] sm:$0xff] %vm223_vm0, %v279_v10  ;;  %313 = vst.msk [vmem:[#allocation2 + $0x21] sm:$0xff] %vm223_vm0, %v280_v11  ;;  %5086 = vmatpush1.bf16.msra.mxu0 %v5085_v3  ;;  %v301_v10 = vld [vmem:[%s5765_s17 + $0xb0] sm:$0xff]  ;;  %v5088_v11 = vpack.c.bf16 %v1609_v9, %v1608_v7 }
  0x32   : > { %314 = vst.msk [vmem:[#allocation2 + $0x31] sm:$0xff] %vm223_vm0, %v281_v12  ;;  %315 = vst.msk [vmem:[#allocation2 + $0x39] sm:$0xff] %vm223_vm0, %v282_v13  ;;  %5087 = vmatprep.subr.bf16.mxu0 %v8146_v1  ;;  %v1610_v12 = vld [vmem:[%s8141_s1 + $0x80] sm:$0xff]  ;;  %v1611_v13 = vld [vmem:[%s8141_s1 + $0x88] sm:$0xff] }
  0x33   : > { %316 = vst.msk [vmem:[#allocation2 + $0x49] sm:$0xff] %vm223_vm0, %v283_v14  ;;  %317 = vst.msk [vmem:[#allocation2 + $0x51] sm:$0xff] %vm223_vm0, %v284_v15  ;;  %v302_v14 = vld [vmem:[%s5765_s17 + $0xb8] sm:$0xff]  ;;  %v303_v15 = vld [vmem:[%s5765_s17 + $0xc0] sm:$0xff]  ;;  %v5091_v18 = vpack.c.bf16 %v1611_v13, %v1610_v12 }
  0x34   : > { %318 = vst.msk [vmem:[#allocation2 + $0x61] sm:$0xff] %vm223_vm0, %v285_v16  ;;  %319 = vst.msk [vmem:[#allocation2 + $0x69] sm:$0xff] %vm223_vm0, %v286_v20  ;;  %v601_v16 = vld [vmem:[#allocation2 + $0x2] sm:$0xff]  ;;  %v1612_v20 = vld [vmem:[%s8141_s1 + $0x90] sm:$0xff] }
  0x35   : > { %320 = vst.msk [vmem:[#allocation2 + $0x79] sm:$0xff] %vm223_vm0, %v287_v21  ;;  %321 = vst.msk [vmem:[#allocation2 + $0x81] sm:$0xff] %vm223_vm0, %v288_v22  ;;  %5089 = vmatpush1.bf16.msra.mxu0 %v5088_v11  ;;  %v1613_v21 = vld [vmem:[%s8141_s1 + $0x98] sm:$0xff]  ;;  %v305_v22 = vld [vmem:[%s5765_s17 + $0xd0] sm:$0xff] }
  0x36   : > { %322 = vst.msk [vmem:[#allocation2 + $0x91] sm:$0xff] %vm223_vm0, %v289_v23  ;;  %323 = vst.msk [vmem:[#allocation2 + $0x99] sm:$0xff] %vm223_vm0, %v290_v24  ;;  %5090 = vmatprep.subr.bf16.mxu0 %v8146_v1  ;;  %v306_v23 = vld [vmem:[%s5765_s17 + $0xd8] sm:$0xff]  ;;  %v307_v24 = vld [vmem:[%s5765_s17 + $0xe0] sm:$0xff] }
  0x37   : > { %324 = vst.msk [vmem:[#allocation2 + $0xa9] sm:$0xff] %vm223_vm0, %v291_v25  ;;  %325 = vst.msk [vmem:[#allocation2 + $0xb1] sm:$0xff] %vm223_vm0, %v292_v26  ;;  %v602_v25 = vld [vmem:[#allocation2 + $0xa] sm:$0xff] }
  0x38   : > { %326 = vst.msk [vmem:[#allocation2 + $0xc1] sm:$0xff] %vm223_vm0, %v293_v27  ;;  %327 = vst.msk [vmem:[#allocation2 + $0xc9] sm:$0xff] %vm223_vm0, %v294_v28  ;;  %v665_v38 = vld [vmem:[#allocation2 + $0x18] sm:$0xff]  ;;  %v666_v39 = vld [vmem:[#allocation2 + $0x20] sm:$0xff]  ;;  %v5094_v27 = vpack.c.bf16 %v1613_v21, %v1612_v20 }
  0x39   : > { %328 = vst.msk [vmem:[#allocation2 + $0xd9] sm:$0xff] %vm223_vm0, %v295_v31  ;;  %329 = vst.msk [vmem:[#allocation2 + $0xe1] sm:$0xff] %vm223_vm0, %v296_v32  ;;  %v667_v40 = vld [vmem:[#allocation2 + $0x30] sm:$0xff]  ;;  %729 = vrot.lane.b32.xlu0 %v665_v38, %s5609_s14  ;;  %731 = vrot.lane.b32.xlu1 %v666_v39, %s5609_s14  ;;  %v668_v42 = vld [vmem:[#allocation2 + $0x38] sm:$0xff] }
  0x3a   : > { %330 = vst.msk [vmem:[#allocation2 + $0xf1] sm:$0xff] %vm223_vm0, %v297_v34  ;;  %331 = vst.msk [vmem:[#allocation2 + $0xf9] sm:$0xff] %vm223_vm0, %v298_v35  ;;  %v5837_v44 = vld [vmem:[#allocation2 + $0x48] sm:$0xff]  ;;  %v5839_v45 = vld [vmem:[#allocation2 + $0x50] sm:$0xff]  ;;  %5092 = vmatpush1.bf16.msra.mxu0 %v5091_v18  ;;  %v5097_v34 = vpack.c.bf16 %v1615_v30, %v1614_v29 }
  0x3b   : > { %332 = vst.msk [vmem:[#allocation2 + $0x109] sm:$0xff] %vm223_vm0, %v299_v36  ;;  %333 = vst.msk [vmem:[#allocation2 + $0x111] sm:$0xff] %vm223_vm0, %v300_v37  ;;  %v5842_v47 = vld [vmem:[#allocation2 + $0x60] sm:$0xff]  ;;  %v5855_v50 = vld [vmem:[#allocation2 + $0x68] sm:$0xff]  ;;  %5093 = vmatprep.subr.bf16.mxu0 %v8146_v1 }
  0x3c   : > { %378 = vst.msk [vmem:[#allocation3 + $0x50] sm:$0xff] %vm223_vm0, %v665_v38  ;;  %379 = vst.msk [vmem:[#allocation3 + $0x78] sm:$0xff] %vm223_vm0, %v666_v39  ;;  %v5857_v51 = vld [vmem:[#allocation2 + $0x78] sm:$0xff]  ;;  %v5863_v52 = vld [vmem:[#allocation2 + $0x80] sm:$0xff] }
  0x3d   : > { %380 = vst.msk [vmem:[#allocation3 + $0xa0] sm:$0xff] %vm223_vm0, %v667_v40  ;;  %381 = vst.msk [vmem:[#allocation3 + $0xc8] sm:$0xff] %vm223_vm0, %v668_v42  ;;  %472 = vrot.lane.b32.xlu0 %v408_v41, %s5609_s14  ;;  %474 = vrot.lane.b32.xlu1 %v409_v43, %s5609_s14  ;;  %v410_v53 = vld [vmem:[#allocation2 + $0x19] sm:$0xff]  ;;  %v5869_v54 = vld [vmem:[#allocation2 + $0x90] sm:$0xff] }
  0x3e   : > { %382 = vst.msk [vmem:[#allocation3 + $0xf0] sm:$0xff] %vm223_vm0, %v5837_v44  ;;  %383 = vst.msk [vmem:[#allocation3 + $0x118] sm:$0xff] %vm223_vm0, %v5839_v45  ;;  %v5871_v55 = vld [vmem:[#allocation2 + $0x98] sm:$0xff]  ;;  %v5875_v57 = vld [vmem:[#allocation2 + $0xa8] sm:$0xff]  ;;  %5095 = vmatpush1.bf16.msra.mxu0 %v5094_v27 }
  0x3f   : > { %384 = vst.msk [vmem:[#allocation3 + $0x140] sm:$0xff] %vm223_vm0, %v5842_v47  ;;  %385 = vst.msk [vmem:[#allocation3 + $0x168] sm:$0xff] %vm223_vm0, %v5855_v50  ;;  %v5888_v60 = vld [vmem:[#allocation2 + $0xb0] sm:$0xff]  ;;  %v5890_v61 = vld [vmem:[#allocation2 + $0xc0] sm:$0xff]  ;;  %5096 = vmatprep.subr.bf16.mxu0 %v8146_v1 }
  0x40   : > { %386 = vst.msk [vmem:[#allocation3 + $0x190] sm:$0xff] %vm223_vm0, %v5857_v51  ;;  %387 = vst.msk [vmem:[#allocation3 + $0x1b8] sm:$0xff] %vm223_vm0, %v5863_v52  ;;  %v5896_v62 = vld [vmem:[#allocation2 + $0xc8] sm:$0xff]  ;;  %v5902_v0 = vld [vmem:[#allocation2 + $0xd8] sm:$0xff] }
  0x41   : > { %388 = vst.msk [vmem:[#allocation3 + $0x1e0] sm:$0xff] %vm223_vm0, %v5869_v54  ;;  %389 = vst.msk [vmem:[#allocation3 + $0x208] sm:$0xff] %vm223_vm0, %v5871_v55  ;;  %733 = vrot.lane.b32.xlu0 %v667_v40, %s5609_s14  ;;  %476 = vrot.lane.b32.xlu1 %v410_v53, %s5609_s14  ;;  %v411_v63 = vld [vmem:[#allocation2 + $0x21] sm:$0xff]  ;;  %v5908_v4 = vld [vmem:[#allocation2 + $0xf0] sm:$0xff] }
  0x42   : > { %390 = vst.msk [vmem:[#allocation3 + $0x230] sm:$0xff] %vm223_vm0, %v5875_v57  ;;  %391 = vst.msk [vmem:[#allocation3 + $0x258] sm:$0xff] %vm223_vm0, %v5888_v60  ;;  %v5904_v2 = vld [vmem:[#allocation2 + $0xe0] sm:$0xff]  ;;  %v5915_v5 = vld [vmem:[#allocation2 + $0xf8] sm:$0xff]  ;;  %5098 = vmatpush1.bf16.msra.mxu0 %v5097_v34 }
  0x43   : > { %392 = vst.msk [vmem:[#allocation3 + $0x280] sm:$0xff] %vm223_vm0, %v5890_v61  ;;  %393 = vst.msk [vmem:[#allocation3 + $0x2a8] sm:$0xff] %vm223_vm0, %v5896_v62  ;;  %v5917_v6 = vld [vmem:[#allocation2 + $0x108] sm:$0xff]  ;;  %v5930_v8 = vld [vmem:[#allocation2 + $0x31] sm:$0xff]  ;;  %5099 = vmatprep.subr.bf16.mxu0 %v8146_v1 }
  0x44   : > { %394 = vst.msk [vmem:[#allocation3 + $0x2d0] sm:$0xff] %vm223_vm0, %v5902_v0  ;;  %395 = vst.msk [vmem:[#allocation3 + $0x2f8] sm:$0xff] %vm223_vm0, %v5904_v2  ;;  %v5951_v17 = vld [vmem:[#allocation2 + $0x39] sm:$0xff]  ;;  %v5973_v26 = vld [vmem:[#allocation2 + $0x49] sm:$0xff] }
  0x45   : > { %396 = vst.msk [vmem:[#allocation3 + $0x320] sm:$0xff] %vm223_vm0, %v5908_v4  ;;  %735 = vrot.lane.b32.xlu0 %v668_v42, %s5609_s14  ;;  %478 = vrot.lane.b32.xlu1 %v411_v63, %s5609_s14  ;;  %397 = vst.msk [vmem:[#allocation3 + $0x348] sm:$0xff] %vm223_vm0, %v5915_v5  ;;  %v344_v28 = vld [vmem:[#allocation2] sm:$0xff]  ;;  %v308_v31 = vld [vmem:[%s5765_s17 + $0xe8] sm:$0xff] }
  0x46   : > { %398 = vst.msk [vmem:[#allocation3 + $0x370] sm:$0xff] %vm223_vm0, %v5917_v6  ;;  %334 = vst.msk [vmem:[#allocation2 + $0x121] sm:$0xff] %vm223_vm0, %v301_v10  ;;  %v345_v32 = vld [vmem:[#allocation2 + $0x8] sm:$0xff]  ;;  %v5992_v33 = vld [vmem:[#allocation2 + $0x51] sm:$0xff] }
  0x47   : > { %335 = vst.msk [vmem:[#allocation2 + $0x129] sm:$0xff] %vm223_vm0, %v302_v14  ;;  %336 = vst.msk [vmem:[#allocation2 + $0x139] sm:$0xff] %vm223_vm0, %v303_v15  ;;  %v1616_v35 = vld [vmem:[%s8141_s1 + $0xb0] sm:$0xff]  ;;  %v1617_v36 = vld [vmem:[%s8141_s1 + $0xb8] sm:$0xff] }
  0x48   : > { %633 = vst.msk [vmem:[#allocation3 + $0x8] sm:$0xff] %vm223_vm0, %v601_v16  ;;  %337 = vst.msk [vmem:[#allocation2 + $0x141] sm:$0xff] %vm223_vm0, %v304_v19  ;;  %v309_v37 = vld [vmem:[%s5765_s17 + $0xf0] sm:$0xff]  ;;  %v6003_v38 = vld [vmem:[#allocation2 + $0x1a] sm:$0xff]  ;;  %v5100_v41 = vpack.c.bf16 %v1617_v36, %v1616_v35 }
  0x49   : > { %737 = vrot.lane.b32.xlu0 %v5837_v44, %s5609_s14  ;;  %480 = vrot.lane.b32.xlu1 %v5930_v8, %s5609_s14  ;;  %338 = vst.msk [vmem:[#allocation2 + $0x151] sm:$0xff] %vm223_vm0, %v305_v22  ;;  %339 = vst.msk [vmem:[#allocation2 + $0x159] sm:$0xff] %vm223_vm0, %v306_v23  ;;  %v310_v39 = vld [vmem:[%s5765_s17 + $0xf8] sm:$0xff]  ;;  %v6012_v40 = vld [vmem:[#allocation2 + $0x61] sm:$0xff] }
  0x4a   : > { %340 = vst.msk [vmem:[#allocation2 + $0x169] sm:$0xff] %vm223_vm0, %v307_v24  ;;  %634 = vst.msk [vmem:[#allocation3 + $0x30] sm:$0xff] %vm223_vm0, %v602_v25  ;;  %v6015_v42 = vld [vmem:[#allocation2 + $0x22] sm:$0xff]  ;;  %v6030_v46 = vld [vmem:[#allocation2 + $0x3a] sm:$0xff]  ;;  %5101 = vmatpush1.bf16.msra.mxu0 %v5100_v41 }
  0x4b   : > { %376 = vst.msk [vmem:[#allocation3] sm:$0xff] %vm223_vm0, %v344_v28  ;;  %341 = vst.msk [vmem:[#allocation2 + $0x171] sm:$0xff] %vm223_vm0, %v308_v31  ;;  %v1618_v43 = vld [vmem:[%s8141_s1 + $0xc0] sm:$0xff]  ;;  %v1619_v44 = vld [vmem:[%s8141_s1 + $0xc8] sm:$0xff]  ;;  %5102 = vmatprep.subr.bf16.mxu0 %v8146_v1 }
  0x4c   : > { %377 = vst.msk [vmem:[#allocation3 + $0x28] sm:$0xff] %vm223_vm0, %v345_v32  ;;  %342 = vst.msk [vmem:[#allocation2 + $0x181] sm:$0xff] %vm223_vm0, %v309_v37  ;;  %v6040_v48 = vld [vmem:[#allocation2 + $0x69] sm:$0xff]  ;;  %v5103_v49 = vpack.c.bf16 %v1619_v44, %v1618_v43  ;;  %v6063_v59 = vld [vmem:[#allocation2 + $0x7a] sm:$0xff] }
  0x4d   : > { %739 = vrot.lane.b32.xlu0 %v5839_v45, %s5609_s14  ;;  %482 = vrot.lane.b32.xlu1 %v5951_v17, %s5609_s14  ;;  %635 = vst.msk [vmem:[#allocation3 + $0x58] sm:$0xff] %vm223_vm0, %v6003_v38  ;;  %343 = vst.msk [vmem:[#allocation2 + $0x189] sm:$0xff] %vm223_vm0, %v310_v39  ;;  %v6026_v45 = vld [vmem:[#allocation2 + $0x32] sm:$0xff]  ;;  %v6046_v53 = vld [vmem:[#allocation2 + $0x62] sm:$0xff] }
  0x4e   : > { %636 = vst.msk [vmem:[#allocation3 + $0x80] sm:$0xff] %vm223_vm0, %v6015_v42  ;;  %637 = vst.msk [vmem:[#allocation3 + $0xa8] sm:$0xff] %vm223_vm0, %v6026_v45  ;;  %v6059_v58 = vld [vmem:[#allocation2 + $0x6a] sm:$0xff]  ;;  %v6071_v63 = vld [vmem:[#allocation2 + $0x82] sm:$0xff]  ;;  %5104 = vmatpush1.bf16.msra.mxu0 %v5103_v49 }
  0x4f   : > { %638 = vst.msk [vmem:[#allocation3 + $0xd0] sm:$0xff] %vm223_vm0, %v6030_v46  ;;  %641 = vst.msk [vmem:[#allocation3 + $0x148] sm:$0xff] %vm223_vm0, %v6046_v53  ;;  %v6073_v3 = vld [vmem:[#allocation2 + $0x92] sm:$0xff]  ;;  %5105 = vmatprep.subr.bf16.mxu0 %v8146_v1  ;;  %v1623_v10 = vld [vmem:[%s8141_s1 + $0xe8] sm:$0xff] }
  0x50   : > { %642 = vst.msk [vmem:[#allocation3 + $0x170] sm:$0xff] %vm223_vm0, %v6059_v58  ;;  %643 = vst.msk [vmem:[#allocation3 + $0x198] sm:$0xff] %vm223_vm0, %v6063_v59  ;;  %v6075_v7 = vld [vmem:[#allocation2 + $0x79] sm:$0xff]  ;;  %v6096_v12 = vld [vmem:[#allocation2 + $0x81] sm:$0xff] }
  0x51   : > { %741 = vrot.lane.b32.xlu0 %v5842_v47, %s5609_s14  ;;  %484 = vrot.lane.b32.xlu1 %v5973_v26, %s5609_s14  ;;  %v6038_v47 = vld [vmem:[#allocation2 + $0x4a] sm:$0xff]  ;;  %644 = vst.msk [vmem:[#allocation3 + $0x1c0] sm:$0xff] %vm223_vm0, %v6071_v63  ;;  %645 = vst.msk [vmem:[#allocation3 + $0x1e8] sm:$0xff] %vm223_vm0, %v6073_v3  ;;  %v6088_v11 = vld [vmem:[#allocation2 + $0x9a] sm:$0xff] }
  0x52   : > { %639 = vst.msk [vmem:[#allocation3 + $0xf8] sm:$0xff] %vm223_vm0, %v6038_v47  ;;  %646 = vst.msk [vmem:[#allocation3 + $0x210] sm:$0xff] %vm223_vm0, %v6088_v11  ;;  %v1624_v14 = vld [vmem:[%s8141_s1 + $0xf0] sm:$0xff]  ;;  %v6127_v20 = vld [vmem:[#allocation2 + $0xc2] sm:$0xff] }
  0x53   : > { %v6105_v15 = vld [vmem:[#allocation2 + $0xaa] sm:$0xff]  ;;  %v6116_v19 = vld [vmem:[#allocation2 + $0xb2] sm:$0xff]  ;;  %649 = vst.msk [vmem:[#allocation3 + $0x288] sm:$0xff] %vm223_vm0, %v6127_v20  ;;  %v6147_v22 = vld [vmem:[#allocation2 + $0xda] sm:$0xff] }
  0x54   : > { %647 = vst.msk [vmem:[#allocation3 + $0x238] sm:$0xff] %vm223_vm0, %v6105_v15  ;;  %v6113_v16 = vld [vmem:[#allocation2 + $0x91] sm:$0xff]  ;;  %648 = vst.msk [vmem:[#allocation3 + $0x260] sm:$0xff] %vm223_vm0, %v6116_v19  ;;  %v6157_v23 = vld [vmem:[#allocation2 + $0xe2] sm:$0xff] }
  0x55   : > { %743 = vrot.lane.b32.xlu0 %v5855_v50, %s5609_s14  ;;  %486 = vrot.lane.b32.xlu1 %v5992_v33, %s5609_s14  ;;  %v6044_v50 = vld [vmem:[#allocation2 + $0x52] sm:$0xff]  ;;  %v6137_v21 = vld [vmem:[#allocation2 + $0xca] sm:$0xff]  ;;  %651 = vst.msk [vmem:[#allocation3 + $0x2d8] sm:$0xff] %vm223_vm0, %v6147_v22  ;;  %652 = vst.msk [vmem:[#allocation3 + $0x300] sm:$0xff] %vm223_vm0, %v6157_v23 }
  0x56   : > { %640 = vst.msk [vmem:[#allocation3 + $0x120] sm:$0xff] %vm223_vm0, %v6044_v50  ;;  %650 = vst.msk [vmem:[#allocation3 + $0x2b0] sm:$0xff] %vm223_vm0, %v6137_v21  ;;  %v6167_v24 = vld [vmem:[#allocation2 + $0xf2] sm:$0xff]  ;;  %v6177_v25 = vld [vmem:[#allocation2 + $0xfa] sm:$0xff] }
  0x57   : > { %653 = vst.msk [vmem:[#allocation3 + $0x328] sm:$0xff] %vm223_vm0, %v6167_v24  ;;  %654 = vst.msk [vmem:[#allocation3 + $0x350] sm:$0xff] %vm223_vm0, %v6177_v25  ;;  %v6185_v27 = vld [vmem:[#allocation2 + $0x10a] sm:$0xff]  ;;  %v6192_v29 = vld [vmem:[#allocation2 + $0x112] sm:$0xff] }
  0x58   : > { %655 = vst.msk [vmem:[#allocation3 + $0x378] sm:$0xff] %vm223_vm0, %v6185_v27  ;;  %v428_v28 = vld [vmem:[#allocation2 + $0xf1] sm:$0xff]  ;;  %656 = vst.msk [vmem:[#allocation3 + $0x3a0] sm:$0xff] %vm223_vm0, %v6192_v29  ;;  %v429_v30 = vld [vmem:[#allocation2 + $0xf9] sm:$0xff] }
  0x59   : > { %745 = vrot.lane.b32.xlu0 %v5857_v51, %s5609_s14  ;;  %488 = vrot.lane.b32.xlu1 %v6012_v40, %s5609_s14  ;;  %v1620_v51 = vld [vmem:[%s8141_s1 + $0xd0] sm:$0xff]  ;;  %v6201_v31 = vld [vmem:[#allocation2 + $0x122] sm:$0xff]  ;;  %v6217_v41 = vld [vmem:[#allocation2 + $0x13a] sm:$0xff] }
  0x5a   : > { %v5106_v9 = vpack.c.bf16 %v1621_v56, %v1620_v51  ;;  %v368_v32 = vld [vmem:[#allocation2 + $0x120] sm:$0xff]  ;;  %657 = vst.msk [vmem:[#allocation3 + $0x3c8] sm:$0xff] %vm223_vm0, %v6201_v31  ;;  %v430_v34 = vld [vmem:[#allocation2 + $0x109] sm:$0xff]  ;;  %v431_v39 = vld [vmem:[#allocation2 + $0x111] sm:$0xff] }
  0x5b   : > { %400 = vst.msk [vmem:[#allocation3 + $0x3c0] sm:$0xff] %vm223_vm0, %v368_v32  ;;  %1166 = vst.msk [vmem:[#allocation3 + $0x338] sm:$0xff] %vm223_vm0, %v368_v32  ;;  %v6209_v35 = vld [vmem:[#allocation2 + $0x12a] sm:$0xff]  ;;  %v370_v43 = vld [vmem:[#allocation2 + $0x138] sm:$0xff] }
  0x5c   : > { %5107 = vmatpush1.bf16.msra.mxu0 %v5106_v9  ;;  %v369_v36 = vld [vmem:[#allocation2 + $0x128] sm:$0xff]  ;;  %658 = vst.msk [vmem:[#allocation3 + $0x3f0] sm:$0xff] %vm223_vm0, %v6209_v35  ;;  %659 = vst.msk [vmem:[#allocation3 + $0x418] sm:$0xff] %vm223_vm0, %v6217_v41  ;;  %v689_v44 = vld [vmem:[#allocation2 + $0x138] sm:$0xff] }
  0x5d   : > { %747 = vrot.lane.b32.xlu0 %v5863_v52, %s5609_s14  ;;  %490 = vrot.lane.b32.xlu1 %v6040_v48, %s5609_s14  ;;  %v1622_v52 = vld [vmem:[%s8141_s1 + $0xe0] sm:$0xff]  ;;  %401 = vst.msk [vmem:[#allocation3 + $0x3e8] sm:$0xff] %vm223_vm0, %v369_v36  ;;  %1167 = vst.msk [vmem:[#allocation3 + $0x360] sm:$0xff] %vm223_vm0, %v369_v36  ;;  %v688_v37 = vld [vmem:[#allocation2 + $0x128] sm:$0xff] }
  0x5e   : > { %v5109_v13 = vpack.c.bf16 %v1623_v10, %v1622_v52  ;;  %5108 = vmatprep.subr.bf16.mxu0 %v8146_v1  ;;  %402 = vst.msk [vmem:[#allocation3 + $0x410] sm:$0xff] %vm223_vm0, %v370_v43  ;;  %1168 = vst.msk [vmem:[#allocation3 + $0x388] sm:$0xff] %vm223_vm0, %v370_v43  ;;  %v432_v49 = vld [vmem:[#allocation2 + $0x121] sm:$0xff]  ;;  %v433_v52 = vld [vmem:[#allocation2 + $0x129] sm:$0xff] }
  0x5f   : > { %v6225_v51 = vld [vmem:[#allocation2 + $0x142] sm:$0xff]  ;;  %v6233_v10 = vld [vmem:[#allocation2 + $0x152] sm:$0xff] }
  0x60   : > { %5110 = vmatpush1.bf16.msra.mxu0 %v5109_v13  ;;  %v371_v56 = vld [vmem:[#allocation2 + $0x140] sm:$0xff]  ;;  %660 = vst.msk [vmem:[#allocation3 + $0x440] sm:$0xff] %vm223_vm0, %v6225_v51  ;;  %v372_v13 = vld [vmem:[#allocation2 + $0x150] sm:$0xff]  ;;  %661 = vst.msk [vmem:[#allocation3 + $0x468] sm:$0xff] %vm223_vm0, %v6233_v10 }
  0x61   : > { %749 = vrot.lane.b32.xlu0 %v5869_v54, %s5609_s14  ;;  %492 = vrot.lane.b32.xlu1 %v6075_v7, %s5609_s14  ;;  %v1625_v54 = vld [vmem:[%s8141_s1 + $0xf8] sm:$0xff]  ;;  %403 = vst.msk [vmem:[#allocation3 + $0x438] sm:$0xff] %vm223_vm0, %v371_v56  ;;  %1169 = vst.msk [vmem:[#allocation3 + $0x3b0] sm:$0xff] %vm223_vm0, %v371_v56  ;;  %v690_v9 = vld [vmem:[#allocation2 + $0x140] sm:$0xff] }
  0x62   : > { %v5112_v18 = vpack.c.bf16 %v1625_v54, %v1624_v14  ;;  %5111 = vmatprep.subr.bf16.mxu0 %v8146_v1  ;;  %404 = vst.msk [vmem:[#allocation3 + $0x460] sm:$0xff] %vm223_vm0, %v372_v13  ;;  %1170 = vst.msk [vmem:[#allocation3 + $0x3d8] sm:$0xff] %vm223_vm0, %v372_v13  ;;  %v691_v14 = vld [vmem:[#allocation2 + $0x150] sm:$0xff]  ;;  %v434_v54 = vld [vmem:[#allocation2 + $0x139] sm:$0xff] }
  0x63   : > { %v436_v32 = vld [vmem:[#allocation2 + $0x151] sm:$0xff]  ;;  %v1659_v36 = vld [vmem:[%s8141_s1 + $0x208] sm:$0xff] }
  0x64   : > { %5113 = vmatpush1.bf16.msra.mxu0 %v5112_v18  ;;  %v6241_v18 = vld [vmem:[#allocation2 + $0x15a] sm:$0xff]  ;;  %v375_v43 = vld [vmem:[#allocation2 + $0x170] sm:$0xff] }
  0x65   : > { %751 = vrot.lane.b32.xlu0 %v5871_v55, %s5609_s14  ;;  %494 = vrot.lane.b32.xlu1 %v6096_v12, %s5609_s14  ;;  %v6124_v55 = vld [vmem:[#allocation2 + $0x99] sm:$0xff]  ;;  %662 = vst.msk [vmem:[#allocation3 + $0x490] sm:$0xff] %vm223_vm0, %v6241_v18  ;;  %407 = vst.msk [vmem:[#allocation3 + $0x4d8] sm:$0xff] %vm223_vm0, %v375_v43  ;;  %v694_v56 = vld [vmem:[#allocation2 + $0x170] sm:$0xff] }
  0x66   : > { %5114 = vmatprep.subr.bf16.mxu0 %v8146_v1  ;;  %1173 = vst.msk [vmem:[#allocation3 + $0x450] sm:$0xff] %vm223_vm0, %v375_v43  ;;  %v1370_v43 = vld [vmem:[#allocation2 + $0x32] sm:$0xff] }
  0x67   : > { %1402 = vst.msk [vmem:[#allocation3 + $0x20] sm:$0xff] %vm223_vm0, %v1370_v43 }
  0x69   : > { %753 = vrot.lane.b32.xlu0 %v5875_v57, %s5609_s14  ;;  %496 = vrot.lane.b32.xlu1 %v6113_v16, %s5609_s14  ;;  %v6135_v57 = vld [vmem:[#allocation2 + $0xa9] sm:$0xff] }
  0x6d   : > { %755 = vrot.lane.b32.xlu0 %v5888_v60, %s5609_s14  ;;  %498 = vrot.lane.b32.xlu1 %v6124_v55, %s5609_s14  ;;  %v6145_v60 = vld [vmem:[#allocation2 + $0xb1] sm:$0xff] }
  0x71   : > { %757 = vrot.lane.b32.xlu0 %v5890_v61, %s5609_s14  ;;  %500 = vrot.lane.b32.xlu1 %v6135_v57, %s5609_s14  ;;  %v6155_v61 = vld [vmem:[#allocation2 + $0xc1] sm:$0xff] }
  0x75   : > { %759 = vrot.lane.b32.xlu0 %v5896_v62, %s5609_s14  ;;  %502 = vrot.lane.b32.xlu1 %v6145_v60, %s5609_s14  ;;  %v6165_v62 = vld [vmem:[#allocation2 + $0xc9] sm:$0xff] }
  0x79   : > { %761 = vrot.lane.b32.xlu0 %v5902_v0, %s5609_s14  ;;  %504 = vrot.lane.b32.xlu1 %v6155_v61, %s5609_s14  ;;  %v6175_v0 = vld [vmem:[#allocation2 + $0xd9] sm:$0xff] }
  0x7d   : > { %763 = vrot.lane.b32.xlu0 %v5904_v2, %s5609_s14  ;;  %506 = vrot.lane.b32.xlu1 %v6165_v62, %s5609_s14  ;;  %v427_v2 = vld [vmem:[#allocation2 + $0xe1] sm:$0xff] }
  0x81   : > { %765 = vrot.lane.b32.xlu0 %v5908_v4, %s5609_s14  ;;  %508 = vrot.lane.b32.xlu1 %v6175_v0, %s5609_s14  ;;  %v367_v4 = vld [vmem:[#allocation2 + $0x110] sm:$0xff] }
  0x82   : > { %399 = vst.msk [vmem:[#allocation3 + $0x398] sm:$0xff] %vm223_vm0, %v367_v4  ;;  %1165 = vst.msk [vmem:[#allocation3 + $0x310] sm:$0xff] %vm223_vm0, %v367_v4  ;;  %v435_v4 = vld [vmem:[#allocation2 + $0x141] sm:$0xff] }
  0x85   : > { %767 = vrot.lane.b32.xlu0 %v5915_v5, %s5609_s14  ;;  %510 = vrot.lane.b32.xlu1 %v427_v2, %s5609_s14  ;;  %v686_v5 = vld [vmem:[#allocation2 + $0x110] sm:$0xff]  ;;  %v373_v2 = vld [vmem:[#allocation2 + $0x158] sm:$0xff] }
  0x86   : > { %405 = vst.msk [vmem:[#allocation3 + $0x488] sm:$0xff] %vm223_vm0, %v373_v2  ;;  %1171 = vst.msk [vmem:[#allocation3 + $0x400] sm:$0xff] %vm223_vm0, %v373_v2  ;;  %v695_v2 = vld [vmem:[#allocation2 + $0x180] sm:$0xff] }
  0x89   : > { %769 = vrot.lane.b32.xlu0 %v5917_v6, %s5609_s14  ;;  %512 = vrot.lane.b32.xlu1 %v428_v28, %s5609_s14  ;;  %v687_v6 = vld [vmem:[#allocation2 + $0x120] sm:$0xff]  ;;  %v692_v28 = vld [vmem:[#allocation2 + $0x158] sm:$0xff] }
  0x8d   : > { %771 = vrot.lane.b32.xlu0 %v686_v5, %s5609_s14  ;;  %514 = vrot.lane.b32.xlu1 %v429_v30, %s5609_s14  ;;  %v6249_v5 = vld [vmem:[#allocation2 + $0x16a] sm:$0xff] }
  0x8e   : > { %v374_v30 = vld [vmem:[#allocation2 + $0x168] sm:$0xff]  ;;  %663 = vst.msk [vmem:[#allocation3 + $0x4b8] sm:$0xff] %vm223_vm0, %v6249_v5 }
  0x8f   : > { %406 = vst.msk [vmem:[#allocation3 + $0x4b0] sm:$0xff] %vm223_vm0, %v374_v30  ;;  %1172 = vst.msk [vmem:[#allocation3 + $0x428] sm:$0xff] %vm223_vm0, %v374_v30  ;;  %v1662_v30 = vld [vmem:[%s8141_s1 + $0x220] sm:$0xff] }
  0x91   : > { %773 = vrot.lane.b32.xlu0 %v687_v6, %s5609_s14  ;;  %516 = vrot.lane.b32.xlu1 %v430_v34, %s5609_s14  ;;  %v693_v6 = vld [vmem:[#allocation2 + $0x168] sm:$0xff]  ;;  %v1658_v34 = vld [vmem:[%s8141_s1 + $0x200] sm:$0xff] }
  0x95   : > { %775 = vrot.lane.b32.xlu0 %v688_v37, %s5609_s14  ;;  %518 = vrot.lane.b32.xlu1 %v431_v39, %s5609_s14  ;;  %v5162_v37 = vpack.c.bf16 %v1659_v36, %v1658_v34  ;;  %v6263_v39 = vld [vmem:[#allocation2 + $0x172] sm:$0xff] }
  0x96   : > { %664 = vst.msk [vmem:[#allocation3 + $0x4e0] sm:$0xff] %vm223_vm0, %v6263_v39  ;;  %1429 = vst.msk [vmem:[#allocation3 + $0x458] sm:$0xff] %vm223_vm0, %v6263_v39 }
  0x97   : > { %5163 = vmatprep.subr.bf16.mxu1 %v5162_v37 }
  0x98   : > { %5165 = vmatpush3.bf16.msra.mxu1 %v5162_v37 }
  0x99   : > { %777 = vrot.lane.b32.xlu0 %v689_v44, %s5609_s14  ;;  %520 = vrot.lane.b32.xlu1 %v432_v49, %s5609_s14  ;;  %v1660_v44 = vld [vmem:[%s8141_s1 + $0x210] sm:$0xff]  ;;  %v1661_v49 = vld [vmem:[%s8141_s1 + $0x218] sm:$0xff] }
  0x9d   : > { %779 = vrot.lane.b32.xlu0 %v690_v9, %s5609_s14  ;;  %522 = vrot.lane.b32.xlu1 %v433_v52, %s5609_s14  ;;  %v437_v9 = vld [vmem:[#allocation2 + $0x159] sm:$0xff]  ;;  %v5166_v52 = vpack.c.bf16 %v1661_v49, %v1660_v44 }
  0x9e   : > { %v1371_v44 = vld [vmem:[#allocation2 + $0x3a] sm:$0xff] }
  0x9f   : > { %5167 = vmatprep.subr.bf16.mxu1 %v5166_v52  ;;  %v1626_v49 = vld [vmem:[%s8141_s1 + $0x100] sm:$0xff]  ;;  %1403 = vst.msk [vmem:[#allocation3 + $0x48] sm:$0xff] %vm223_vm0, %v1371_v44  ;;  %v1628_v44 = vld [vmem:[%s8141_s1 + $0x110] sm:$0xff] }
  0xa0   : > { %5169 = vmatpush3.bf16.msra.mxu1 %v5166_v52  ;;  %v1664_v52 = vld [vmem:[%s8141_s1 + $0x230] sm:$0xff] }
  0xa1   : > { %781 = vrot.lane.b32.xlu0 %v691_v14, %s5609_s14  ;;  %524 = vrot.lane.b32.xlu1 %v434_v54, %s5609_s14  ;;  %v1114_v54 = vld [vmem:[#allocation2 + $0x30] sm:$0xff] }
  0xa2   : > { %1146 = vst.msk [vmem:[#allocation3 + $0x18] sm:$0xff] %vm223_vm0, %v1114_v54  ;;  %v1627_v54 = vld [vmem:[%s8141_s1 + $0x108] sm:$0xff] }
  0xa3   : > { %v5115_v43 = vpack.c.bf16 %v1627_v54, %v1626_v49  ;;  %v1372_v49 = vld [vmem:[#allocation2 + $0x4a] sm:$0xff] }
  0xa4   : > { %v1438_v54 = vld [vmem:[#allocation3 + $0x20] sm:$0xff]  ;;  %1404 = vst.msk [vmem:[#allocation3 + $0x70] sm:$0xff] %vm223_vm0, %v1372_v49 }
  0xa5   : > { %783 = vrot.lane.b32.xlu0 %v692_v28, %s5609_s14  ;;  %526 = vrot.lane.b32.xlu1 %v435_v4, %s5609_s14  ;;  %v438_v28 = vld [vmem:[#allocation2 + $0x169] sm:$0xff]  ;;  %v857_v4 = vld [vmem:[#allocation2 + $0x19] sm:$0xff] }
  0xa6   : > { %889 = vst.msk [vmem:[#allocation3 + $0x10] sm:$0xff] %vm223_vm0, %v857_v4  ;;  %v439_v4 = vld [vmem:[#allocation2 + $0x171] sm:$0xff]  ;;  %4954 = vmatprep.mubr.msk.f32.mxu1 %vm223_vm0, %v1438_v54 }
  0xa7   : > { %v1633_v54 = vld [vmem:[%s8141_s1 + $0x138] sm:$0xff] }
  0xa9   : > { %785 = vrot.lane.b32.xlu0 %v693_v6, %s5609_s14  ;;  %528 = vrot.lane.b32.xlu1 %v436_v32, %s5609_s14  ;;  %v1663_v32 = vld [vmem:[%s8141_s1 + $0x228] sm:$0xff] }
  0xaa   : > { %v6291_v6 = vld [vmem:[#allocation2 + $0x189] sm:$0xff]  ;;  %v5170_v37 = vpack.c.bf16 %v1663_v32, %v1662_v30 }
  0xab   : > { %v730_v13 = vpop.permute.xlu0 %729  ;;  %v732_v14 = vpop.permute.xlu1 %731  ;;  %920 = vst.msk [vmem:[#allocation3 + $0x4e8] sm:$0xff] %vm223_vm0, %v6291_v6 }
  0xac   : > { %825 = vst.msk [vmem:[#allocation3 + $0x8] sm:$0xff] %vm568_vm2, %v730_v13  ;;  %826 = vst.msk [vmem:[#allocation3 + $0x30] sm:$0xff] %vm568_vm2, %v732_v14  ;;  %v1665_v13 = vld [vmem:[%s8141_s1 + $0x238] sm:$0xff]  ;;  %v696_v14 = vld [vmem:[#allocation2 + $0x188] sm:$0xff]  ;;  %5171 = vmatprep.subr.bf16.mxu1 %v5170_v37 }
  0xad   : > { %787 = vrot.lane.b32.xlu0 %v694_v56, %s5609_s14  ;;  %530 = vrot.lane.b32.xlu1 %v437_v9, %s5609_s14  ;;  %v1115_v56 = vld [vmem:[#allocation2 + $0x38] sm:$0xff]  ;;  %v858_v9 = vld [vmem:[#allocation2 + $0x21] sm:$0xff] }
  0xae   : > { %1147 = vst.msk [vmem:[#allocation3 + $0x40] sm:$0xff] %vm223_vm0, %v1115_v56  ;;  %890 = vst.msk [vmem:[#allocation3 + $0x38] sm:$0xff] %vm223_vm0, %v858_v9  ;;  %5173 = vmatpush3.bf16.msra.mxu1 %v5170_v37  ;;  %v859_v37 = vld [vmem:[#allocation2 + $0x31] sm:$0xff] }
  0xaf   : > { %v473_v34 = vpop.permute.xlu0 %472  ;;  %v475_v36 = vpop.permute.xlu1 %474  ;;  %v1629_v9 = vld [vmem:[%s8141_s1 + $0x118] sm:$0xff]  ;;  %891 = vst.msk [vmem:[#allocation3 + $0x60] sm:$0xff] %vm223_vm0, %v859_v37 }
  0xb0   : > { %569 = vst.msk [vmem:[#allocation3] sm:$0xff] %vm568_vm2, %v473_v34  ;;  %570 = vst.msk [vmem:[#allocation3 + $0x28] sm:$0xff] %vm568_vm2, %v475_v36  ;;  %v6317_v34 = vld [vmem:[#allocation2 + $0x182] sm:$0xff]  ;;  %v1373_v37 = vld [vmem:[#allocation2 + $0x52] sm:$0xff] }
  0xb1   : > { %789 = vrot.lane.b32.xlu0 %v695_v2, %s5609_s14  ;;  %532 = vrot.lane.b32.xlu1 %v438_v28, %s5609_s14  ;;  %v5174_v2 = vpack.c.bf16 %v1665_v13, %v1664_v52  ;;  %v1116_v36 = vld [vmem:[#allocation2 + $0x48] sm:$0xff]  ;;  %1430 = vst.msk [vmem:[#allocation3 + $0x480] sm:$0xff] %vm223_vm0, %v6317_v34  ;;  %1405 = vst.msk [vmem:[#allocation3 + $0x98] sm:$0xff] %vm223_vm0, %v1373_v37 }
  0xb2   : > { %1148 = vst.msk [vmem:[#allocation3 + $0x68] sm:$0xff] %vm223_vm0, %v1116_v36  ;;  %v5118_v36 = vpack.c.bf16 %v1629_v9, %v1628_v44  ;;  %v1631_v44 = vld [vmem:[%s8141_s1 + $0x128] sm:$0xff] }
  0xb3   : > { %v1435_v28 = vld [vmem:[#allocation3 + $0x8] sm:$0xff]  ;;  %v734_v30 = vpop.permute.xlu0 %733  ;;  %v477_v32 = vpop.permute.xlu1 %476  ;;  %5175 = vmatprep.subr.bf16.mxu1 %v5174_v2  ;;  %v1440_v56 = vld [vmem:[#allocation3 + $0x30] sm:$0xff] }
  0xb4   : > { %1833 = vmatprep.mubr.f32.mxu0 %v1435_v28  ;;  %827 = vst.msk [vmem:[#allocation3 + $0x58] sm:$0xff] %vm568_vm2, %v734_v30  ;;  %571 = vst.msk [vmem:[#allocation3 + $0x50] sm:$0xff] %vm568_vm2, %v477_v32  ;;  %5177 = vmatpush3.bf16.msra.mxu1 %v5174_v2  ;;  %v6335_v28 = vld [vmem:[#allocation2 + $0x18a] sm:$0xff]  ;;  %v860_v2 = vld [vmem:[#allocation2 + $0x39] sm:$0xff] }
  0xb5   : > { %791 = vrot.lane.b32.xlu0 %v696_v14, %s5609_s14  ;;  %534 = vrot.lane.b32.xlu1 %v439_v4, %s5609_s14  ;;  %v1443_v4 = vld [vmem:[#allocation3 + $0x48] sm:$0xff]  ;;  %v1117_v30 = vld [vmem:[#allocation2 + $0x50] sm:$0xff]  ;;  %1431 = vst.msk [vmem:[#allocation3 + $0x4a8] sm:$0xff] %vm223_vm0, %v6335_v28  ;;  %892 = vst.msk [vmem:[#allocation3 + $0x88] sm:$0xff] %vm223_vm0, %v860_v2 }
  0xb6   : > { %1149 = vst.msk [vmem:[#allocation3 + $0x90] sm:$0xff] %vm223_vm0, %v1117_v30  ;;  %5178 = vmatprep.subr.bf16.mxu1 %v8146_v1  ;;  %v1374_v30 = vld [vmem:[#allocation2 + $0x62] sm:$0xff] }
  0xb7   : > { %v1434_v52 = vld [vmem:[#allocation3] sm:$0xff]  ;;  %v736_v13 = vpop.permute.xlu0 %735  ;;  %v479_v14 = vpop.permute.xlu1 %478  ;;  %v1439_v32 = vld [vmem:[#allocation3 + $0x28] sm:$0xff]  ;;  %4955 = vmatmul.mubr.msk.f32.vlgmr.msra.gmra.mrb[0].mxu1 %vm223_vm0, %v1443_v4  ;;  %v1448_v4 = vld [vmem:[#allocation3 + $0x70] sm:$0xff]  ;;  %1406 = vst.msk [vmem:[#allocation3 + $0xc0] sm:$0xff] %vm223_vm0, %v1374_v30 }
  0xb8   : > { %1834 = vmatmul.mubr.f32.vlgmr.msra.gmra.mrb[0].mxu0 %v1434_v52  ;;  %828 = vst.msk [vmem:[#allocation3 + $0x80] sm:$0xff] %vm568_vm2, %v736_v13  ;;  %572 = vst.msk [vmem:[#allocation3 + $0x78] sm:$0xff] %vm568_vm2, %v479_v14  ;;  %v1632_v13 = vld [vmem:[%s8141_s1 + $0x130] sm:$0xff]  ;;  %4957 = vmatprep.mubr.msk.f32.mxu1 %vm223_vm0, %v1448_v4  ;;  %v1637_v4 = vld [vmem:[%s8141_s1 + $0x158] sm:$0xff] }
  0xb9   : > { %5116 = vmatpush1.bf16.msra.mxu0 %v5115_v43  ;;  %1838 = vmatprep.mubr.f32.mxu0 %v1440_v56  ;;  %v1630_v43 = vld [vmem:[%s8141_s1 + $0x120] sm:$0xff]  ;;  %v861_v14 = vld [vmem:[#allocation2 + $0x49] sm:$0xff] }
  0xba   : > { %1242 = vrot.lane.b32.xlu0 %v5930_v8, %s5609_s14  ;;  %985 = vrot.lane.b32.xlu1 %v6003_v38, %s5609_s14  ;;  %v1118_v38 = vld [vmem:[#allocation2 + $0x60] sm:$0xff]  ;;  %v5121_v52 = vpack.c.bf16 %v1631_v44, %v1630_v43  ;;  %893 = vst.msk [vmem:[#allocation3 + $0xb0] sm:$0xff] %vm223_vm0, %v861_v14  ;;  %v5124_v43 = vpack.c.bf16 %v1633_v54, %v1632_v13  ;;  %v1453_v44 = vld [vmem:[#allocation3 + $0x98] sm:$0xff]  ;;  %v1636_v14 = vld [vmem:[%s8141_s1 + $0x150] sm:$0xff] }
  0xbb   : > { %v738_v56 = vpop.permute.xlu0 %737  ;;  %v1445_v9 = vld [vmem:[#allocation3 + $0x58] sm:$0xff]  ;;  %5117 = vmatprep.subr.bf16.mxu0 %v8146_v1  ;;  %v481_v8 = vpop.permute.xlu1 %480  ;;  %v1444_v49 = vld [vmem:[#allocation3 + $0x50] sm:$0xff]  ;;  %1150 = vst.msk [vmem:[#allocation3 + $0xb8] sm:$0xff] %vm223_vm0, %v1118_v38  ;;  %4958 = vmatmul.mubr.msk.f32.gmra.mrb[2].mxu1 %vm223_vm0, %v1453_v44 }
  0xbc   : > { %1839 = vmatmul.mubr.f32.gmra.mrb[2].mxu0 %v1439_v32  ;;  %829 = vst.msk [vmem:[#allocation3 + $0xa8] sm:$0xff] %vm568_vm2, %v738_v56  ;;  %573 = vst.msk [vmem:[#allocation3 + $0xa0] sm:$0xff] %vm568_vm2, %v481_v8  ;;  %v862_v56 = vld [vmem:[#allocation2 + $0x51] sm:$0xff]  ;;  %v1635_v8 = vld [vmem:[%s8141_s1 + $0x148] sm:$0xff] }
  0xbd   : > { %1843 = vmatprep.mubr.f32.mxu0 %v1445_v9  ;;  %5119 = vmatpush1.bf16.msra.mxu0 %v5118_v36  ;;  %v1634_v9 = vld [vmem:[%s8141_s1 + $0x140] sm:$0xff]  ;;  %894 = vst.msk [vmem:[#allocation3 + $0xd8] sm:$0xff] %vm223_vm0, %v862_v56  ;;  %v864_v44 = vld [vmem:[#allocation2 + $0x69] sm:$0xff] }
  0xbe   : > { %1244 = vrot.lane.b32.xlu0 %v5951_v17, %s5609_s14  ;;  %987 = vrot.lane.b32.xlu1 %v6015_v42, %s5609_s14  ;;  %v1375_v17 = vld [vmem:[#allocation2 + $0x6a] sm:$0xff]  ;;  %v5127_v13 = vpack.c.bf16 %v1635_v8, %v1634_v9  ;;  %v863_v54 = vld [vmem:[#allocation2 + $0x61] sm:$0xff]  ;;  %896 = vst.msk [vmem:[#allocation3 + $0x128] sm:$0xff] %vm223_vm0, %v864_v44 }
  0xbf   : > { %v740_v32 = vpop.permute.xlu0 %739  ;;  %v483_v36 = vpop.permute.xlu1 %482  ;;  %v1450_v2 = vld [vmem:[#allocation3 + $0x80] sm:$0xff]  ;;  %5120 = vmatprep.subr.bf16.mxu0 %v8146_v1  ;;  %v1119_v42 = vld [vmem:[#allocation2 + $0x68] sm:$0xff]  ;;  %1407 = vst.msk [vmem:[#allocation3 + $0xe8] sm:$0xff] %vm223_vm0, %v1375_v17  ;;  %895 = vst.msk [vmem:[#allocation3 + $0x100] sm:$0xff] %vm223_vm0, %v863_v54 }
  0xc0   : > { %1844 = vmatmul.mubr.f32.gmra.mrb[4].mxu0 %v1444_v49  ;;  %830 = vst.msk [vmem:[#allocation3 + $0xd0] sm:$0xff] %vm568_vm2, %v740_v32  ;;  %574 = vst.msk [vmem:[#allocation3 + $0xc8] sm:$0xff] %vm568_vm2, %v483_v36  ;;  %v1449_v37 = vld [vmem:[#allocation3 + $0x78] sm:$0xff]  ;;  %v1458_v30 = vld [vmem:[#allocation3 + $0xc0] sm:$0xff] }
  0xc1   : > { %1848 = vmatprep.mubr.f32.mxu0 %v1450_v2  ;;  %5122 = vmatpush1.bf16.msra.mxu0 %v5121_v52  ;;  %1151 = vst.msk [vmem:[#allocation3 + $0xe0] sm:$0xff] %vm223_vm0, %v1119_v42  ;;  %v1376_v32 = vld [vmem:[#allocation2 + $0x7a] sm:$0xff]  ;;  %v1639_v9 = vld [vmem:[%s8141_s1 + $0x168] sm:$0xff]  ;;  %v1378_v54 = vld [vmem:[#allocation2 + $0x92] sm:$0xff] }
  0xc2   : > { %1246 = vrot.lane.b32.xlu0 %v5973_v26, %s5609_s14  ;;  %989 = vrot.lane.b32.xlu1 %v6026_v45, %s5609_s14  ;;  %v1120_v26 = vld [vmem:[#allocation2 + $0x78] sm:$0xff]  ;;  %1408 = vst.msk [vmem:[#allocation3 + $0x110] sm:$0xff] %vm223_vm0, %v1376_v32  ;;  %v1638_v56 = vld [vmem:[%s8141_s1 + $0x160] sm:$0xff]  ;;  %1410 = vst.msk [vmem:[#allocation3 + $0x160] sm:$0xff] %vm223_vm0, %v1378_v54 }
  0xc3   : > { %v742_v38 = vpop.permute.xlu0 %741  ;;  %v485_v49 = vpop.permute.xlu1 %484  ;;  %v1455_v52 = vld [vmem:[#allocation3 + $0xa8] sm:$0xff]  ;;  %5123 = vmatprep.subr.bf16.mxu0 %v8146_v1  ;;  %v1454_v45 = vld [vmem:[#allocation3 + $0xa0] sm:$0xff]  ;;  %1152 = vst.msk [vmem:[#allocation3 + $0x108] sm:$0xff] %vm223_vm0, %v1120_v26  ;;  %4960 = vmatprep.mubr.msk.f32.mxu1 %vm223_vm0, %v1458_v30 }
  0xc4   : > { %1849 = vmatmul.mubr.f32.gmra.mrb[6].mxu0 %v1449_v37  ;;  %831 = vst.msk [vmem:[#allocation3 + $0xf8] sm:$0xff] %vm568_vm2, %v742_v38  ;;  %575 = vst.msk [vmem:[#allocation3 + $0xf0] sm:$0xff] %vm568_vm2, %v485_v49  ;;  %v1640_v26 = vld [vmem:[%s8141_s1 + $0x170] sm:$0xff]  ;;  %v868_v54 = vld [vmem:[#allocation2 + $0x99] sm:$0xff] }
  0xc5   : > { %1853 = vmatprep.mubr.f32.mxu0 %v1455_v52  ;;  %5125 = vmatpush1.bf16.msra.mxu0 %v5124_v43  ;;  %v5130_v43 = vpack.c.bf16 %v1637_v4, %v1636_v14  ;;  %v5133_v52 = vpack.c.bf16 %v1639_v9, %v1638_v56  ;;  %v1644_v9 = vld [vmem:[%s8141_s1 + $0x190] sm:$0xff]  ;;  %900 = vst.msk [vmem:[#allocation3 + $0x1c8] sm:$0xff] %vm223_vm0, %v868_v54 }
  0xc6   : > { %1248 = vrot.lane.b32.xlu0 %v5992_v33, %s5609_s14  ;;  %991 = vrot.lane.b32.xlu1 %v6030_v46, %s5609_s14  ;;  %v1463_v42 = vld [vmem:[#allocation3 + $0xe8] sm:$0xff]  ;;  %v1121_v33 = vld [vmem:[#allocation2 + $0x80] sm:$0xff] }
  0xc7   : > { %v744_v36 = vpop.permute.xlu0 %743  ;;  %v487_v2 = vpop.permute.xlu1 %486  ;;  %v1460_v17 = vld [vmem:[#allocation3 + $0xd0] sm:$0xff]  ;;  %5126 = vmatprep.subr.bf16.mxu0 %v8146_v1  ;;  %4961 = vmatmul.mubr.msk.f32.gmra.mrb[4].mxu1 %vm223_vm0, %v1463_v42  ;;  %v1459_v37 = vld [vmem:[#allocation3 + $0xc8] sm:$0xff]  ;;  %1153 = vst.msk [vmem:[#allocation3 + $0x130] sm:$0xff] %vm223_vm0, %v1121_v33 }
  0xc8   : > { %1854 = vmatmul.mubr.f32.gmra.mrb[8].mxu0 %v1454_v45  ;;  %832 = vst.msk [vmem:[#allocation3 + $0x120] sm:$0xff] %vm568_vm2, %v744_v36  ;;  %576 = vst.msk [vmem:[#allocation3 + $0x118] sm:$0xff] %vm568_vm2, %v487_v2  ;;  %v1377_v46 = vld [vmem:[#allocation2 + $0x82] sm:$0xff]  ;;  %v865_v45 = vld [vmem:[#allocation2 + $0x79] sm:$0xff] }
  0xc9   : > { %1858 = vmatprep.mubr.f32.mxu0 %v1460_v17  ;;  %5128 = vmatpush1.bf16.msra.mxu0 %v5127_v13  ;;  %1409 = vst.msk [vmem:[#allocation3 + $0x138] sm:$0xff] %vm223_vm0, %v1377_v46  ;;  %v1641_v13 = vld [vmem:[%s8141_s1 + $0x178] sm:$0xff]  ;;  %v1468_v14 = vld [vmem:[#allocation3 + $0x110] sm:$0xff]  ;;  %897 = vst.msk [vmem:[#allocation3 + $0x150] sm:$0xff] %vm223_vm0, %v865_v45 }
  0xca   : > { %1250 = vrot.lane.b32.xlu0 %v6012_v40, %s5609_s14  ;;  %993 = vrot.lane.b32.xlu1 %v6038_v47, %s5609_s14  ;;  %v1122_v40 = vld [vmem:[#allocation2 + $0x90] sm:$0xff]  ;;  %v1123_v36 = vld [vmem:[#allocation2 + $0x98] sm:$0xff]  ;;  %v5136_v17 = vpack.c.bf16 %v1641_v13, %v1640_v26  ;;  %v866_v42 = vld [vmem:[#allocation2 + $0x81] sm:$0xff] }
  0xcb   : > { %v746_v8 = vpop.permute.xlu0 %745  ;;  %v489_v38 = vpop.permute.xlu1 %488  ;;  %v1465_v49 = vld [vmem:[#allocation3 + $0xf8] sm:$0xff]  ;;  %5129 = vmatprep.subr.bf16.mxu0 %v8146_v1  ;;  %v1464_v47 = vld [vmem:[#allocation3 + $0xf0] sm:$0xff]  ;;  %1154 = vst.msk [vmem:[#allocation3 + $0x158] sm:$0xff] %vm223_vm0, %v1122_v40  ;;  %4963 = vmatprep.mubr.msk.f32.mxu1 %vm223_vm0, %v1468_v14  ;;  %1155 = vst.msk [vmem:[#allocation3 + $0x180] sm:$0xff] %vm223_vm0, %v1123_v36 }
  0xcc   : > { %1859 = vmatmul.mubr.f32.gmra.mrb[10].mxu0 %v1459_v37  ;;  %833 = vst.msk [vmem:[#allocation3 + $0x148] sm:$0xff] %vm568_vm2, %v746_v8  ;;  %577 = vst.msk [vmem:[#allocation3 + $0x140] sm:$0xff] %vm568_vm2, %v489_v38  ;;  %v1642_v33 = vld [vmem:[%s8141_s1 + $0x180] sm:$0xff]  ;;  %v1643_v46 = vld [vmem:[%s8141_s1 + $0x188] sm:$0xff] }
  0xcd   : > { %1863 = vmatprep.mubr.f32.mxu0 %v1465_v49  ;;  %5131 = vmatpush1.bf16.msra.mxu0 %v5130_v43  ;;  %898 = vst.msk [vmem:[#allocation3 + $0x178] sm:$0xff] %vm223_vm0, %v866_v42  ;;  %v5139_v56 = vpack.c.bf16 %v1643_v46, %v1642_v33  ;;  %v867_v8 = vld [vmem:[#allocation2 + $0x91] sm:$0xff]  ;;  %v1382_v46 = vld [vmem:[#allocation2 + $0xc2] sm:$0xff] }
  0xce   : > { %1252 = vrot.lane.b32.xlu0 %v6040_v48, %s5609_s14  ;;  %995 = vrot.lane.b32.xlu1 %v6044_v50, %s5609_s14  ;;  %v1379_v48 = vld [vmem:[#allocation2 + $0x9a] sm:$0xff]  ;;  %v1478_v49 = vld [vmem:[#allocation3 + $0x160] sm:$0xff]  ;;  %899 = vst.msk [vmem:[#allocation3 + $0x1a0] sm:$0xff] %vm223_vm0, %v867_v8  ;;  %1414 = vst.msk [vmem:[#allocation3 + $0x200] sm:$0xff] %vm223_vm0, %v1382_v46 }
  0xcf   : > { %v748_v4 = vpop.permute.xlu0 %747  ;;  %v491_v30 = vpop.permute.xlu1 %490  ;;  %v1470_v32 = vld [vmem:[#allocation3 + $0x120] sm:$0xff]  ;;  %5132 = vmatprep.subr.bf16.mxu0 %v8146_v1  ;;  %1411 = vst.msk [vmem:[#allocation3 + $0x188] sm:$0xff] %vm223_vm0, %v1379_v48  ;;  %v1469_v2 = vld [vmem:[#allocation3 + $0x118] sm:$0xff]  ;;  %v1645_v38 = vld [vmem:[%s8141_s1 + $0x198] sm:$0xff] }
  0xd0   : > { %1864 = vmatmul.mubr.f32.gmra.mrb[12].mxu0 %v1464_v47  ;;  %834 = vst.msk [vmem:[#allocation3 + $0x170] sm:$0xff] %vm568_vm2, %v748_v4  ;;  %578 = vst.msk [vmem:[#allocation3 + $0x168] sm:$0xff] %vm568_vm2, %v491_v30  ;;  %v1473_v50 = vld [vmem:[#allocation3 + $0x138] sm:$0xff]  ;;  %v5142_v14 = vpack.c.bf16 %v1645_v38, %v1644_v9  ;;  %v1646_v4 = vld [vmem:[%s8141_s1 + $0x1a0] sm:$0xff] }
  0xd1   : > { %1868 = vmatprep.mubr.f32.mxu0 %v1470_v32  ;;  %5134 = vmatpush1.bf16.msra.mxu0 %v5133_v52  ;;  %v1380_v40 = vld [vmem:[#allocation2 + $0xaa] sm:$0xff]  ;;  %v1649_v42 = vld [vmem:[%s8141_s1 + $0x1b8] sm:$0xff]  ;;  %v1650_v8 = vld [vmem:[%s8141_s1 + $0x1c0] sm:$0xff] }
  0xd2   : > { %1254 = vrot.lane.b32.xlu0 %v6075_v7, %s5609_s14  ;;  %997 = vrot.lane.b32.xlu1 %v6046_v53, %s5609_s14  ;;  %v1124_v53 = vld [vmem:[#allocation2 + $0xa8] sm:$0xff]  ;;  %1412 = vst.msk [vmem:[#allocation3 + $0x1b0] sm:$0xff] %vm223_vm0, %v1380_v40  ;;  %v870_v9 = vld [vmem:[#allocation2 + $0xb1] sm:$0xff]  ;;  %v873_v46 = vld [vmem:[#allocation2 + $0xd9] sm:$0xff] }
  0xd3   : > { %v750_v37 = vpop.permute.xlu0 %749  ;;  %v493_v43 = vpop.permute.xlu1 %492  ;;  %v1475_v44 = vld [vmem:[#allocation3 + $0x148] sm:$0xff]  ;;  %5135 = vmatprep.subr.bf16.mxu0 %v8146_v1  ;;  %4964 = vmatmul.mubr.msk.f32.gmra.mrb[6].mxu1 %vm223_vm0, %v1473_v50  ;;  %v1474_v7 = vld [vmem:[#allocation3 + $0x140] sm:$0xff]  ;;  %1156 = vst.msk [vmem:[#allocation3 + $0x1a8] sm:$0xff] %vm223_vm0, %v1124_v53  ;;  %v1647_v30 = vld [vmem:[%s8141_s1 + $0x1a8] sm:$0xff] }
  0xd4   : > { %1869 = vmatmul.mubr.f32.gmra.mrb[14].mxu0 %v1469_v2  ;;  %835 = vst.msk [vmem:[#allocation3 + $0x198] sm:$0xff] %vm568_vm2, %v750_v37  ;;  %579 = vst.msk [vmem:[#allocation3 + $0x190] sm:$0xff] %vm568_vm2, %v493_v43  ;;  %4966 = vmatprep.mubr.msk.f32.mxu1 %vm223_vm0, %v1478_v49  ;;  %v5145_v36 = vpack.c.bf16 %v1647_v30, %v1646_v4  ;;  %v1648_v2 = vld [vmem:[%s8141_s1 + $0x1b0] sm:$0xff]  ;;  %v1127_v53 = vld [vmem:[#allocation2 + $0xc8] sm:$0xff] }
  0xd5   : > { %1873 = vmatprep.mubr.f32.mxu0 %v1475_v44  ;;  %5137 = vmatpush1.bf16.msra.mxu0 %v5136_v17  ;;  %v869_v17 = vld [vmem:[#allocation2 + $0xa9] sm:$0xff]  ;;  %1159 = vst.msk [vmem:[#allocation3 + $0x220] sm:$0xff] %vm223_vm0, %v1127_v53  ;;  %902 = vst.msk [vmem:[#allocation3 + $0x218] sm:$0xff] %vm223_vm0, %v870_v9 }
  0xd6   : > { %1256 = vrot.lane.b32.xlu0 %v6096_v12, %s5609_s14  ;;  %999 = vrot.lane.b32.xlu1 %v6059_v58, %s5609_s14  ;;  %v1483_v45 = vld [vmem:[#allocation3 + $0x188] sm:$0xff]  ;;  %v1125_v58 = vld [vmem:[#allocation2 + $0xb0] sm:$0xff]  ;;  %901 = vst.msk [vmem:[#allocation3 + $0x1f0] sm:$0xff] %vm223_vm0, %v869_v17  ;;  %v1651_v38 = vld [vmem:[%s8141_s1 + $0x1c8] sm:$0xff] }
  0xd7   : > { %v752_v47 = vpop.permute.xlu0 %751  ;;  %v495_v52 = vpop.permute.xlu1 %494  ;;  %v1480_v26 = vld [vmem:[#allocation3 + $0x170] sm:$0xff]  ;;  %5138 = vmatprep.subr.bf16.mxu0 %v8146_v1  ;;  %4967 = vmatmul.mubr.msk.f32.gmra.mrb[8].mxu1 %vm223_vm0, %v1483_v45  ;;  %v1381_v12 = vld [vmem:[#allocation2 + $0xb2] sm:$0xff]  ;;  %1157 = vst.msk [vmem:[#allocation3 + $0x1d0] sm:$0xff] %vm223_vm0, %v1125_v58  ;;  %905 = vst.msk [vmem:[#allocation3 + $0x290] sm:$0xff] %vm223_vm0, %v873_v46 }
  0xd8   : > { %1874 = vmatmul.mubr.f32.gmra.mrb[16].mxu0 %v1474_v7  ;;  %836 = vst.msk [vmem:[#allocation3 + $0x1c0] sm:$0xff] %vm568_vm2, %v752_v47  ;;  %580 = vst.msk [vmem:[#allocation3 + $0x1b8] sm:$0xff] %vm568_vm2, %v495_v52  ;;  %v1479_v13 = vld [vmem:[#allocation3 + $0x168] sm:$0xff]  ;;  %v5151_v52 = vpack.c.bf16 %v1651_v38, %v1650_v8  ;;  %v871_v45 = vld [vmem:[#allocation2 + $0xc1] sm:$0xff] }
  0xd9   : > { %1878 = vmatprep.mubr.f32.mxu0 %v1480_v26  ;;  %5140 = vmatpush1.bf16.msra.mxu0 %v5139_v56  ;;  %1413 = vst.msk [vmem:[#allocation3 + $0x1d8] sm:$0xff] %vm223_vm0, %v1381_v12  ;;  %v1488_v33 = vld [vmem:[#allocation3 + $0x1b0] sm:$0xff]  ;;  %v5148_v56 = vpack.c.bf16 %v1649_v42, %v1648_v2  ;;  %v1652_v26 = vld [vmem:[%s8141_s1 + $0x1d0] sm:$0xff]  ;;  %v1653_v58 = vld [vmem:[%s8141_s1 + $0x1d8] sm:$0xff] }
  0xda   : > { %1258 = vrot.lane.b32.xlu0 %v6113_v16, %s5609_s14  ;;  %1001 = vrot.lane.b32.xlu1 %v6063_v59, %s5609_s14  ;;  %v1126_v59 = vld [vmem:[#allocation2 + $0xc0] sm:$0xff]  ;;  %v1498_v12 = vld [vmem:[#allocation3 + $0x200] sm:$0xff]  ;;  %903 = vst.msk [vmem:[#allocation3 + $0x240] sm:$0xff] %vm223_vm0, %v871_v45 }
  0xdb   : > { %v754_v32 = vpop.permute.xlu0 %753  ;;  %v497_v48 = vpop.permute.xlu1 %496  ;;  %v1485_v50 = vld [vmem:[#allocation3 + $0x198] sm:$0xff]  ;;  %5141 = vmatprep.subr.bf16.mxu0 %v8146_v1  ;;  %v1484_v16 = vld [vmem:[#allocation3 + $0x190] sm:$0xff]  ;;  %1158 = vst.msk [vmem:[#allocation3 + $0x1f8] sm:$0xff] %vm223_vm0, %v1126_v59  ;;  %4969 = vmatprep.mubr.msk.f32.mxu1 %vm223_vm0, %v1488_v33  ;;  %v1656_v33 = vld [vmem:[%s8141_s1 + $0x1f0] sm:$0xff] }
  0xdc   : > { %1879 = vmatmul.mubr.f32.gmra.mrb[18].mxu0 %v1479_v13  ;;  %837 = vst.msk [vmem:[#allocation3 + $0x1e8] sm:$0xff] %vm568_vm2, %v754_v32  ;;  %581 = vst.msk [vmem:[#allocation3 + $0x1e0] sm:$0xff] %vm568_vm2, %v497_v48  ;;  %v1384_v13 = vld [vmem:[#allocation2 + $0xda] sm:$0xff]  ;;  %v5154_v48 = vpack.c.bf16 %v1653_v58, %v1652_v26 }
  0xdd   : > { %1883 = vmatprep.mubr.f32.mxu0 %v1485_v50  ;;  %5143 = vmatpush1.bf16.msra.mxu0 %v5142_v14  ;;  %1416 = vst.msk [vmem:[#allocation3 + $0x250] sm:$0xff] %vm223_vm0, %v1384_v13  ;;  %v872_v50 = vld [vmem:[#allocation2 + $0xc9] sm:$0xff]  ;;  %v1654_v59 = vld [vmem:[%s8141_s1 + $0x1e0] sm:$0xff] }
  0xde   : > { %1260 = vrot.lane.b32.xlu0 %v6124_v55, %s5609_s14  ;;  %1003 = vrot.lane.b32.xlu1 %v6071_v63, %s5609_s14  ;;  %v1383_v55 = vld [vmem:[#allocation2 + $0xca] sm:$0xff]  ;;  %904 = vst.msk [vmem:[#allocation3 + $0x268] sm:$0xff] %vm223_vm0, %v872_v50  ;;  %v874_v8 = vld [vmem:[#allocation2 + $0xe1] sm:$0xff] }
  0xdf   : > { %v756_v37 = vpop.permute.xlu0 %755  ;;  %v499_v43 = vpop.permute.xlu1 %498  ;;  %v1490_v44 = vld [vmem:[#allocation3 + $0x1c0] sm:$0xff]  ;;  %5144 = vmatprep.subr.bf16.mxu0 %v8146_v1  ;;  %1415 = vst.msk [vmem:[#allocation3 + $0x228] sm:$0xff] %vm223_vm0, %v1383_v55  ;;  %v1489_v7 = vld [vmem:[#allocation3 + $0x1b8] sm:$0xff]  ;;  %906 = vst.msk [vmem:[#allocation3 + $0x2b8] sm:$0xff] %vm223_vm0, %v874_v8 }
  0xe0   : > { %1884 = vmatmul.mubr.f32.gmra.mrb[20].mxu0 %v1484_v16  ;;  %838 = vst.msk [vmem:[#allocation3 + $0x210] sm:$0xff] %vm568_vm2, %v756_v37  ;;  %582 = vst.msk [vmem:[#allocation3 + $0x208] sm:$0xff] %vm568_vm2, %v499_v43  ;;  %v1493_v63 = vld [vmem:[#allocation3 + $0x1d8] sm:$0xff]  ;;  %v1657_v37 = vld [vmem:[%s8141_s1 + $0x1f8] sm:$0xff] }
  0xe1   : > { %1888 = vmatprep.mubr.f32.mxu0 %v1490_v44  ;;  %5146 = vmatpush1.bf16.msra.mxu0 %v5145_v36  ;;  %v1655_v16 = vld [vmem:[%s8141_s1 + $0x1e8] sm:$0xff]  ;;  %v1386_v44 = vld [vmem:[#allocation2 + $0xf2] sm:$0xff]  ;;  %v5160_v9 = vpack.c.bf16 %v1657_v37, %v1656_v33 }
  0xe2   : > { %1262 = vrot.lane.b32.xlu0 %v6135_v57, %s5609_s14  ;;  %1005 = vrot.lane.b32.xlu1 %v6073_v3, %s5609_s14  ;;  %v1128_v3 = vld [vmem:[#allocation2 + $0xd8] sm:$0xff]  ;;  %v5157_v42 = vpack.c.bf16 %v1655_v16, %v1654_v59  ;;  %1418 = vst.msk [vmem:[#allocation3 + $0x2a0] sm:$0xff] %vm223_vm0, %v1386_v44  ;;  %v1390_v50 = vld [vmem:[#allocation2 + $0x122] sm:$0xff] }
  0xe3   : > { %v758_v49 = vpop.permute.xlu0 %757  ;;  %v501_v40 = vpop.permute.xlu1 %500  ;;  %v1495_v47 = vld [vmem:[#allocation3 + $0x1e8] sm:$0xff]  ;;  %5147 = vmatprep.subr.bf16.mxu0 %v8146_v1  ;;  %4970 = vmatmul.mubr.msk.f32.gmra.mrb[10].mxu1 %vm223_vm0, %v1493_v63  ;;  %v1494_v57 = vld [vmem:[#allocation3 + $0x1e0] sm:$0xff]  ;;  %1160 = vst.msk [vmem:[#allocation3 + $0x248] sm:$0xff] %vm223_vm0, %v1128_v3  ;;  %v5534_v3 = vld [vmem:[#allocation2 + $0xe1] sm:$0xff] }
  0xe4   : > { %1889 = vmatmul.mubr.f32.gmra.mrb[22].mxu0 %v1489_v7  ;;  %839 = vst.msk [vmem:[#allocation3 + $0x238] sm:$0xff] %vm568_vm2, %v758_v49  ;;  %583 = vst.msk [vmem:[#allocation3 + $0x230] sm:$0xff] %vm568_vm2, %v501_v40  ;;  %4972 = vmatprep.mubr.msk.f32.mxu1 %vm223_vm0, %v1498_v12  ;;  %v1508_v43 = vld [vmem:[#allocation3 + $0x250] sm:$0xff]  ;;  %v1131_v7 = vld [vmem:[#allocation2 + $0xf8] sm:$0xff] }
  0xe5   : > { %1893 = vmatprep.mubr.f32.mxu0 %v1495_v47  ;;  %5149 = vmatpush1.bf16.msra.mxu0 %v5148_v56  ;;  %1163 = vst.msk [vmem:[#allocation3 + $0x2c0] sm:$0xff] %vm223_vm0, %v1131_v7  ;;  %v1132_v47 = vld [vmem:[#allocation2 + $0x108] sm:$0xff]  ;;  %1422 = vst.msk [vmem:[#allocation3 + $0x340] sm:$0xff] %vm223_vm0, %v1390_v50  ;;  %v5538_v44 = vld [vmem:[#allocation2 + $0x111] sm:$0xff] }
  0xe6   : > { %1264 = vrot.lane.b32.xlu0 %v6145_v60, %s5609_s14  ;;  %1007 = vrot.lane.b32.xlu1 %v6088_v11, %s5609_s14  ;;  %v1503_v30 = vld [vmem:[#allocation3 + $0x228] sm:$0xff]  ;;  %v1129_v11 = vld [vmem:[#allocation2 + $0xe0] sm:$0xff]  ;;  %1164 = vst.msk [vmem:[#allocation3 + $0x2e8] sm:$0xff] %vm223_vm0, %v1132_v47 }
  0xe7   : > { %v760_v14 = vpop.permute.xlu0 %759  ;;  %v503_v54 = vpop.permute.xlu1 %502  ;;  %v1500_v4 = vld [vmem:[#allocation3 + $0x210] sm:$0xff]  ;;  %5150 = vmatprep.subr.bf16.mxu0 %v8146_v1  ;;  %4973 = vmatmul.mubr.msk.f32.gmra.mrb[12].mxu1 %vm223_vm0, %v1503_v30  ;;  %v1499_v32 = vld [vmem:[#allocation3 + $0x208] sm:$0xff]  ;;  %1161 = vst.msk [vmem:[#allocation3 + $0x270] sm:$0xff] %vm223_vm0, %v1129_v11 }
  0xe8   : > { %1894 = vmatmul.mubr.f32.gmra.mrb[24].mxu0 %v1494_v57  ;;  %840 = vst.msk [vmem:[#allocation3 + $0x260] sm:$0xff] %vm568_vm2, %v760_v14  ;;  %584 = vst.msk [vmem:[#allocation3 + $0x258] sm:$0xff] %vm568_vm2, %v503_v54  ;;  %v1385_v60 = vld [vmem:[#allocation2 + $0xe2] sm:$0xff]  ;;  %4975 = vmatprep.mubr.msk.f32.mxu1 %vm223_vm0, %v1508_v43  ;;  %v876_v14 = vld [vmem:[#allocation2 + $0xf9] sm:$0xff] }
  0xe9   : > { %1898 = vmatprep.mubr.f32.mxu0 %v1500_v4  ;;  %5152 = vmatpush1.bf16.msra.mxu0 %v5151_v52  ;;  %1417 = vst.msk [vmem:[#allocation3 + $0x278] sm:$0xff] %vm223_vm0, %v1385_v60  ;;  %v1518_v57 = vld [vmem:[#allocation3 + $0x2a0] sm:$0xff]  ;;  %908 = vst.msk [vmem:[#allocation3 + $0x308] sm:$0xff] %vm223_vm0, %v876_v14  ;;  %v879_v43 = vld [vmem:[#allocation2 + $0x121] sm:$0xff] }
  0xea   : > { %1266 = vrot.lane.b32.xlu0 %v6155_v61, %s5609_s14  ;;  %1009 = vrot.lane.b32.xlu1 %v6105_v15, %s5609_s14  ;;  %v1130_v15 = vld [vmem:[#allocation2 + $0xf0] sm:$0xff]  ;;  %911 = vst.msk [vmem:[#allocation3 + $0x380] sm:$0xff] %vm223_vm0, %v879_v43  ;;  %v881_v47 = vld [vmem:[#allocation2 + $0x139] sm:$0xff]  ;;  %v1573_v43 = vld [vmem:[#allocation3 + $0x458] sm:$0xff] }
  0xeb   : > { %v762_v36 = vpop.permute.xlu0 %761  ;;  %v505_v2 = vpop.permute.xlu1 %504  ;;  %v1505_v17 = vld [vmem:[#allocation3 + $0x238] sm:$0xff]  ;;  %5153 = vmatprep.subr.bf16.mxu0 %v8146_v1  ;;  %v1504_v61 = vld [vmem:[#allocation3 + $0x230] sm:$0xff]  ;;  %1162 = vst.msk [vmem:[#allocation3 + $0x298] sm:$0xff] %vm223_vm0, %v1130_v15  ;;  %v5535_v54 = vld [vmem:[#allocation2 + $0xf1] sm:$0xff] }
  0xec   : > { %1899 = vmatmul.mubr.f32.gmra.mrb[26].mxu0 %v1499_v32  ;;  %841 = vst.msk [vmem:[#allocation3 + $0x288] sm:$0xff] %vm568_vm2, %v762_v36  ;;  %585 = vst.msk [vmem:[#allocation3 + $0x280] sm:$0xff] %vm568_vm2, %v505_v2  ;;  %v1388_v52 = vld [vmem:[#allocation2 + $0x10a] sm:$0xff] }
  0xed   : > { %1903 = vmatprep.mubr.f32.mxu0 %v1505_v17  ;;  %5155 = vmatpush1.bf16.msra.mxu0 %v5154_v48  ;;  %1420 = vst.msk [vmem:[#allocation3 + $0x2f0] sm:$0xff] %vm223_vm0, %v1388_v52  ;;  %v877_v32 = vld [vmem:[#allocation2 + $0x109] sm:$0xff]  ;;  %v5536_v48 = vld [vmem:[#allocation2 + $0xf9] sm:$0xff]  ;;  %v878_v15 = vld [vmem:[#allocation2 + $0x111] sm:$0xff] }
  0xee   : > { %1268 = vrot.lane.b32.xlu0 %v6165_v62, %s5609_s14  ;;  %1011 = vrot.lane.b32.xlu1 %v6116_v19, %s5609_s14  ;;  %v1387_v62 = vld [vmem:[#allocation2 + $0xfa] sm:$0xff]  ;;  %909 = vst.msk [vmem:[#allocation3 + $0x330] sm:$0xff] %vm223_vm0, %v877_v32  ;;  %v1391_v2 = vld [vmem:[#allocation2 + $0x12a] sm:$0xff]  ;;  %910 = vst.msk [vmem:[#allocation3 + $0x358] sm:$0xff] %vm223_vm0, %v878_v15 }
  0xef   : > { %v764_v55 = vpop.permute.xlu0 %763  ;;  %v507_v63 = vpop.permute.xlu1 %506  ;;  %v1510_v53 = vld [vmem:[#allocation3 + $0x260] sm:$0xff]  ;;  %5156 = vmatprep.subr.bf16.mxu0 %v8146_v1  ;;  %1419 = vst.msk [vmem:[#allocation3 + $0x2c8] sm:$0xff] %vm223_vm0, %v1387_v62  ;;  %v1509_v56 = vld [vmem:[#allocation3 + $0x258] sm:$0xff]  ;;  %1423 = vst.msk [vmem:[#allocation3 + $0x368] sm:$0xff] %vm223_vm0, %v1391_v2 }
  0xf0   : > { %1904 = vmatmul.mubr.f32.gmra.mrb[28].mxu0 %v1504_v61  ;;  %842 = vst.msk [vmem:[#allocation3 + $0x2b0] sm:$0xff] %vm568_vm2, %v764_v55  ;;  %586 = vst.msk [vmem:[#allocation3 + $0x2a8] sm:$0xff] %vm568_vm2, %v507_v63  ;;  %v1513_v19 = vld [vmem:[#allocation3 + $0x278] sm:$0xff]  ;;  %v1392_v55 = vld [vmem:[#allocation2 + $0x13a] sm:$0xff] }
  0xf1   : > { %1908 = vmatprep.mubr.f32.mxu0 %v1510_v53  ;;  %5158 = vmatpush1.bf16.msra.mxu0 %v5157_v42  ;;  %v5537_v61 = vld [vmem:[#allocation2 + $0x109] sm:$0xff]  ;;  %1424 = vst.msk [vmem:[#allocation3 + $0x390] sm:$0xff] %vm223_vm0, %v1392_v55  ;;  %913 = vst.msk [vmem:[#allocation3 + $0x3d0] sm:$0xff] %vm223_vm0, %v881_v47 }
  0xf2   : > { %1270 = vrot.lane.b32.xlu0 %v6175_v0, %s5609_s14  ;;  %1013 = vrot.lane.b32.xlu1 %v6127_v20, %s5609_s14  ;;  %v875_v20 = vld [vmem:[#allocation2 + $0xf1] sm:$0xff]  ;;  %v1401_v47 = vld [vmem:[#allocation2 + $0x1a2] sm:$0xff] }
  0xf3   : > { %v766_v38 = vpop.permute.xlu0 %765  ;;  %v509_v49 = vpop.permute.xlu1 %508  ;;  %v1515_v40 = vld [vmem:[#allocation3 + $0x288] sm:$0xff]  ;;  %5159 = vmatprep.subr.bf16.mxu0 %v8146_v1  ;;  %4976 = vmatmul.mubr.msk.f32.gmra.mrb[14].mxu1 %vm223_vm0, %v1513_v19  ;;  %v1514_v0 = vld [vmem:[#allocation3 + $0x280] sm:$0xff]  ;;  %907 = vst.msk [vmem:[#allocation3 + $0x2e0] sm:$0xff] %vm223_vm0, %v875_v20  ;;  %1433 = vst.msk [vmem:[#allocation3 + $0x4f8] sm:$0xff] %vm223_vm0, %v1401_v47 }
  0xf4   : > { %1909 = vmatmul.mubr.f32.gmra.mrb[30].mxu0 %v1509_v56  ;;  %843 = vst.msk [vmem:[#allocation3 + $0x2d8] sm:$0xff] %vm568_vm2, %v766_v38  ;;  %587 = vst.msk [vmem:[#allocation3 + $0x2d0] sm:$0xff] %vm568_vm2, %v509_v49  ;;  %4978 = vmatprep.mubr.msk.f32.mxu1 %vm223_vm0, %v1518_v57  ;;  %v880_v56 = vld [vmem:[#allocation2 + $0x129] sm:$0xff]  ;;  %v1394_v20 = vld [vmem:[#allocation2 + $0x152] sm:$0xff] }
  0xf5   : > { %1913 = vmatprep.mubr.f32.mxu0 %v1515_v40  ;;  %5161 = vmatpush1.bf16.msra.mxu0 %v5160_v9  ;;  %v5539_v9 = vld [vmem:[#allocation2 + $0x121] sm:$0xff]  ;;  %912 = vst.msk [vmem:[#allocation3 + $0x3a8] sm:$0xff] %vm223_vm0, %v880_v56  ;;  %1426 = vst.msk [vmem:[#allocation3 + $0x3e0] sm:$0xff] %vm223_vm0, %v1394_v20 }
  0xf6   : > { %1272 = vrot.lane.b32.xlu0 %v5534_v3, %s5609_s14  ;;  %1015 = vrot.lane.b32.xlu1 %v6137_v21, %s5609_s14  ;;  %v1523_v12 = vld [vmem:[#allocation3 + $0x2c8] sm:$0xff]  ;;  %v887_v56 = vld [vmem:[#allocation2 + $0x181] sm:$0xff] }
  0xf7   : > { %v768_v26 = vpop.permute.xlu0 %767  ;;  %v511_v45 = vpop.permute.xlu1 %510  ;;  %v1520_v58 = vld [vmem:[#allocation3 + $0x2b0] sm:$0xff]  ;;  %4979 = vmatmul.mubr.msk.f32.gmra.mrb[16].mxu1 %vm223_vm0, %v1523_v12  ;;  %v1389_v21 = vld [vmem:[#allocation2 + $0x112] sm:$0xff]  ;;  %919 = vst.msk [vmem:[#allocation3 + $0x4c0] sm:$0xff] %vm223_vm0, %v887_v56 }
  0xf8   : > { %1914 = vmatmul.mubr.f32.gmra.mrb[32].mxu0 %v1514_v0  ;;  %844 = vst.msk [vmem:[#allocation3 + $0x300] sm:$0xff] %vm568_vm2, %v768_v26  ;;  %588 = vst.msk [vmem:[#allocation3 + $0x2f8] sm:$0xff] %vm568_vm2, %v511_v45  ;;  %v1519_v13 = vld [vmem:[#allocation3 + $0x2a8] sm:$0xff]  ;;  %v5540_v0 = vld [vmem:[#allocation2 + $0x129] sm:$0xff] }
  0xf9   : > { %1918 = vmatprep.mubr.f32.mxu0 %v1520_v58  ;;  %1421 = vst.msk [vmem:[#allocation3 + $0x318] sm:$0xff] %vm223_vm0, %v1389_v21  ;;  %v1543_v19 = vld [vmem:[#allocation3 + $0x368] sm:$0xff]  ;;  %v882_v58 = vld [vmem:[#allocation2 + $0x141] sm:$0xff] }
  0xfa   : > { %1274 = vrot.lane.b32.xlu0 %v5535_v54, %s5609_s14  ;;  %1017 = vrot.lane.b32.xlu1 %v6147_v22, %s5609_s14  ;;  %v1528_v22 = vld [vmem:[#allocation3 + $0x2f0] sm:$0xff]  ;;  %914 = vst.msk [vmem:[#allocation3 + $0x3f8] sm:$0xff] %vm223_vm0, %v882_v58  ;;  %v1593_v58 = vld [vmem:[#allocation3 + $0x4f8] sm:$0xff] }
  0xfb   : > { %v770_v4 = vpop.permute.xlu0 %769  ;;  %v513_v30 = vpop.permute.xlu1 %512  ;;  %v1525_v11 = vld [vmem:[#allocation3 + $0x2d8] sm:$0xff]  ;;  %v1524_v60 = vld [vmem:[#allocation3 + $0x2d0] sm:$0xff]  ;;  %4981 = vmatprep.mubr.msk.f32.mxu1 %vm223_vm0, %v1528_v22  ;;  %v1202_v22 = vld [vmem:[#allocation2 + $0x151] sm:$0xff]  ;;  %3659 = vst.msk [vmem:[#allocation3 + $0x4f8] sm:$0xff] %vm223_vm0, %v1401_v47 }
  0xfc   : > { %1919 = vmatmul.mubr.f32.gmra.mrb[34].mxu0 %v1519_v13  ;;  %845 = vst.msk [vmem:[#allocation3 + $0x328] sm:$0xff] %vm568_vm2, %v770_v4  ;;  %589 = vst.msk [vmem:[#allocation3 + $0x320] sm:$0xff] %vm568_vm2, %v513_v30  ;;  %v1395_v26 = vld [vmem:[#allocation2 + $0x15a] sm:$0xff]  ;;  %v883_v30 = vld [vmem:[#allocation2 + $0x151] sm:$0xff] }
  0xfd   : > { %1923 = vmatprep.mubr.f32.mxu0 %v1525_v11  ;;  %1427 = vst.msk [vmem:[#allocation3 + $0x408] sm:$0xff] %vm223_vm0, %v1395_v26  ;;  %v5541_v12 = vld [vmem:[#allocation2 + $0x139] sm:$0xff]  ;;  %v1201_v54 = vld [vmem:[#allocation2 + $0x141] sm:$0xff]  ;;  %915 = vst.msk [vmem:[#allocation3 + $0x420] sm:$0xff] %vm223_vm0, %v883_v30 }
  0xfe   : > { %1276 = vrot.lane.b32.xlu0 %v5536_v48, %s5609_s14  ;;  %1019 = vrot.lane.b32.xlu1 %v6157_v23, %s5609_s14  ;;  %v1396_v11 = vld [vmem:[#allocation2 + $0x16a] sm:$0xff] }
  0xff   : > { %v772_v59 = vpop.permute.xlu0 %771  ;;  %v515_v16 = vpop.permute.xlu1 %514  ;;  %v1530_v36 = vld [vmem:[#allocation3 + $0x300] sm:$0xff]  ;;  %v1529_v23 = vld [vmem:[#allocation3 + $0x2f8] sm:$0xff]  ;;  %1428 = vst.msk [vmem:[#allocation3 + $0x430] sm:$0xff] %vm223_vm0, %v1396_v11 }
 0x100   : > { %1924 = vmatmul.mubr.f32.gmra.mrb[36].mxu0 %v1524_v60  ;;  %846 = vst.msk [vmem:[#allocation3 + $0x350] sm:$0xff] %vm568_vm2, %v772_v59  ;;  %590 = vst.msk [vmem:[#allocation3 + $0x348] sm:$0xff] %vm568_vm2, %v515_v16  ;;  %v1533_v17 = vld [vmem:[#allocation3 + $0x318] sm:$0xff]  ;;  %v884_v59 = vld [vmem:[#allocation2 + $0x159] sm:$0xff] }
 0x101   : > { %1928 = vmatprep.mubr.f32.mxu0 %v1530_v36  ;;  %4982 = vmatmul.mubr.msk.f32.gmra.mrb[18].mxu1 %vm223_vm0, %v1533_v17  ;;  %916 = vst.msk [vmem:[#allocation3 + $0x448] sm:$0xff] %vm223_vm0, %v884_v59  ;;  %v1203_v17 = vld [vmem:[#allocation2 + $0x159] sm:$0xff] }
 0x102   : > { %1278 = vrot.lane.b32.xlu0 %v5537_v61, %s5609_s14  ;;  %1021 = vrot.lane.b32.xlu1 %v6167_v24, %s5609_s14  ;;  %v1538_v24 = vld [vmem:[#allocation3 + $0x340] sm:$0xff] }
 0x103   : > { %v774_v42 = vpop.permute.xlu0 %773  ;;  %v517_v33 = vpop.permute.xlu1 %516  ;;  %v1535_v46 = vld [vmem:[#allocation3 + $0x328] sm:$0xff]  ;;  %v1534_v37 = vld [vmem:[#allocation3 + $0x320] sm:$0xff]  ;;  %4984 = vmatprep.mubr.msk.f32.mxu1 %vm223_vm0, %v1538_v24 }
 0x104   : > { %1929 = vmatmul.mubr.f32.gmra.mrb[38].mxu0 %v1529_v23  ;;  %847 = vst.msk [vmem:[#allocation3 + $0x378] sm:$0xff] %vm568_vm2, %v774_v42  ;;  %591 = vst.msk [vmem:[#allocation3 + $0x370] sm:$0xff] %vm568_vm2, %v517_v33  ;;  %v1563_v50 = vld [vmem:[#allocation3 + $0x408] sm:$0xff]  ;;  %v1142_v23 = vld [vmem:[#allocation2 + $0x180] sm:$0xff] }
 0x105   : > { %1933 = vmatprep.mubr.f32.mxu0 %v1535_v46  ;;  %4985 = vmatmul.mubr.msk.f32.gmra.mrb[20].mxu1 %vm223_vm0, %v1543_v19  ;;  %1174 = vst.msk [vmem:[#allocation3 + $0x478] sm:$0xff] %vm223_vm0, %v1142_v23  ;;  %v885_v61 = vld [vmem:[#allocation2 + $0x169] sm:$0xff]  ;;  %v886_v24 = vld [vmem:[#allocation2 + $0x171] sm:$0xff] }
 0x106   : > { %1280 = vrot.lane.b32.xlu0 %v5538_v44, %s5609_s14  ;;  %1023 = vrot.lane.b32.xlu1 %v6177_v25, %s5609_s14  ;;  %v1393_v25 = vld [vmem:[#allocation2 + $0x142] sm:$0xff]  ;;  %917 = vst.msk [vmem:[#allocation3 + $0x470] sm:$0xff] %vm223_vm0, %v885_v61  ;;  %918 = vst.msk [vmem:[#allocation3 + $0x498] sm:$0xff] %vm223_vm0, %v886_v24  ;;  %v1144_v19 = vld [vmem:[#allocation2 + $0x198] sm:$0xff] }
 0x107   : > { %v776_v63 = vpop.permute.xlu0 %775  ;;  %v519_v53 = vpop.permute.xlu1 %518  ;;  %v1540_v62 = vld [vmem:[#allocation3 + $0x350] sm:$0xff]  ;;  %v1539_v7 = vld [vmem:[#allocation3 + $0x348] sm:$0xff]  ;;  %1425 = vst.msk [vmem:[#allocation3 + $0x3b8] sm:$0xff] %vm223_vm0, %v1393_v25  ;;  %v1143_v44 = vld [vmem:[#allocation2 + $0x188] sm:$0xff] }
 0x108   : > { %1934 = vmatmul.mubr.f32.gmra.mrb[40].mxu0 %v1534_v37  ;;  %848 = vst.msk [vmem:[#allocation3 + $0x3a0] sm:$0xff] %vm568_vm2, %v776_v63  ;;  %592 = vst.msk [vmem:[#allocation3 + $0x398] sm:$0xff] %vm568_vm2, %v519_v53  ;;  %v1204_v37 = vld [vmem:[#allocation2 + $0x169] sm:$0xff] }
 0x109   : > { %1938 = vmatprep.mubr.f32.mxu0 %v1540_v62  ;;  %1175 = vst.msk [vmem:[#allocation3 + $0x4a0] sm:$0xff] %vm223_vm0, %v1143_v44  ;;  %v1205_v62 = vld [vmem:[#allocation2 + $0x171] sm:$0xff]  ;;  %1176 = vst.msk [vmem:[#allocation3 + $0x4c8] sm:$0xff] %vm223_vm0, %v1144_v19 }
 0x10a   : > { %1282 = vrot.lane.b32.xlu0 %v5539_v9, %s5609_s14  ;;  %1025 = vrot.lane.b32.xlu1 %v6185_v27, %s5609_s14  ;;  %v1548_v27 = vld [vmem:[#allocation3 + $0x390] sm:$0xff] }
 0x10b   : > { %v778_v8 = vpop.permute.xlu0 %777  ;;  %v521_v38 = vpop.permute.xlu1 %520  ;;  %v1545_v49 = vld [vmem:[#allocation3 + $0x378] sm:$0xff]  ;;  %v1544_v40 = vld [vmem:[#allocation3 + $0x370] sm:$0xff]  ;;  %4987 = vmatprep.mubr.msk.f32.mxu1 %vm223_vm0, %v1548_v27 }
 0x10c   : > { %1939 = vmatmul.mubr.f32.gmra.mrb[42].mxu0 %v1539_v7  ;;  %849 = vst.msk [vmem:[#allocation3 + $0x3c8] sm:$0xff] %vm568_vm2, %v778_v8  ;;  %593 = vst.msk [vmem:[#allocation3 + $0x3c0] sm:$0xff] %vm568_vm2, %v521_v38  ;;  %v1578_v7 = vld [vmem:[#allocation3 + $0x480] sm:$0xff] }
 0x10d   : > { %1943 = vmatprep.mubr.f32.mxu0 %v1545_v49  ;;  %v1206_v49 = vld [vmem:[#allocation2 + $0x181] sm:$0xff] }
 0x10e   : > { %1284 = vrot.lane.b32.xlu0 %v5540_v0, %s5609_s14  ;;  %1027 = vrot.lane.b32.xlu1 %v6192_v29, %s5609_s14  ;;  %v1553_v45 = vld [vmem:[#allocation3 + $0x3b8] sm:$0xff] }
 0x10f   : > { %v780_v3 = vpop.permute.xlu0 %779  ;;  %v523_v57 = vpop.permute.xlu1 %522  ;;  %v1550_v52 = vld [vmem:[#allocation3 + $0x3a0] sm:$0xff]  ;;  %v1549_v29 = vld [vmem:[#allocation3 + $0x398] sm:$0xff]  ;;  %4988 = vmatmul.mubr.msk.f32.gmra.mrb[22].mxu1 %vm223_vm0, %v1553_v45  ;;  %v1208_v45 = vld [vmem:[#allocation2 + $0x199] sm:$0xff] }
 0x110   : > { %1944 = vmatmul.mubr.f32.gmra.mrb[44].mxu0 %v1544_v40  ;;  %850 = vst.msk [vmem:[#allocation3 + $0x3f0] sm:$0xff] %vm568_vm2, %v780_v3  ;;  %594 = vst.msk [vmem:[#allocation3 + $0x3e8] sm:$0xff] %vm568_vm2, %v523_v57  ;;  %v1583_v40 = vld [vmem:[#allocation3 + $0x4a8] sm:$0xff] }
 0x111   : > { %1948 = vmatprep.mubr.f32.mxu0 %v1550_v52 }
 0x112   : > { %1286 = vrot.lane.b32.xlu0 %v5541_v12, %s5609_s14  ;;  %1029 = vrot.lane.b32.xlu1 %v6201_v31, %s5609_s14  ;;  %v1558_v31 = vld [vmem:[#allocation3 + $0x3e0] sm:$0xff] }
 0x113   : > { %v782_v21 = vpop.permute.xlu0 %781  ;;  %v525_v13 = vpop.permute.xlu1 %524  ;;  %v1555_v14 = vld [vmem:[#allocation3 + $0x3c8] sm:$0xff]  ;;  %v1554_v4 = vld [vmem:[#allocation3 + $0x3c0] sm:$0xff]  ;;  %4990 = vmatprep.mubr.msk.f32.mxu1 %vm223_vm0, %v1558_v31 }
 0x114   : > { %1949 = vmatmul.mubr.f32.gmra.mrb[46].mxu0 %v1549_v29  ;;  %851 = vst.msk [vmem:[#allocation3 + $0x418] sm:$0xff] %vm568_vm2, %v782_v21  ;;  %595 = vst.msk [vmem:[#allocation3 + $0x410] sm:$0xff] %vm568_vm2, %v525_v13  ;;  %4991 = vmatmul.mubr.msk.f32.gmra.mrb[24].mxu1 %vm223_vm0, %v1563_v50 }
 0x115   : > { %1953 = vmatprep.mubr.f32.mxu0 %v1555_v14 }
 0x116   : > { %1288 = vrot.lane.b32.xlu0 %v1201_v54, %s5609_s14  ;;  %1031 = vrot.lane.b32.xlu1 %v6209_v35, %s5609_s14 }
 0x117   : > { %v784_v60 = vpop.permute.xlu0 %783  ;;  %v527_v32 = vpop.permute.xlu1 %526  ;;  %v1560_v48 = vld [vmem:[#allocation3 + $0x3f0] sm:$0xff]  ;;  %v1559_v35 = vld [vmem:[#allocation3 + $0x3e8] sm:$0xff] }
 0x118   : > { %1954 = vmatmul.mubr.f32.gmra.mrb[48].mxu0 %v1554_v4  ;;  %852 = vst.msk [vmem:[#allocation3 + $0x440] sm:$0xff] %vm568_vm2, %v784_v60  ;;  %596 = vst.msk [vmem:[#allocation3 + $0x438] sm:$0xff] %vm568_vm2, %v527_v32 }
 0x119   : > { %1958 = vmatprep.mubr.f32.mxu0 %v1560_v48 }
 0x11a   : > { %1290 = vrot.lane.b32.xlu0 %v1202_v22, %s5609_s14  ;;  %1033 = vrot.lane.b32.xlu1 %v6217_v41, %s5609_s14  ;;  %v1568_v41 = vld [vmem:[#allocation3 + $0x430] sm:$0xff] }
 0x11b   : > { %v786_v16 = vpop.permute.xlu0 %785  ;;  %v529_v36 = vpop.permute.xlu1 %528  ;;  %v1565_v2 = vld [vmem:[#allocation3 + $0x418] sm:$0xff]  ;;  %v1564_v15 = vld [vmem:[#allocation3 + $0x410] sm:$0xff]  ;;  %4993 = vmatprep.mubr.msk.f32.mxu1 %vm223_vm0, %v1568_v41 }
 0x11c   : > { %1959 = vmatmul.mubr.f32.gmra.mrb[50].mxu0 %v1559_v35  ;;  %853 = vst.msk [vmem:[#allocation3 + $0x468] sm:$0xff] %vm568_vm2, %v786_v16  ;;  %597 = vst.msk [vmem:[#allocation3 + $0x460] sm:$0xff] %vm568_vm2, %v529_v36  ;;  %4994 = vmatmul.mubr.msk.f32.gmra.mrb[26].mxu1 %vm223_vm0, %v1573_v43 }
 0x11d   : > { %1963 = vmatprep.mubr.f32.mxu0 %v1565_v2  ;;  %4996 = vmatprep.mubr.msk.f32.mxu1 %vm223_vm0, %v1578_v7 }
 0x11e   : > { %1292 = vrot.lane.b32.xlu0 %v1203_v17, %s5609_s14  ;;  %1035 = vrot.lane.b32.xlu1 %v6225_v51, %s5609_s14 }
 0x11f   : > { %v788_v42 = vpop.permute.xlu0 %787  ;;  %v531_v33 = vpop.permute.xlu1 %530  ;;  %v1570_v46 = vld [vmem:[#allocation3 + $0x440] sm:$0xff]  ;;  %v1569_v51 = vld [vmem:[#allocation3 + $0x438] sm:$0xff] }
 0x120   : > { %1964 = vmatmul.mubr.f32.gmra.mrb[52].mxu0 %v1564_v15  ;;  %854 = vst.msk [vmem:[#allocation3 + $0x490] sm:$0xff] %vm568_vm2, %v788_v42  ;;  %598 = vst.msk [vmem:[#allocation3 + $0x488] sm:$0xff] %vm568_vm2, %v531_v33  ;;  %4997 = vmatmul.mubr.msk.f32.gmra.mrb[28].mxu1 %vm223_vm0, %v1583_v40 }
 0x121   : > { %1968 = vmatprep.mubr.f32.mxu0 %v1570_v46 }
 0x122   : > { %1294 = vrot.lane.b32.xlu0 %v1204_v37, %s5609_s14  ;;  %1037 = vrot.lane.b32.xlu1 %v6233_v10, %s5609_s14  ;;  %v1400_v10 = vld [vmem:[#allocation2 + $0x19a] sm:$0xff] }
 0x123   : > { %v790_v55 = vpop.permute.xlu0 %789  ;;  %v533_v63 = vpop.permute.xlu1 %532  ;;  %v1575_v53 = vld [vmem:[#allocation3 + $0x468] sm:$0xff]  ;;  %v1574_v25 = vld [vmem:[#allocation3 + $0x460] sm:$0xff]  ;;  %1432 = vst.msk [vmem:[#allocation3 + $0x4d0] sm:$0xff] %vm223_vm0, %v1400_v10 }
 0x124   : > { %1969 = vmatmul.mubr.f32.gmra.mrb[54].mxu0 %v1569_v51  ;;  %855 = vst.msk [vmem:[#allocation3 + $0x4b8] sm:$0xff] %vm568_vm2, %v790_v55  ;;  %599 = vst.msk [vmem:[#allocation3 + $0x4b0] sm:$0xff] %vm568_vm2, %v533_v63 }
 0x125   : > { %1973 = vmatprep.mubr.f32.mxu0 %v1575_v53 }
 0x126   : > { %1296 = vrot.lane.b32.xlu0 %v1205_v62, %s5609_s14  ;;  %1039 = vrot.lane.b32.xlu1 %v6241_v18, %s5609_s14  ;;  %v1145_v18 = vld [vmem:[#allocation2 + $0x1a0] sm:$0xff] }
 0x127   : > { %v792_v9 = vpop.permute.xlu0 %791  ;;  %v535_v8 = vpop.permute.xlu1 %534  ;;  %v1580_v38 = vld [vmem:[#allocation3 + $0x490] sm:$0xff]  ;;  %v1579_v0 = vld [vmem:[#allocation3 + $0x488] sm:$0xff]  ;;  %1177 = vst.msk [vmem:[#allocation3 + $0x4f0] sm:$0xff] %vm223_vm0, %v1145_v18 }
 0x128   : > { %1974 = vmatmul.mubr.f32.gmra.mrb[56].mxu0 %v1574_v25  ;;  %856 = vst.msk [vmem:[#allocation3 + $0x4e0] sm:$0xff] %vm568_vm2, %v792_v9  ;;  %600 = vst.msk [vmem:[#allocation3 + $0x4d8] sm:$0xff] %vm568_vm2, %v535_v8 }
 0x129   : > { %1978 = vmatprep.mubr.f32.mxu0 %v1580_v38 }
 0x12a   : > { %1298 = vrot.lane.b32.xlu0 %v1206_v49, %s5609_s14  ;;  %1041 = vrot.lane.b32.xlu1 %v6249_v5, %s5609_s14  ;;  %v1588_v52 = vld [vmem:[#allocation3 + $0x4d0] sm:$0xff] }
 0x12b   : > { %v1585_v27 = vld [vmem:[#allocation3 + $0x4b8] sm:$0xff]  ;;  %v1584_v57 = vld [vmem:[#allocation3 + $0x4b0] sm:$0xff]  ;;  %4999 = vmatprep.mubr.msk.f32.mxu1 %vm223_vm0, %v1588_v52  ;;  %3658 = vst.msk [vmem:[#allocation3 + $0x4d0] sm:$0xff] %vm223_vm0, %v1400_v10 }
 0x12c   : > { %1979 = vmatmul.mubr.f32.gmra.mrb[58].mxu0 %v1579_v0  ;;  %v1243_v20 = vpop.permute.xlu0 %1242  ;;  %v986_v3 = vpop.permute.xlu1 %985  ;;  %5000 = vmatmul.mubr.msk.f32.gmra.mrb[30].mxu1 %vm223_vm0, %v1593_v58 }
 0x12d   : > { %1338 = vst.msk [vmem:[#allocation3 + $0x18] sm:$0xff] %vm568_vm2, %v1243_v20  ;;  %1081 = vst.msk [vmem:[#allocation3 + $0x10] sm:$0xff] %vm568_vm2, %v986_v3  ;;  %1983 = vmatprep.mubr.f32.mxu0 %v1585_v27 }
 0x12e   : > { %1300 = vrot.lane.b32.xlu0 %v6291_v6, %s5609_s14  ;;  %1043 = vrot.lane.b32.xlu1 %v6263_v39, %s5609_s14  ;;  %v1209_v39 = vld [vmem:[#allocation2 + $0x1a1] sm:$0xff] }
 0x12f   : > { %v1590_v26 = vld [vmem:[#allocation3 + $0x4e0] sm:$0xff]  ;;  %v1589_v6 = vld [vmem:[#allocation3 + $0x4d8] sm:$0xff] }
 0x130   : > { %1984 = vmatmul.mubr.f32.gmra.mrb[60].mxu0 %v1584_v57  ;;  %v1245_v5 = vpop.permute.xlu0 %1244  ;;  %v988_v29 = vpop.permute.xlu1 %987 }
 0x131   : > { %1339 = vst.msk [vmem:[#allocation3 + $0x40] sm:$0xff] %vm568_vm2, %v1245_v5  ;;  %1082 = vst.msk [vmem:[#allocation3 + $0x38] sm:$0xff] %vm568_vm2, %v988_v29  ;;  %1988 = vmatprep.mubr.f32.mxu0 %v1590_v26 }
 0x132   : > { %1302 = vrot.lane.b32.xlu0 %v1208_v45, %s5609_s14  ;;  %1045 = vrot.lane.b32.xlu1 %v6317_v34, %s5609_s14 }
 0x134   : > { %1989 = vmatmul.mubr.f32.gmra.mrb[62].mxu0 %v1589_v6  ;;  %v1247_v12 = vpop.permute.xlu0 %1246  ;;  %v990_v21 = vpop.permute.xlu1 %989  ;;  %v1437_v13 = vld [vmem:[#allocation3 + $0x18] sm:$0xff]  ;;  %v1436_v14 = vld [vmem:[#allocation3 + $0x10] sm:$0xff] }
 0x135   : > { %1340 = vst.msk [vmem:[#allocation3 + $0x68] sm:$0xff] %vm568_vm2, %v1247_v12  ;;  %1083 = vst.msk [vmem:[#allocation3 + $0x60] sm:$0xff] %vm568_vm2, %v990_v21  ;;  %2058 = vmatprep.mubr.f32.mxu0 %v1437_v13 }
 0x136   : > { %1304 = vrot.lane.b32.xlu0 %v1209_v39, %s5609_s14  ;;  %1047 = vrot.lane.b32.xlu1 %v6335_v28, %s5609_s14 }
 0x138   : > { %2059 = vmatmul.mubr.f32.vlgmr.msra.gmra.mrb[0].mxu0 %v1436_v14  ;;  %v1249_v54 = vpop.permute.xlu0 %1248  ;;  %v992_v4 = vpop.permute.xlu1 %991  ;;  %v1442_v34 = vld [vmem:[#allocation3 + $0x40] sm:$0xff]  ;;  %v1441_v30 = vld [vmem:[#allocation3 + $0x38] sm:$0xff] }
 0x139   : > { %1341 = vst.msk [vmem:[#allocation3 + $0x90] sm:$0xff] %vm568_vm2, %v1249_v54  ;;  %1084 = vst.msk [vmem:[#allocation3 + $0x88] sm:$0xff] %vm568_vm2, %v992_v4  ;;  %2063 = vmatprep.mubr.f32.mxu0 %v1442_v34 }
 0x13c   : > { %2064 = vmatmul.mubr.f32.gmra.mrb[2].mxu0 %v1441_v30  ;;  %v1251_v31 = vpop.permute.xlu0 %1250  ;;  %v994_v11 = vpop.permute.xlu1 %993  ;;  %v1447_v60 = vld [vmem:[#allocation3 + $0x68] sm:$0xff]  ;;  %v1446_v28 = vld [vmem:[#allocation3 + $0x60] sm:$0xff] }
 0x13d   : > { %1342 = vst.msk [vmem:[#allocation3 + $0xb8] sm:$0xff] %vm568_vm2, %v1251_v31  ;;  %1085 = vst.msk [vmem:[#allocation3 + $0xb0] sm:$0xff] %vm568_vm2, %v994_v11  ;;  %2068 = vmatprep.mubr.f32.mxu0 %v1447_v60 }
 0x140   : > { %2069 = vmatmul.mubr.f32.gmra.mrb[4].mxu0 %v1446_v28  ;;  %v1253_v32 = vpop.permute.xlu0 %1252  ;;  %v996_v48 = vpop.permute.xlu1 %995  ;;  %v1452_v22 = vld [vmem:[#allocation3 + $0x90] sm:$0xff]  ;;  %v1451_v50 = vld [vmem:[#allocation3 + $0x88] sm:$0xff] }
 0x141   : > { %1343 = vst.msk [vmem:[#allocation3 + $0xe0] sm:$0xff] %vm568_vm2, %v1253_v32  ;;  %1086 = vst.msk [vmem:[#allocation3 + $0xd8] sm:$0xff] %vm568_vm2, %v996_v48  ;;  %2073 = vmatprep.mubr.f32.mxu0 %v1452_v22 }
 0x144   : > { %2074 = vmatmul.mubr.f32.gmra.mrb[6].mxu0 %v1451_v50  ;;  %v1255_v35 = vpop.permute.xlu0 %1254  ;;  %v998_v59 = vpop.permute.xlu1 %997  ;;  %v1457_v16 = vld [vmem:[#allocation3 + $0xb8] sm:$0xff]  ;;  %v1456_v36 = vld [vmem:[#allocation3 + $0xb0] sm:$0xff] }
 0x145   : > { %1344 = vst.msk [vmem:[#allocation3 + $0x108] sm:$0xff] %vm568_vm2, %v1255_v35  ;;  %1087 = vst.msk [vmem:[#allocation3 + $0x100] sm:$0xff] %vm568_vm2, %v998_v59  ;;  %2078 = vmatprep.mubr.f32.mxu0 %v1457_v16 }
 0x148   : > { %2079 = vmatmul.mubr.f32.gmra.mrb[8].mxu0 %v1456_v36  ;;  %v1257_v2 = vpop.permute.xlu0 %1256  ;;  %v1000_v17 = vpop.permute.xlu1 %999  ;;  %v1462_v23 = vld [vmem:[#allocation3 + $0xe0] sm:$0xff]  ;;  %v1461_v15 = vld [vmem:[#allocation3 + $0xd8] sm:$0xff] }
 0x149   : > { %1345 = vst.msk [vmem:[#allocation3 + $0x130] sm:$0xff] %vm568_vm2, %v1257_v2  ;;  %1088 = vst.msk [vmem:[#allocation3 + $0x128] sm:$0xff] %vm568_vm2, %v1000_v17  ;;  %2083 = vmatprep.mubr.f32.mxu0 %v1462_v23 }
 0x14c   : > { %2084 = vmatmul.mubr.f32.gmra.mrb[10].mxu0 %v1461_v15  ;;  %v1259_v61 = vpop.permute.xlu0 %1258  ;;  %v1002_v41 = vpop.permute.xlu1 %1001  ;;  %v1467_v42 = vld [vmem:[#allocation3 + $0x108] sm:$0xff]  ;;  %v1466_v33 = vld [vmem:[#allocation3 + $0x100] sm:$0xff] }
 0x14d   : > { %1346 = vst.msk [vmem:[#allocation3 + $0x158] sm:$0xff] %vm568_vm2, %v1259_v61  ;;  %1089 = vst.msk [vmem:[#allocation3 + $0x150] sm:$0xff] %vm568_vm2, %v1002_v41  ;;  %2088 = vmatprep.mubr.f32.mxu0 %v1467_v42 }
 0x150   : > { %2089 = vmatmul.mubr.f32.gmra.mrb[12].mxu0 %v1466_v33  ;;  %v1261_v46 = vpop.permute.xlu0 %1260  ;;  %v1004_v37 = vpop.permute.xlu1 %1003  ;;  %v1472_v43 = vld [vmem:[#allocation3 + $0x130] sm:$0xff]  ;;  %v1471_v44 = vld [vmem:[#allocation3 + $0x128] sm:$0xff] }
 0x151   : > { %1347 = vst.msk [vmem:[#allocation3 + $0x180] sm:$0xff] %vm568_vm2, %v1261_v46  ;;  %1090 = vst.msk [vmem:[#allocation3 + $0x178] sm:$0xff] %vm568_vm2, %v1004_v37  ;;  %2093 = vmatprep.mubr.f32.mxu0 %v1472_v43 }
 0x154   : > { %2094 = vmatmul.mubr.f32.gmra.mrb[14].mxu0 %v1471_v44  ;;  %v1263_v51 = vpop.permute.xlu0 %1262  ;;  %v1006_v24 = vpop.permute.xlu1 %1005  ;;  %v1477_v55 = vld [vmem:[#allocation3 + $0x158] sm:$0xff]  ;;  %v1476_v63 = vld [vmem:[#allocation3 + $0x150] sm:$0xff] }
 0x155   : > { %1348 = vst.msk [vmem:[#allocation3 + $0x1a8] sm:$0xff] %vm568_vm2, %v1263_v51  ;;  %1091 = vst.msk [vmem:[#allocation3 + $0x1a0] sm:$0xff] %vm568_vm2, %v1006_v24  ;;  %2098 = vmatprep.mubr.f32.mxu0 %v1477_v55 }
 0x158   : > { %2099 = vmatmul.mubr.f32.gmra.mrb[16].mxu0 %v1476_v63  ;;  %v1265_v53 = vpop.permute.xlu0 %1264  ;;  %v1008_v62 = vpop.permute.xlu1 %1007  ;;  %v1482_v19 = vld [vmem:[#allocation3 + $0x180] sm:$0xff]  ;;  %v1481_v25 = vld [vmem:[#allocation3 + $0x178] sm:$0xff] }
 0x159   : > { %1349 = vst.msk [vmem:[#allocation3 + $0x1d0] sm:$0xff] %vm568_vm2, %v1265_v53  ;;  %1092 = vst.msk [vmem:[#allocation3 + $0x1c8] sm:$0xff] %vm568_vm2, %v1008_v62  ;;  %2103 = vmatprep.mubr.f32.mxu0 %v1482_v19  ;;  %v2636_v63 = vld [vmem:[#allocation2 + $0x1] sm:$0xff] }
 0x15a   : > { %2700 = vrot.lane.b32.xlu1 %v2636_v63, %s5609_s14  ;;  %v3821_v63 = vld [vmem:[%s8143_s3 + $0x8] sm:$0xff] }
 0x15c   : > { %2104 = vmatmul.mubr.f32.gmra.mrb[18].mxu0 %v1481_v25  ;;  %v1267_v7 = vpop.permute.xlu0 %1266  ;;  %v1010_v56 = vpop.permute.xlu1 %1009  ;;  %v1487_v10 = vld [vmem:[#allocation3 + $0x1a8] sm:$0xff]  ;;  %v1486_v9 = vld [vmem:[#allocation3 + $0x1a0] sm:$0xff] }
 0x15d   : > { %1350 = vst.msk [vmem:[#allocation3 + $0x1f8] sm:$0xff] %vm568_vm2, %v1267_v7  ;;  %1093 = vst.msk [vmem:[#allocation3 + $0x1f0] sm:$0xff] %vm568_vm2, %v1010_v56  ;;  %2108 = vmatprep.mubr.f32.mxu0 %v1487_v10  ;;  %v2637_v10 = vld [vmem:[#allocation2 + $0x9] sm:$0xff] }
 0x15e   : > { %2702 = vrot.lane.b32.xlu1 %v2637_v10, %s5609_s14 }
 0x160   : > { %2109 = vmatmul.mubr.f32.gmra.mrb[20].mxu0 %v1486_v9  ;;  %v1269_v8 = vpop.permute.xlu0 %1268  ;;  %v1012_v38 = vpop.permute.xlu1 %1011  ;;  %v1492_v49 = vld [vmem:[#allocation3 + $0x1d0] sm:$0xff]  ;;  %v1491_v40 = vld [vmem:[#allocation3 + $0x1c8] sm:$0xff] }
 0x161   : > { %1351 = vst.msk [vmem:[#allocation3 + $0x220] sm:$0xff] %vm568_vm2, %v1269_v8  ;;  %1094 = vst.msk [vmem:[#allocation3 + $0x218] sm:$0xff] %vm568_vm2, %v1012_v38  ;;  %2113 = vmatprep.mubr.f32.mxu0 %v1492_v49 }
 0x164   : > { %2114 = vmatmul.mubr.f32.gmra.mrb[22].mxu0 %v1491_v40  ;;  %v1271_v18 = vpop.permute.xlu0 %1270  ;;  %v1014_v47 = vpop.permute.xlu1 %1013  ;;  %v1497_v0 = vld [vmem:[#allocation3 + $0x1f8] sm:$0xff]  ;;  %v1496_v27 = vld [vmem:[#allocation3 + $0x1f0] sm:$0xff] }
 0x165   : > { %1352 = vst.msk [vmem:[#allocation3 + $0x248] sm:$0xff] %vm568_vm2, %v1271_v18  ;;  %1095 = vst.msk [vmem:[#allocation3 + $0x240] sm:$0xff] %vm568_vm2, %v1014_v47  ;;  %2118 = vmatprep.mubr.f32.mxu0 %v1497_v0 }
 0x168   : > { %2119 = vmatmul.mubr.f32.gmra.mrb[24].mxu0 %v1496_v27  ;;  %v1273_v20 = vpop.permute.xlu0 %1272  ;;  %v1016_v3 = vpop.permute.xlu1 %1015  ;;  %v1502_v57 = vld [vmem:[#allocation3 + $0x220] sm:$0xff]  ;;  %v1501_v52 = vld [vmem:[#allocation3 + $0x218] sm:$0xff] }
 0x169   : > { %1353 = vst.msk [vmem:[#allocation3 + $0x270] sm:$0xff] %vm568_vm2, %v1273_v20  ;;  %1096 = vst.msk [vmem:[#allocation3 + $0x268] sm:$0xff] %vm568_vm2, %v1016_v3  ;;  %2123 = vmatprep.mubr.f32.mxu0 %v1502_v57  ;;  %v3884_v3 = vld [vmem:[%s8143_s3 + $0x200] sm:$0xff]  ;;  %v3885_v57 = vld [vmem:[%s8143_s3 + $0x208] sm:$0xff] }
 0x16c   : > { %2124 = vmatmul.mubr.f32.gmra.mrb[26].mxu0 %v1501_v52  ;;  %v1275_v26 = vpop.permute.xlu0 %1274  ;;  %v1018_v45 = vpop.permute.xlu1 %1017  ;;  %v1507_v5 = vld [vmem:[#allocation3 + $0x248] sm:$0xff]  ;;  %v1506_v29 = vld [vmem:[#allocation3 + $0x240] sm:$0xff]  ;;  %v6792_v52 = vpack.c.bf16 %v3885_v57, %v3884_v3  ;;  %v3828_v57 = vld [vmem:[%s8143_s3 + $0x40] sm:$0xff] }
 0x16d   : > { %1354 = vst.msk [vmem:[#allocation3 + $0x298] sm:$0xff] %vm568_vm2, %v1275_v26  ;;  %1097 = vst.msk [vmem:[#allocation3 + $0x290] sm:$0xff] %vm568_vm2, %v1018_v45  ;;  %2128 = vmatprep.mubr.f32.mxu0 %v1507_v5 }
 0x16e   : > { %5275 = vmatprep.subr.bf16.mxu0 %v6792_v52 }
 0x16f   : > { %5277 = vmatpush3.bf16.msra.mxu0 %v6792_v52 }
 0x170   : > { %2129 = vmatmul.mubr.f32.gmra.mrb[28].mxu0 %v1506_v29  ;;  %v1277_v58 = vpop.permute.xlu0 %1276  ;;  %v1020_v6 = vpop.permute.xlu1 %1019  ;;  %v1512_v39 = vld [vmem:[#allocation3 + $0x270] sm:$0xff]  ;;  %v1511_v12 = vld [vmem:[#allocation3 + $0x268] sm:$0xff] }
 0x171   : > { %1355 = vst.msk [vmem:[#allocation3 + $0x2c0] sm:$0xff] %vm568_vm2, %v1277_v58  ;;  %1098 = vst.msk [vmem:[#allocation3 + $0x2b8] sm:$0xff] %vm568_vm2, %v1020_v6  ;;  %2133 = vmatprep.mubr.f32.mxu0 %v1512_v39  ;;  %v3886_v58 = vld [vmem:[%s8143_s3 + $0x210] sm:$0xff]  ;;  %v3887_v6 = vld [vmem:[%s8143_s3 + $0x218] sm:$0xff] }
 0x172   : > { %v6804_v39 = vpack.c.bf16 %v3887_v6, %v3886_v58 }
 0x174   : > { %2134 = vmatmul.mubr.f32.gmra.mrb[30].mxu0 %v1511_v12  ;;  %v1279_v21 = vpop.permute.xlu0 %1278  ;;  %v1022_v13 = vpop.permute.xlu1 %1021  ;;  %v1517_v14 = vld [vmem:[#allocation3 + $0x298] sm:$0xff]  ;;  %v1516_v54 = vld [vmem:[#allocation3 + $0x290] sm:$0xff]  ;;  %8159 = vst [vmem:[#allocation7_spill] sm:$0xff] %v6804_v39  ;;  %5279 = vmatprep.subr.bf16.mxu0 %v6804_v39 }
 0x175   : > { %1356 = vst.msk [vmem:[#allocation3 + $0x2e8] sm:$0xff] %vm568_vm2, %v1279_v21  ;;  %1099 = vst.msk [vmem:[#allocation3 + $0x2e0] sm:$0xff] %vm568_vm2, %v1022_v13  ;;  %2138 = vmatprep.mubr.f32.mxu0 %v1517_v14  ;;  %5281 = vmatpush3.bf16.msra.mxu0 %v6804_v39 }
 0x178   : > { %2139 = vmatmul.mubr.f32.gmra.mrb[32].mxu0 %v1516_v54  ;;  %v1281_v4 = vpop.permute.xlu0 %1280  ;;  %v1024_v34 = vpop.permute.xlu1 %1023  ;;  %v1522_v30 = vld [vmem:[#allocation3 + $0x2c0] sm:$0xff]  ;;  %v1521_v31 = vld [vmem:[#allocation3 + $0x2b8] sm:$0xff] }
 0x179   : > { %1357 = vst.msk [vmem:[#allocation3 + $0x310] sm:$0xff] %vm568_vm2, %v1281_v4  ;;  %1100 = vst.msk [vmem:[#allocation3 + $0x308] sm:$0xff] %vm568_vm2, %v1024_v34  ;;  %2143 = vmatprep.mubr.f32.mxu0 %v1522_v30  ;;  %v3888_v4 = vld [vmem:[%s8143_s3 + $0x220] sm:$0xff]  ;;  %v3889_v34 = vld [vmem:[%s8143_s3 + $0x228] sm:$0xff] }
 0x17c   : > { %2144 = vmatmul.mubr.f32.gmra.mrb[34].mxu0 %v1521_v31  ;;  %v1283_v11 = vpop.permute.xlu0 %1282  ;;  %v1026_v60 = vpop.permute.xlu1 %1025  ;;  %v1527_v28 = vld [vmem:[#allocation3 + $0x2e8] sm:$0xff]  ;;  %v1526_v32 = vld [vmem:[#allocation3 + $0x2e0] sm:$0xff]  ;;  %v6820_v31 = vpack.c.bf16 %v3889_v34, %v3888_v4 }
 0x17d   : > { %1358 = vst.msk [vmem:[#allocation3 + $0x338] sm:$0xff] %vm568_vm2, %v1283_v11  ;;  %1101 = vst.msk [vmem:[#allocation3 + $0x330] sm:$0xff] %vm568_vm2, %v1026_v60  ;;  %2148 = vmatprep.mubr.f32.mxu0 %v1527_v28  ;;  %v3834_v4 = vld [vmem:[%s8143_s3 + $0x70] sm:$0xff]  ;;  %v3835_v34 = vld [vmem:[%s8143_s3 + $0x78] sm:$0xff] }
 0x17e   : > { %8160 = vst [vmem:[#allocation8_spill] sm:$0xff] %v6820_v31  ;;  %5283 = vmatprep.subr.bf16.mxu0 %v6820_v31 }
 0x17f   : > { %5285 = vmatpush3.bf16.msra.mxu0 %v6820_v31 }
 0x180   : > { %2149 = vmatmul.mubr.f32.gmra.mrb[36].mxu0 %v1526_v32  ;;  %v1285_v48 = vpop.permute.xlu0 %1284  ;;  %v1028_v22 = vpop.permute.xlu1 %1027  ;;  %v1532_v50 = vld [vmem:[#allocation3 + $0x310] sm:$0xff]  ;;  %v1531_v35 = vld [vmem:[#allocation3 + $0x308] sm:$0xff] }
 0x181   : > { %1359 = vst.msk [vmem:[#allocation3 + $0x360] sm:$0xff] %vm568_vm2, %v1285_v48  ;;  %1102 = vst.msk [vmem:[#allocation3 + $0x358] sm:$0xff] %vm568_vm2, %v1028_v22  ;;  %2153 = vmatprep.mubr.f32.mxu0 %v1532_v50  ;;  %v3890_v48 = vld [vmem:[%s8143_s3 + $0x230] sm:$0xff]  ;;  %v3891_v22 = vld [vmem:[%s8143_s3 + $0x238] sm:$0xff] }
 0x184   : > { %2154 = vmatmul.mubr.f32.gmra.mrb[38].mxu0 %v1531_v35  ;;  %v1287_v59 = vpop.permute.xlu0 %1286  ;;  %v1030_v16 = vpop.permute.xlu1 %1029  ;;  %v1537_v36 = vld [vmem:[#allocation3 + $0x338] sm:$0xff]  ;;  %v1536_v2 = vld [vmem:[#allocation3 + $0x330] sm:$0xff]  ;;  %v6834_v35 = vpack.c.bf16 %v3891_v22, %v3890_v48 }
 0x185   : > { %1360 = vst.msk [vmem:[#allocation3 + $0x388] sm:$0xff] %vm568_vm2, %v1287_v59  ;;  %1103 = vst.msk [vmem:[#allocation3 + $0x380] sm:$0xff] %vm568_vm2, %v1030_v16  ;;  %2158 = vmatprep.mubr.f32.mxu0 %v1537_v36  ;;  %v3837_v48 = vld [vmem:[%s8143_s3 + $0x88] sm:$0xff] }
 0x186   : > { %8161 = vst [vmem:[#allocation9_spill] sm:$0xff] %v6834_v35  ;;  %5287 = vmatprep.subr.bf16.mxu0 %v6834_v35 }
 0x187   : > { %5289 = vmatpush3.bf16.msra.mxu0 %v6834_v35 }
 0x188   : > { %2159 = vmatmul.mubr.f32.gmra.mrb[40].mxu0 %v1536_v2  ;;  %v1289_v17 = vpop.permute.xlu0 %1288  ;;  %v1032_v23 = vpop.permute.xlu1 %1031  ;;  %v1542_v15 = vld [vmem:[#allocation3 + $0x360] sm:$0xff]  ;;  %v1541_v61 = vld [vmem:[#allocation3 + $0x358] sm:$0xff] }
 0x189   : > { %1361 = vst.msk [vmem:[#allocation3 + $0x3b0] sm:$0xff] %vm568_vm2, %v1289_v17  ;;  %1104 = vst.msk [vmem:[#allocation3 + $0x3a8] sm:$0xff] %vm568_vm2, %v1032_v23  ;;  %2163 = vmatprep.mubr.f32.mxu0 %v1542_v15 }
 0x18a   : > { %v6764_v37 = vpop.f32.mrb[0].mxu1 }
 0x18b   : > { %v6766_v43 = vpop.f32.mrb[1].mxu1 }
 0x18c   : > { %2164 = vmatmul.mubr.f32.gmra.mrb[42].mxu0 %v1541_v61  ;;  %v1291_v41 = vpop.permute.xlu0 %1290  ;;  %v1034_v42 = vpop.permute.xlu1 %1033  ;;  %v1547_v33 = vld [vmem:[#allocation3 + $0x388] sm:$0xff]  ;;  %v1546_v46 = vld [vmem:[#allocation3 + $0x380] sm:$0xff] }
 0x18d   : > { %1362 = vst.msk [vmem:[#allocation3 + $0x3d8] sm:$0xff] %vm568_vm2, %v1291_v41  ;;  %1105 = vst.msk [vmem:[#allocation3 + $0x3d0] sm:$0xff] %vm568_vm2, %v1034_v42  ;;  %2168 = vmatprep.mubr.f32.mxu0 %v1547_v33 }
 0x18e   : > { %v6773_v7 = vpop.f32.mrb[2].mxu1 }
 0x18f   : > { %v6775_v56 = vpop.f32.mrb[3].mxu1 }
 0x190   : > { %2169 = vmatmul.mubr.f32.gmra.mrb[44].mxu0 %v1546_v46  ;;  %v1293_v44 = vpop.permute.xlu0 %1292  ;;  %v1036_v51 = vpop.permute.xlu1 %1035  ;;  %v1552_v24 = vld [vmem:[#allocation3 + $0x3b0] sm:$0xff]  ;;  %v1551_v55 = vld [vmem:[#allocation3 + $0x3a8] sm:$0xff] }
 0x191   : > { %1363 = vst.msk [vmem:[#allocation3 + $0x400] sm:$0xff] %vm568_vm2, %v1293_v44  ;;  %1106 = vst.msk [vmem:[#allocation3 + $0x3f8] sm:$0xff] %vm568_vm2, %v1036_v51  ;;  %2173 = vmatprep.mubr.f32.mxu0 %v1552_v24 }
 0x194   : > { %2174 = vmatmul.mubr.f32.gmra.mrb[46].mxu0 %v1551_v55  ;;  %v1295_v53 = vpop.permute.xlu0 %1294  ;;  %v1038_v62 = vpop.permute.xlu1 %1037  ;;  %v1557_v19 = vld [vmem:[#allocation3 + $0x3d8] sm:$0xff]  ;;  %v1556_v25 = vld [vmem:[#allocation3 + $0x3d0] sm:$0xff] }
 0x195   : > { %1364 = vst.msk [vmem:[#allocation3 + $0x428] sm:$0xff] %vm568_vm2, %v1295_v53  ;;  %1107 = vst.msk [vmem:[#allocation3 + $0x420] sm:$0xff] %vm568_vm2, %v1038_v62  ;;  %2178 = vmatprep.mubr.f32.mxu0 %v1557_v19  ;;  %v3820_v55 = vld [vmem:[%s8143_s3] sm:$0xff]  ;;  %v3822_v62 = vld [vmem:[%s8143_s3 + $0x10] sm:$0xff] }
 0x196   : > { %v5179_v53 = vpack.c.bf16 %v3821_v63, %v3820_v55  ;;  %v3823_v19 = vld [vmem:[%s8143_s3 + $0x18] sm:$0xff]  ;;  %v3840_v63 = vld [vmem:[%s8143_s3 + $0xa0] sm:$0xff] }
 0x197   : > { %v5182_v10 = vpack.c.bf16 %v3823_v19, %v3822_v62  ;;  %v3842_v19 = vld [vmem:[%s8143_s3 + $0xb0] sm:$0xff] }
 0x198   : > { %2179 = vmatmul.mubr.f32.gmra.mrb[48].mxu0 %v1556_v25  ;;  %v1297_v9 = vpop.permute.xlu0 %1296  ;;  %v1040_v8 = vpop.permute.xlu1 %1039  ;;  %v1562_v38 = vld [vmem:[#allocation3 + $0x400] sm:$0xff]  ;;  %v1561_v49 = vld [vmem:[#allocation3 + $0x3f8] sm:$0xff]  ;;  %5180 = vmatpush1.bf16.msra.mxu1 %v5179_v53 }
 0x199   : > { %1365 = vst.msk [vmem:[#allocation3 + $0x450] sm:$0xff] %vm568_vm2, %v1297_v9  ;;  %1108 = vst.msk [vmem:[#allocation3 + $0x448] sm:$0xff] %vm568_vm2, %v1040_v8  ;;  %2183 = vmatprep.mubr.f32.mxu0 %v1562_v38  ;;  %5181 = vmatprep.subr.bf16.mxu1 %v8146_v1  ;;  %v3824_v8 = vld [vmem:[%s8143_s3 + $0x20] sm:$0xff]  ;;  %v3825_v38 = vld [vmem:[%s8143_s3 + $0x28] sm:$0xff] }
 0x19a   : > { %v6780_v40 = vpop.f32.mrb[4].mxu1  ;;  %v3841_v53 = vld [vmem:[%s8143_s3 + $0xa8] sm:$0xff] }
 0x19b   : > { %v6784_v20 = vpop.f32.mrb[5].mxu1  ;;  %v5209_v62 = vpack.c.bf16 %v3841_v53, %v3840_v63  ;;  %v2445_v53 = vld [vmem:[%s5765_s17 + $0x8] sm:$0xff] }
 0x19c   : > { %2184 = vmatmul.mubr.f32.gmra.mrb[50].mxu0 %v1561_v49  ;;  %v1299_v18 = vpop.permute.xlu0 %1298  ;;  %v1042_v47 = vpop.permute.xlu1 %1041  ;;  %v1567_v0 = vld [vmem:[#allocation3 + $0x428] sm:$0xff]  ;;  %v1566_v27 = vld [vmem:[#allocation3 + $0x420] sm:$0xff]  ;;  %5183 = vmatpush1.bf16.msra.mxu1 %v5182_v10  ;;  %v5185_v49 = vpack.c.bf16 %v3825_v38, %v3824_v8 }
 0x19d   : > { %1366 = vst.msk [vmem:[#allocation3 + $0x478] sm:$0xff] %vm568_vm2, %v1299_v18  ;;  %1109 = vst.msk [vmem:[#allocation3 + $0x470] sm:$0xff] %vm568_vm2, %v1042_v47  ;;  %2188 = vmatprep.mubr.f32.mxu0 %v1567_v0  ;;  %5184 = vmatprep.subr.bf16.mxu1 %v8146_v1  ;;  %v3826_v18 = vld [vmem:[%s8143_s3 + $0x30] sm:$0xff]  ;;  %v3827_v47 = vld [vmem:[%s8143_s3 + $0x38] sm:$0xff] }
 0x19e   : > { %v3843_v10 = vld [vmem:[%s8143_s3 + $0xb8] sm:$0xff] }
 0x19f   : > { %v5212_v38 = vpack.c.bf16 %v3843_v10, %v3842_v19  ;;  %v2829_v19 = vld [vmem:[#allocation2 + $0xa] sm:$0xff] }
 0x1a0   : > { %2189 = vmatmul.mubr.f32.gmra.mrb[52].mxu0 %v1566_v27  ;;  %v1301_v26 = vpop.permute.xlu0 %1300  ;;  %v1044_v45 = vpop.permute.xlu1 %1043  ;;  %v1572_v5 = vld [vmem:[#allocation3 + $0x450] sm:$0xff]  ;;  %v1571_v29 = vld [vmem:[#allocation3 + $0x448] sm:$0xff]  ;;  %5186 = vmatpush1.bf16.msra.mxu1 %v5185_v49  ;;  %v5188_v27 = vpack.c.bf16 %v3827_v47, %v3826_v18  ;;  %v3845_v47 = vld [vmem:[%s8143_s3 + $0xc8] sm:$0xff]  ;;  %2861 = vst.msk [vmem:[#allocation3 + $0x30] sm:$0xff] %vm223_vm0, %v2829_v19 }
 0x1a1   : > { %1367 = vst.msk [vmem:[#allocation3 + $0x4a0] sm:$0xff] %vm568_vm2, %v1301_v26  ;;  %1110 = vst.msk [vmem:[#allocation3 + $0x498] sm:$0xff] %vm568_vm2, %v1044_v45  ;;  %2193 = vmatprep.mubr.f32.mxu0 %v1572_v5  ;;  %5187 = vmatprep.subr.bf16.mxu1 %v8146_v1  ;;  %v3829_v26 = vld [vmem:[%s8143_s3 + $0x48] sm:$0xff]  ;;  %v3830_v5 = vld [vmem:[%s8143_s3 + $0x50] sm:$0xff] }
 0x1a2   : > { %v5191_v45 = vpack.c.bf16 %v3829_v26, %v3828_v57  ;;  %v3844_v18 = vld [vmem:[%s8143_s3 + $0xc0] sm:$0xff] }
 0x1a3   : > { %v6977_v57 = vld [vmem:[%s8142_s2] ss:$0 sm:$0xff] }
 0x1a4   : > { %2194 = vmatmul.mubr.f32.gmra.mrb[54].mxu0 %v1571_v29  ;;  %v1303_v12 = vpop.permute.xlu0 %1302  ;;  %v1046_v21 = vpop.permute.xlu1 %1045  ;;  %v1577_v13 = vld [vmem:[#allocation3 + $0x478] sm:$0xff]  ;;  %v1576_v14 = vld [vmem:[#allocation3 + $0x470] sm:$0xff]  ;;  %5189 = vmatpush1.bf16.msra.mxu1 %v5188_v27  ;;  %v3831_v29 = vld [vmem:[%s8143_s3 + $0x58] sm:$0xff]  ;;  %v5215_v27 = vpack.c.bf16 %v3845_v47, %v3844_v18 }
 0x1a5   : > { %1368 = vst.msk [vmem:[#allocation3 + $0x4c8] sm:$0xff] %vm568_vm2, %v1303_v12  ;;  %1111 = vst.msk [vmem:[#allocation3 + $0x4c0] sm:$0xff] %vm568_vm2, %v1046_v21  ;;  %2198 = vmatprep.mubr.f32.mxu0 %v1577_v13  ;;  %5190 = vmatprep.subr.bf16.mxu1 %v8146_v1  ;;  %v5194_v6 = vpack.c.bf16 %v3831_v29, %v3830_v5  ;;  %v3832_v21 = vld [vmem:[%s8143_s3 + $0x60] sm:$0xff]  ;;  %v3833_v13 = vld [vmem:[%s8143_s3 + $0x68] sm:$0xff] }
 0x1a6   : > { %v6809_v54 = vpop.f32.mrb[6].mxu1  ;;  %v3846_v5 = vld [vmem:[%s8143_s3 + $0xd0] sm:$0xff]  ;;  %v3847_v29 = vld [vmem:[%s8143_s3 + $0xd8] sm:$0xff] }
 0x1a7   : > { %v6818_v30 = vpop.f32.mrb[7].mxu1  ;;  %v3850_v47 = vld [vmem:[%s8143_s3 + $0xf0] sm:$0xff] }
 0x1a8   : > { %2199 = vmatmul.mubr.f32.gmra.mrb[56].mxu0 %v1576_v14  ;;  %v1305_v11 = vpop.permute.xlu0 %1304  ;;  %v1048_v60 = vpop.permute.xlu1 %1047  ;;  %v1582_v28 = vld [vmem:[#allocation3 + $0x4a0] sm:$0xff]  ;;  %v1581_v32 = vld [vmem:[#allocation3 + $0x498] sm:$0xff]  ;;  %5192 = vmatpush1.bf16.msra.mxu1 %v5191_v45  ;;  %v5197_v14 = vpack.c.bf16 %v3833_v13, %v3832_v21  ;;  %v2572_v13 = vld [vmem:[#allocation2] sm:$0xff] }
 0x1a9   : > { %1369 = vst.msk [vmem:[#allocation3 + $0x4f0] sm:$0xff] %vm568_vm2, %v1305_v11  ;;  %1112 = vst.msk [vmem:[#allocation3 + $0x4e8] sm:$0xff] %vm568_vm2, %v1048_v60  ;;  %2203 = vmatprep.mubr.f32.mxu0 %v1582_v28  ;;  %5193 = vmatprep.subr.bf16.mxu1 %v8146_v1  ;;  %v5200_v60 = vpack.c.bf16 %v3835_v34, %v3834_v4  ;;  %v2444_v4 = vld [vmem:[%s5765_s17] sm:$0xff] }
 0x1aa   : > { %v6832_v50 = vpop.f32.mrb[8].mxu1  ;;  %2604 = vst.msk [vmem:[#allocation3] sm:$0xff] %vm223_vm0, %v2572_v13 }
 0x1ab   : > { %v6836_v16 = vpop.f32.mrb[9].mxu1 }
 0x1ac   : > { %2204 = vmatmul.mubr.f32.gmra.mrb[58].mxu0 %v1581_v32  ;;  %v1587_v59 = vld [vmem:[#allocation3 + $0x4c8] sm:$0xff]  ;;  %v1586_v36 = vld [vmem:[#allocation3 + $0x4c0] sm:$0xff]  ;;  %5195 = vmatpush1.bf16.msra.mxu1 %v5194_v6  ;;  %v3836_v32 = vld [vmem:[%s8143_s3 + $0x80] sm:$0xff] }
 0x1ad   : > { %2208 = vmatprep.mubr.f32.mxu0 %v1587_v59  ;;  %5196 = vmatprep.subr.bf16.mxu1 %v8146_v1  ;;  %v5203_v22 = vpack.c.bf16 %v3837_v48, %v3836_v32  ;;  %v3838_v59 = vld [vmem:[%s8143_s3 + $0x90] sm:$0xff]  ;;  %v3848_v48 = vld [vmem:[%s8143_s3 + $0xe0] sm:$0xff] }
 0x1b0   : > { %2209 = vmatmul.mubr.f32.gmra.mrb[60].mxu0 %v1586_v36  ;;  %v1592_v2 = vld [vmem:[#allocation3 + $0x4f0] sm:$0xff]  ;;  %v1591_v17 = vld [vmem:[#allocation3 + $0x4e8] sm:$0xff]  ;;  %5198 = vmatpush1.bf16.msra.mxu1 %v5197_v14  ;;  %v5218_v14 = vpack.c.bf16 %v3847_v29, %v3846_v5  ;;  %v2446_v29 = vld [vmem:[%s5765_s17 + $0x10] sm:$0xff] }
 0x1b1   : > { %2213 = vmatprep.mubr.f32.mxu0 %v1592_v2  ;;  %5199 = vmatprep.subr.bf16.mxu1 %v8146_v1  ;;  %v3839_v36 = vld [vmem:[%s8143_s3 + $0x98] sm:$0xff] }
 0x1b4   : > { %2214 = vmatmul.mubr.f32.gmra.mrb[62].mxu0 %v1591_v17  ;;  %5201 = vmatpush1.bf16.msra.mxu1 %v5200_v60  ;;  %v5206_v17 = vpack.c.bf16 %v3839_v36, %v3838_v59  ;;  %v2828_v60 = vld [vmem:[#allocation2 + $0x2] sm:$0xff] }
 0x1b5   : > { %5202 = vmatprep.subr.bf16.mxu1 %v8146_v1  ;;  %2860 = vst.msk [vmem:[#allocation3 + $0x8] sm:$0xff] %vm223_vm0, %v2828_v60  ;;  %v2447_v60 = vld [vmem:[%s5765_s17 + $0x18] sm:$0xff] }
 0x1b6   : > { %v6840_v23 = vpop.f32.mrb[10].mxu1 }
 0x1b7   : > { %v6842_v15 = vpop.f32.mrb[11].mxu1 }
 0x1b8   : > { %5204 = vmatpush1.bf16.msra.mxu1 %v5203_v22  ;;  %v3849_v22 = vld [vmem:[%s8143_s3 + $0xe8] sm:$0xff] }
 0x1b9   : > { %5205 = vmatprep.subr.bf16.mxu1 %v8146_v1  ;;  %v5221_v63 = vpack.c.bf16 %v3849_v22, %v3848_v48 }
 0x1ba   : > { %v6844_v61 = vpop.f32.mrb[12].mxu1 }
 0x1bb   : > { %v6846_v41 = vpop.f32.mrb[13].mxu1 }
 0x1bc   : > { %5207 = vmatpush1.bf16.msra.mxu1 %v5206_v17  ;;  %v2573_v17 = vld [vmem:[#allocation2 + $0x8] sm:$0xff] }
 0x1bd   : > { %5208 = vmatprep.subr.bf16.mxu1 %v8146_v1  ;;  %2605 = vst.msk [vmem:[#allocation3 + $0x28] sm:$0xff] %vm223_vm0, %v2573_v17 }
 0x1c0   : > { %5210 = vmatpush1.bf16.msra.mxu1 %v5209_v62 }
 0x1c1   : > { %5211 = vmatprep.subr.bf16.mxu1 %v8146_v1 }
 0x1c4   : > { %5213 = vmatpush1.bf16.msra.mxu1 %v5212_v38 }
 0x1c5   : > { %5214 = vmatprep.subr.bf16.mxu1 %v8146_v1 }
 0x1c6   : > { %v6848_v42 = vpop.f32.mrb[14].mxu1 }
 0x1c7   : > { %v6850_v33 = vpop.f32.mrb[15].mxu1 }
 0x1c8   : > { %5216 = vmatpush1.bf16.msra.mxu1 %v5215_v27  ;;  %v3851_v27 = vld [vmem:[%s8143_s3 + $0xf8] sm:$0xff] }
 0x1c9   : > { %5217 = vmatprep.subr.bf16.mxu1 %v8146_v1  ;;  %v5224_v5 = vpack.c.bf16 %v3851_v27, %v3850_v47 }
 0x1ca   : > { %v6852_v46 = vpop.f32.mrb[16].mxu1 }
 0x1cb   : > { %v6854_v44 = vpop.f32.mrb[17].mxu1 }
 0x1cc   : > { %v2701_v45 = vpop.permute.xlu1 %2700  ;;  %5219 = vmatpush1.bf16.msra.mxu1 %v5218_v14 }
 0x1cd   : > { %2796 = vst.msk [vmem:[#allocation3] sm:$0xff] %vm568_vm2, %v2701_v45  ;;  %5220 = vmatprep.subr.bf16.mxu1 %v8146_v1 }
 0x1d0   : > { %v2703_v62 = vpop.permute.xlu1 %2702  ;;  %5222 = vmatpush1.bf16.msra.mxu1 %v5221_v63 }
 0x1d1   : > { %2797 = vst.msk [vmem:[#allocation3 + $0x28] sm:$0xff] %vm568_vm2, %v2703_v62  ;;  %5223 = vmatprep.subr.bf16.mxu1 %v8146_v1  ;;  %v2448_v62 = vld [vmem:[%s5765_s17 + $0x20] sm:$0xff] }
 0x1d4   : > { %v6856_v51 = vpop.f32.mrb[18].mxu1  ;;  %5225 = vmatpush1.bf16.msra.mxu1 %v5224_v5 }
 0x1d5   : > { %v6858_v24 = vpop.f32.mrb[19].mxu1  ;;  %5226 = vmatprep.subr.bf16.mxu1 %v8146_v1 }
 0x1d8   : > { %v6873_v25 = vpop.f32.mrb[20].mxu1 }
 0x1d9   : > { %v6875_v9 = vpop.f32.mrb[21].mxu1 }
 0x1e2   : > { %v6891_v0 = vpop.f32.mrb[22].mxu1 }
 0x1e3   : > { %v6893_v3 = vpop.f32.mrb[23].mxu1 }
 0x1e7   : > { %v6909_v58 = vpop.f32.mrb[24].mxu1 }
 0x1e8   : > { %v6911_v12 = vpop.f32.mrb[25].mxu1 }
 0x1ef   : > { %v6927_v11 = vpop.f32.mrb[26].mxu1 }
 0x1f0   : > { %v6929_v28 = vpop.f32.mrb[27].mxu1 }
 0x1f3   : > { %v6945_v2 = vpop.f32.mrb[28].mxu1 }
 0x1f4   : > { %v6947_v55 = vpop.f32.mrb[29].mxu1 }
 0x1ff   : > { %v6963_v8 = vpop.f32.mrb[30].mxu1 }
 0x200   : > { %v6965_v49 = vpop.f32.mrb[31].mxu1 }
 0x20b   : > { %v2060_v26 = vpop.f32.mrb[0].mxu0 }
 0x20c   : > { %v5298_v6 = vadd.f32 %v6977_v57, %v2060_v26  ;;  %v2062_v21 = vpop.f32.mrb[1].mxu0 }
 0x20e   : > { %v2286_v34 = vadd.f32 %v5298_v6, %v6766_v43 }
 0x20f   : > { %v2065_v32 = vpop.f32.mrb[2].mxu0 }
 0x210   : > { %v2476_v59 = vadd.f32 %v2444_v4, %v2286_v34  ;;  %v5299_v43 = vadd.f32 %v6977_v57, %v2065_v32  ;;  %v2067_v36 = vpop.f32.mrb[3].mxu0 }
 0x212   : > { %v2508_v10 = vmax.f32 %v2476_v59, 0.0  ;;  %v2291_v38 = vadd.f32 %v5299_v43, %v6764_v37 }
 0x213   : > { %v2070_v18 = vpop.f32.mrb[4].mxu0 }
 0x214   : > { %2540 = vst.msk [vmem:[#allocation2 + $0x19] sm:$0xff] %vm223_vm0, %v2508_v10  ;;  %v2477_v37 = vadd.f32 %v2445_v53, %v2291_v38  ;;  %v5300_v26 = vadd.f32 %v6977_v57, %v2070_v18  ;;  %v2072_v45 = vpop.f32.mrb[5].mxu0 }
 0x216   : > { %v2509_v6 = vmax.f32 %v2477_v37, 0.0  ;;  %v2296_v21 = vadd.f32 %v5300_v26, %v6775_v56 }
 0x217   : > { %v2075_v13 = vpop.f32.mrb[6].mxu0 }
 0x218   : > { %2541 = vst.msk [vmem:[#allocation2 + $0x21] sm:$0xff] %vm223_vm0, %v2509_v6  ;;  %v2478_v14 = vadd.f32 %v2446_v29, %v2296_v21  ;;  %v5301_v4 = vadd.f32 %v6977_v57, %v2075_v13  ;;  %v2077_v34 = vpop.f32.mrb[7].mxu0 }
 0x21a   : > { %v2510_v32 = vmax.f32 %v2478_v14, 0.0  ;;  %v2301_v48 = vadd.f32 %v5301_v4, %v6773_v7 }
 0x21b   : > { %v2080_v22 = vpop.f32.mrb[8].mxu0  ;;  %v2892_v59 = vld [vmem:[#allocation2 + $0x18] sm:$0xff] }
 0x21c   : > { %v2638_v43 = vld [vmem:[#allocation2 + $0x19] sm:$0xff]  ;;  %2542 = vst.msk [vmem:[#allocation2 + $0x31] sm:$0xff] %vm223_vm0, %v2510_v32  ;;  %v2479_v56 = vadd.f32 %v2447_v60, %v2301_v48  ;;  %v5302_v17 = vadd.f32 %v6977_v57, %v2080_v22  ;;  %v2082_v63 = vpop.f32.mrb[9].mxu0  ;;  %2956 = vrot.lane.b32.xlu0 %v2892_v59, %s5609_s14  ;;  %v2450_v59 = vld [vmem:[%s5765_s17 + $0x30] sm:$0xff] }
 0x21d   : > { %v2574_v36 = vld [vmem:[#allocation2 + $0x18] sm:$0xff]  ;;  %2704 = vrot.lane.b32.xlu1 %v2638_v43, %s5609_s14 }
 0x21e   : > { %2606 = vst.msk [vmem:[#allocation3 + $0x50] sm:$0xff] %vm223_vm0, %v2574_v36  ;;  %v3084_v53 = vld [vmem:[#allocation2 + $0x19] sm:$0xff]  ;;  %v2511_v7 = vmax.f32 %v2479_v56, 0.0  ;;  %v2306_v19 = vadd.f32 %v5302_v17, %v6784_v20  ;;  %v2449_v20 = vld [vmem:[%s5765_s17 + $0x28] sm:$0xff] }
 0x21f   : > { %3116 = vst.msk [vmem:[#allocation3 + $0x10] sm:$0xff] %vm223_vm0, %v3084_v53  ;;  %v2085_v10 = vpop.f32.mrb[10].mxu0  ;;  %v2893_v38 = vld [vmem:[#allocation2 + $0x20] sm:$0xff] }
 0x220   : > { %v2639_v18 = vld [vmem:[#allocation2 + $0x21] sm:$0xff]  ;;  %2543 = vst.msk [vmem:[#allocation2 + $0x39] sm:$0xff] %vm223_vm0, %v2511_v7  ;;  %v2480_v27 = vadd.f32 %v2448_v62, %v2306_v19  ;;  %v5303_v37 = vadd.f32 %v6977_v57, %v2085_v10  ;;  %v2087_v26 = vpop.f32.mrb[11].mxu0  ;;  %2958 = vrot.lane.b32.xlu0 %v2893_v38, %s5609_s14 }
 0x221   : > { %v2575_v47 = vld [vmem:[#allocation2 + $0x20] sm:$0xff]  ;;  %2706 = vrot.lane.b32.xlu1 %v2639_v18, %s5609_s14 }
 0x222   : > { %2607 = vst.msk [vmem:[#allocation3 + $0x78] sm:$0xff] %vm223_vm0, %v2575_v47  ;;  %v7034_v45 = vld [vmem:[#allocation2 + $0x1a] sm:$0xff]  ;;  %v7036_v5 = vld [vmem:[#allocation2 + $0x22] sm:$0xff]  ;;  %v2512_v6 = vmax.f32 %v2480_v27, 0.0  ;;  %v2311_v21 = vadd.f32 %v5303_v37, %v6780_v40 }
 0x223   : > { %2862 = vst.msk [vmem:[#allocation3 + $0x58] sm:$0xff] %vm223_vm0, %v7034_v45  ;;  %2863 = vst.msk [vmem:[#allocation3 + $0x80] sm:$0xff] %vm223_vm0, %v7036_v5  ;;  %v3085_v29 = vld [vmem:[#allocation2 + $0x21] sm:$0xff]  ;;  %v2090_v13 = vpop.f32.mrb[12].mxu0  ;;  %v2894_v14 = vld [vmem:[#allocation2 + $0x30] sm:$0xff] }
 0x224   : > { %3117 = vst.msk [vmem:[#allocation3 + $0x38] sm:$0xff] %vm223_vm0, %v3085_v29  ;;  %v2640_v4 = vld [vmem:[#allocation2 + $0x31] sm:$0xff]  ;;  %2544 = vst.msk [vmem:[#allocation2 + $0x49] sm:$0xff] %vm223_vm0, %v2512_v6  ;;  %v2481_v60 = vadd.f32 %v2449_v20, %v2311_v21  ;;  %v5304_v32 = vadd.f32 %v6977_v57, %v2090_v13  ;;  %v2092_v48 = vpop.f32.mrb[13].mxu0  ;;  %2960 = vrot.lane.b32.xlu0 %v2894_v14, %s5609_s14 }
 0x225   : > { %v2576_v34 = vld [vmem:[#allocation2 + $0x30] sm:$0xff]  ;;  %2708 = vrot.lane.b32.xlu1 %v2640_v4, %s5609_s14 }
 0x226   : > { %2608 = vst.msk [vmem:[#allocation3 + $0xa0] sm:$0xff] %vm223_vm0, %v2576_v34  ;;  %v3340_v22 = vld [vmem:[#allocation2 + $0x30] sm:$0xff]  ;;  %v2513_v43 = vmax.f32 %v2481_v60, 0.0  ;;  %v2316_v36 = vadd.f32 %v5304_v32, %v6818_v30  ;;  %v2451_v30 = vld [vmem:[%s5765_s17 + $0x38] sm:$0xff]  ;;  %v2452_v32 = vld [vmem:[%s5765_s17 + $0x40] sm:$0xff] }
 0x227   : > { %v3086_v40 = vld [vmem:[#allocation2 + $0x31] sm:$0xff]  ;;  %3372 = vst.msk [vmem:[#allocation3 + $0x18] sm:$0xff] %vm223_vm0, %v3340_v22  ;;  %v2095_v56 = vpop.f32.mrb[14].mxu0  ;;  %v2641_v63 = vld [vmem:[#allocation2 + $0x39] sm:$0xff] }
 0x228   : > { %3118 = vst.msk [vmem:[#allocation3 + $0x60] sm:$0xff] %vm223_vm0, %v3086_v40  ;;  %v2895_v17 = vld [vmem:[#allocation2 + $0x38] sm:$0xff]  ;;  %2545 = vst.msk [vmem:[#allocation2 + $0x51] sm:$0xff] %vm223_vm0, %v2513_v43  ;;  %v2482_v62 = vadd.f32 %v2450_v59, %v2316_v36  ;;  %v5305_v7 = vadd.f32 %v6977_v57, %v2095_v56  ;;  %v2097_v19 = vpop.f32.mrb[15].mxu0 }
 0x229   : > { %v3596_v53 = vld [vmem:[#allocation2 + $0x32] sm:$0xff]  ;;  %2962 = vrot.lane.b32.xlu0 %v2895_v17, %s5609_s14  ;;  %2710 = vrot.lane.b32.xlu1 %v2641_v63, %s5609_s14  ;;  %v3597_v10 = vld [vmem:[#allocation2 + $0x3a] sm:$0xff]  ;;  %v2453_v19 = vld [vmem:[%s5765_s17 + $0x48] sm:$0xff] }
 0x22a   : > { %3628 = vst.msk [vmem:[#allocation3 + $0x20] sm:$0xff] %vm223_vm0, %v3596_v53  ;;  %v2577_v38 = vld [vmem:[#allocation2 + $0x38] sm:$0xff]  ;;  %3629 = vst.msk [vmem:[#allocation3 + $0x48] sm:$0xff] %vm223_vm0, %v3597_v10  ;;  %v2514_v27 = vmax.f32 %v2482_v62, 0.0  ;;  %v2321_v37 = vadd.f32 %v5305_v7, %v6809_v54 }
 0x22b   : > { %v7059_v18 = vld [vmem:[#allocation2 + $0x32] sm:$0xff]  ;;  %2609 = vst.msk [vmem:[#allocation3 + $0xc8] sm:$0xff] %vm223_vm0, %v2577_v38  ;;  %v7066_v47 = vld [vmem:[#allocation2 + $0x3a] sm:$0xff]  ;;  %v2100_v29 = vpop.f32.mrb[16].mxu0  ;;  %v2896_v6 = vld [vmem:[#allocation2 + $0x48] sm:$0xff] }
 0x22c   : > { %2864 = vst.msk [vmem:[#allocation3 + $0xa8] sm:$0xff] %vm223_vm0, %v7059_v18  ;;  %2865 = vst.msk [vmem:[#allocation3 + $0xd0] sm:$0xff] %vm223_vm0, %v7066_v47  ;;  %v3341_v26 = vld [vmem:[#allocation2 + $0x38] sm:$0xff]  ;;  %v2642_v21 = vld [vmem:[#allocation2 + $0x49] sm:$0xff]  ;;  %v2483_v14 = vadd.f32 %v2451_v30, %v2321_v37  ;;  %v5306_v4 = vadd.f32 %v6977_v57, %v2100_v29  ;;  %v2102_v54 = vpop.f32.mrb[17].mxu0 }
 0x22d   : > { %v3087_v20 = vld [vmem:[#allocation2 + $0x39] sm:$0xff]  ;;  %v2578_v13 = vld [vmem:[#allocation2 + $0x48] sm:$0xff]  ;;  %3373 = vst.msk [vmem:[#allocation3 + $0x40] sm:$0xff] %vm223_vm0, %v3341_v26  ;;  %2546 = vst.msk [vmem:[#allocation2 + $0x61] sm:$0xff] %vm223_vm0, %v2514_v27  ;;  %2964 = vrot.lane.b32.xlu0 %v2896_v6, %s5609_s14  ;;  %2712 = vrot.lane.b32.xlu1 %v2642_v21, %s5609_s14 }
 0x22e   : > { %3119 = vst.msk [vmem:[#allocation3 + $0x88] sm:$0xff] %vm223_vm0, %v3087_v20  ;;  %2610 = vst.msk [vmem:[#allocation3 + $0xf0] sm:$0xff] %vm223_vm0, %v2578_v13  ;;  %v3342_v34 = vld [vmem:[#allocation2 + $0x48] sm:$0xff]  ;;  %v2515_v48 = vmax.f32 %v2483_v14, 0.0  ;;  %v2326_v22 = vadd.f32 %v5306_v4, %v6836_v16  ;;  %v2454_v4 = vld [vmem:[%s5765_s17 + $0x50] sm:$0xff] }
 0x22f   : > { %v3088_v60 = vld [vmem:[#allocation2 + $0x49] sm:$0xff]  ;;  %3374 = vst.msk [vmem:[#allocation3 + $0x68] sm:$0xff] %vm223_vm0, %v3342_v34  ;;  %v2105_v40 = vpop.f32.mrb[18].mxu0  ;;  %v2643_v36 = vld [vmem:[#allocation2 + $0x51] sm:$0xff] }
 0x230   : > { %3120 = vst.msk [vmem:[#allocation3 + $0xb0] sm:$0xff] %vm223_vm0, %v3088_v60  ;;  %v2897_v43 = vld [vmem:[#allocation2 + $0x50] sm:$0xff]  ;;  %2547 = vst.msk [vmem:[#allocation2 + $0x69] sm:$0xff] %vm223_vm0, %v2515_v48  ;;  %v2484_v56 = vadd.f32 %v2452_v32, %v2326_v22  ;;  %v5307_v17 = vadd.f32 %v6977_v57, %v2105_v40  ;;  %v2107_v63 = vpop.f32.mrb[19].mxu0 }
 0x231   : > { %v3664_v59 = vld [vmem:[#allocation3 + $0x20] sm:$0xff]  ;;  %2966 = vrot.lane.b32.xlu0 %v2897_v43, %s5609_s14  ;;  %v3669_v53 = vld [vmem:[#allocation3 + $0x48] sm:$0xff]  ;;  %2714 = vrot.lane.b32.xlu1 %v2643_v36, %s5609_s14 }
 0x232   : > { %5018 = vmatprep.mubr.msk.f32.mxu0 %vm223_vm0, %v3664_v59  ;;  %v3598_v62 = vld [vmem:[#allocation2 + $0x4a] sm:$0xff]  ;;  %v3599_v7 = vld [vmem:[#allocation2 + $0x52] sm:$0xff]  ;;  %v2516_v38 = vmax.f32 %v2484_v56, 0.0  ;;  %v2331_v30 = vadd.f32 %v5307_v17, %v6832_v50 }
 0x233   : > { %5019 = vmatmul.mubr.msk.f32.vlgmr.msra.gmra.mrb[64].mxu0 %vm223_vm0, %v3669_v53  ;;  %3630 = vst.msk [vmem:[#allocation3 + $0x70] sm:$0xff] %vm223_vm0, %v3598_v62  ;;  %3631 = vst.msk [vmem:[#allocation3 + $0x98] sm:$0xff] %vm223_vm0, %v3599_v7  ;;  %v2579_v16 = vld [vmem:[#allocation2 + $0x50] sm:$0xff]  ;;  %v2110_v37 = vpop.f32.mrb[20].mxu0  ;;  %v2455_v53 = vld [vmem:[%s5765_s17 + $0x58] sm:$0xff] }
 0x234   : > { %v7091_v10 = vld [vmem:[#allocation2 + $0x4a] sm:$0xff]  ;;  %2611 = vst.msk [vmem:[#allocation3 + $0x118] sm:$0xff] %vm223_vm0, %v2579_v16  ;;  %v7097_v27 = vld [vmem:[#allocation2 + $0x52] sm:$0xff]  ;;  %v2898_v26 = vld [vmem:[#allocation2 + $0x60] sm:$0xff]  ;;  %v2485_v6 = vadd.f32 %v2453_v19, %v2331_v30  ;;  %v5308_v50 = vadd.f32 %v6977_v57, %v2110_v37  ;;  %v2112_v21 = vpop.f32.mrb[21].mxu0 }
 0x235   : > { %2866 = vst.msk [vmem:[#allocation3 + $0xf8] sm:$0xff] %vm223_vm0, %v7091_v10  ;;  %v2644_v20 = vld [vmem:[#allocation2 + $0x61] sm:$0xff]  ;;  %2867 = vst.msk [vmem:[#allocation3 + $0x120] sm:$0xff] %vm223_vm0, %v7097_v27  ;;  %2968 = vrot.lane.b32.xlu0 %v2898_v26, %s5609_s14  ;;  %v3343_v13 = vld [vmem:[#allocation2 + $0x50] sm:$0xff] }
 0x236   : > { %v2580_v29 = vld [vmem:[#allocation2 + $0x60] sm:$0xff]  ;;  %2548 = vst.msk [vmem:[#allocation2 + $0x79] sm:$0xff] %vm223_vm0, %v2516_v38  ;;  %v3089_v14 = vld [vmem:[#allocation2 + $0x51] sm:$0xff]  ;;  %2716 = vrot.lane.b32.xlu1 %v2644_v20, %s5609_s14  ;;  %3375 = vst.msk [vmem:[#allocation3 + $0x90] sm:$0xff] %vm223_vm0, %v3343_v13  ;;  %v2517_v60 = vmax.f32 %v2485_v6, 0.0  ;;  %v2336_v32 = vadd.f32 %v5308_v50, %v6842_v15 }
 0x237   : > { %2612 = vst.msk [vmem:[#allocation3 + $0x140] sm:$0xff] %vm223_vm0, %v2580_v29  ;;  %3121 = vst.msk [vmem:[#allocation3 + $0xd8] sm:$0xff] %vm223_vm0, %v3089_v14  ;;  %v3344_v54 = vld [vmem:[#allocation2 + $0x60] sm:$0xff]  ;;  %v2115_v48 = vpop.f32.mrb[22].mxu0  ;;  %v2899_v22 = vld [vmem:[#allocation2 + $0x68] sm:$0xff] }
 0x238   : > { %v3090_v34 = vld [vmem:[#allocation2 + $0x61] sm:$0xff]  ;;  %3376 = vst.msk [vmem:[#allocation3 + $0xb8] sm:$0xff] %vm223_vm0, %v3344_v54  ;;  %v2645_v40 = vld [vmem:[#allocation2 + $0x69] sm:$0xff]  ;;  %2549 = vst.msk [vmem:[#allocation2 + $0x81] sm:$0xff] %vm223_vm0, %v2517_v60  ;;  %v2486_v43 = vadd.f32 %v2454_v4, %v2336_v32  ;;  %v5309_v36 = vadd.f32 %v6977_v57, %v2115_v48  ;;  %v2117_v56 = vpop.f32.mrb[23].mxu0 }
 0x239   : > { %3122 = vst.msk [vmem:[#allocation3 + $0x100] sm:$0xff] %vm223_vm0, %v3090_v34  ;;  %v3600_v59 = vld [vmem:[#allocation2 + $0x62] sm:$0xff]  ;;  %2970 = vrot.lane.b32.xlu0 %v2899_v22, %s5609_s14  ;;  %v3601_v15 = vld [vmem:[#allocation2 + $0x6a] sm:$0xff] }
 0x23a   : > { %v3674_v17 = vld [vmem:[#allocation3 + $0x70] sm:$0xff]  ;;  %v3679_v63 = vld [vmem:[#allocation3 + $0x98] sm:$0xff]  ;;  %3632 = vst.msk [vmem:[#allocation3 + $0xc0] sm:$0xff] %vm223_vm0, %v3600_v59  ;;  %2718 = vrot.lane.b32.xlu1 %v2645_v40, %s5609_s14  ;;  %3633 = vst.msk [vmem:[#allocation3 + $0xe8] sm:$0xff] %vm223_vm0, %v3601_v15  ;;  %v2518_v19 = vmax.f32 %v2486_v43, 0.0  ;;  %v2341_v16 = vadd.f32 %v5309_v36, %v6840_v23 }
 0x23b   : > { %5021 = vmatprep.mubr.msk.f32.mxu0 %vm223_vm0, %v3674_v17  ;;  %v2581_v62 = vld [vmem:[#allocation2 + $0x68] sm:$0xff]  ;;  %v2120_v30 = vpop.f32.mrb[24].mxu0  ;;  %v2456_v13 = vld [vmem:[%s5765_s17 + $0x60] sm:$0xff] }
 0x23c   : > { %v7120_v7 = vld [vmem:[#allocation2 + $0x62] sm:$0xff]  ;;  %5022 = vmatmul.mubr.msk.f32.gmra.mrb[66].mxu0 %vm223_vm0, %v3679_v63  ;;  %2613 = vst.msk [vmem:[#allocation3 + $0x168] sm:$0xff] %vm223_vm0, %v2581_v62  ;;  %v7127_v38 = vld [vmem:[#allocation2 + $0x6a] sm:$0xff]  ;;  %2550 = vst.msk [vmem:[#allocation2 + $0x91] sm:$0xff] %vm223_vm0, %v2518_v19  ;;  %v2487_v23 = vadd.f32 %v2455_v53, %v2341_v16  ;;  %v5310_v29 = vadd.f32 %v6977_v57, %v2120_v30  ;;  %v2122_v6 = vpop.f32.mrb[25].mxu0 }
 0x23d   : > { %2868 = vst.msk [vmem:[#allocation3 + $0x148] sm:$0xff] %vm223_vm0, %v7120_v7  ;;  %v2900_v37 = vld [vmem:[#allocation2 + $0x78] sm:$0xff]  ;;  %2869 = vst.msk [vmem:[#allocation3 + $0x170] sm:$0xff] %vm223_vm0, %v7127_v38  ;;  %v3345_v50 = vld [vmem:[#allocation2 + $0x68] sm:$0xff] }
 0x23e   : > { %v2646_v26 = vld [vmem:[#allocation2 + $0x79] sm:$0xff]  ;;  %2972 = vrot.lane.b32.xlu0 %v2900_v37, %s5609_s14  ;;  %v3091_v21 = vld [vmem:[#allocation2 + $0x69] sm:$0xff]  ;;  %3377 = vst.msk [vmem:[#allocation3 + $0xe0] sm:$0xff] %vm223_vm0, %v3345_v50  ;;  %v2519_v54 = vmax.f32 %v2487_v23, 0.0  ;;  %v2346_v34 = vadd.f32 %v5310_v29, %v6846_v41 }
 0x23f   : > { %v2582_v20 = vld [vmem:[#allocation2 + $0x78] sm:$0xff]  ;;  %2720 = vrot.lane.b32.xlu1 %v2646_v26, %s5609_s14  ;;  %3123 = vst.msk [vmem:[#allocation3 + $0x128] sm:$0xff] %vm223_vm0, %v3091_v21  ;;  %v2125_v60 = vpop.f32.mrb[26].mxu0  ;;  %v2457_v32 = vld [vmem:[%s5765_s17 + $0x68] sm:$0xff]  ;;  %v2901_v22 = vld [vmem:[#allocation2 + $0x80] sm:$0xff] }
 0x240   : > { %2614 = vst.msk [vmem:[#allocation3 + $0x190] sm:$0xff] %vm223_vm0, %v2582_v20  ;;  %v3346_v14 = vld [vmem:[#allocation2 + $0x78] sm:$0xff]  ;;  %v2647_v40 = vld [vmem:[#allocation2 + $0x81] sm:$0xff]  ;;  %2551 = vst.msk [vmem:[#allocation2 + $0x99] sm:$0xff] %vm223_vm0, %v2519_v54  ;;  %v2488_v59 = vadd.f32 %v2456_v13, %v2346_v34  ;;  %v5311_v43 = vadd.f32 %v6977_v57, %v2125_v60  ;;  %v2127_v36 = vpop.f32.mrb[27].mxu0 }
 0x241   : > { %v3092_v4 = vld [vmem:[#allocation2 + $0x79] sm:$0xff]  ;;  %3378 = vst.msk [vmem:[#allocation3 + $0x108] sm:$0xff] %vm223_vm0, %v3346_v14  ;;  %v3684_v48 = vld [vmem:[#allocation3 + $0xc0] sm:$0xff]  ;;  %v3603_v17 = vld [vmem:[#allocation2 + $0x82] sm:$0xff] }
 0x242   : > { %3124 = vst.msk [vmem:[#allocation3 + $0x150] sm:$0xff] %vm223_vm0, %v3092_v4  ;;  %5024 = vmatprep.mubr.msk.f32.mxu0 %vm223_vm0, %v3684_v48  ;;  %2974 = vrot.lane.b32.xlu0 %v2901_v22, %s5609_s14  ;;  %v3689_v41 = vld [vmem:[#allocation3 + $0xe8] sm:$0xff]  ;;  %3635 = vst.msk [vmem:[#allocation3 + $0x138] sm:$0xff] %vm223_vm0, %v3603_v17  ;;  %v2583_v63 = vld [vmem:[#allocation2 + $0x80] sm:$0xff]  ;;  %v2520_v62 = vmax.f32 %v2488_v59, 0.0  ;;  %v2351_v19 = vadd.f32 %v5311_v43, %v6844_v61 }
 0x243   : > { %v3602_v56 = vld [vmem:[#allocation2 + $0x7a] sm:$0xff]  ;;  %2722 = vrot.lane.b32.xlu1 %v2647_v40, %s5609_s14  ;;  %5025 = vmatmul.mubr.msk.f32.gmra.mrb[68].mxu0 %vm223_vm0, %v3689_v41  ;;  %2615 = vst.msk [vmem:[#allocation3 + $0x1b8] sm:$0xff] %vm223_vm0, %v2583_v63  ;;  %v7159_v16 = vld [vmem:[#allocation2 + $0x82] sm:$0xff]  ;;  %v2130_v30 = vpop.f32.mrb[28].mxu0  ;;  %v2902_v37 = vld [vmem:[#allocation2 + $0x90] sm:$0xff] }
 0x244   : > { %3634 = vst.msk [vmem:[#allocation3 + $0x110] sm:$0xff] %vm223_vm0, %v3602_v56  ;;  %v7151_v15 = vld [vmem:[#allocation2 + $0x7a] sm:$0xff]  ;;  %v2648_v26 = vld [vmem:[#allocation2 + $0x91] sm:$0xff]  ;;  %2871 = vst.msk [vmem:[#allocation3 + $0x1c0] sm:$0xff] %vm223_vm0, %v7159_v16  ;;  %v2489_v61 = vadd.f32 %v2457_v32, %v2351_v19  ;;  %v5312_v23 = vadd.f32 %v6977_v57, %v2130_v30  ;;  %v2132_v29 = vpop.f32.mrb[29].mxu0 }
 0x245   : > { %v7153_v53 = vld [vmem:[#allocation2 + $0x81] sm:$0xff]  ;;  %2870 = vst.msk [vmem:[#allocation3 + $0x198] sm:$0xff] %vm223_vm0, %v7151_v15  ;;  %v2584_v20 = vld [vmem:[#allocation2 + $0x90] sm:$0xff]  ;;  %2552 = vst.msk [vmem:[#allocation2 + $0xa9] sm:$0xff] %vm223_vm0, %v2520_v62 }
 0x246   : > { %3125 = vst.msk [vmem:[#allocation3 + $0x178] sm:$0xff] %vm223_vm0, %v7153_v53  ;;  %2976 = vrot.lane.b32.xlu0 %v2902_v37, %s5609_s14  ;;  %2616 = vst.msk [vmem:[#allocation3 + $0x1e0] sm:$0xff] %vm223_vm0, %v2584_v20  ;;  %v7169_v6 = vld [vmem:[#allocation2 + $0x91] sm:$0xff]  ;;  %v3347_v50 = vld [vmem:[#allocation2 + $0x80] sm:$0xff]  ;;  %v2521_v14 = vmax.f32 %v2489_v61, 0.0  ;;  %v2356_v4 = vadd.f32 %v5312_v23, %v6850_v33 }
 0x247   : > { %v3348_v21 = vld [vmem:[#allocation2 + $0x90] sm:$0xff]  ;;  %2724 = vrot.lane.b32.xlu1 %v2648_v26, %s5609_s14  ;;  %3379 = vst.msk [vmem:[#allocation3 + $0x130] sm:$0xff] %vm223_vm0, %v3347_v50  ;;  %3126 = vst.msk [vmem:[#allocation3 + $0x1a0] sm:$0xff] %vm223_vm0, %v7169_v6  ;;  %v2135_v54 = vpop.f32.mrb[30].mxu0  ;;  %v2459_v34 = vld [vmem:[%s5765_s17 + $0x78] sm:$0xff] }
 0x248   : > { %v2458_v13 = vld [vmem:[%s5765_s17 + $0x70] sm:$0xff]  ;;  %3380 = vst.msk [vmem:[#allocation3 + $0x158] sm:$0xff] %vm223_vm0, %v3348_v21  ;;  %v2903_v60 = vld [vmem:[#allocation2 + $0x98] sm:$0xff]  ;;  %2553 = vst.msk [vmem:[#allocation2 + $0xb1] sm:$0xff] %vm223_vm0, %v2521_v14  ;;  %v5313_v40 = vadd.f32 %v6977_v57, %v2135_v54  ;;  %v2137_v59 = vpop.f32.mrb[31].mxu0 }
 0x249   : > { %v2649_v32 = vld [vmem:[#allocation2 + $0x99] sm:$0xff]  ;;  %v2490_v22 = vadd.f32 %v2458_v13, %v2356_v4  ;;  %v3699_v36 = vld [vmem:[#allocation3 + $0x138] sm:$0xff] }
 0x24a   : > { %v3604_v48 = vld [vmem:[#allocation2 + $0x92] sm:$0xff]  ;;  %2978 = vrot.lane.b32.xlu0 %v2903_v60, %s5609_s14  ;;  %v3605_v41 = vld [vmem:[#allocation2 + $0x9a] sm:$0xff]  ;;  %v2361_v62 = vadd.f32 %v5313_v40, %v6848_v42 }
 0x24b   : > { %v3694_v43 = vld [vmem:[#allocation3 + $0x110] sm:$0xff]  ;;  %3636 = vst.msk [vmem:[#allocation3 + $0x160] sm:$0xff] %vm223_vm0, %v3604_v48  ;;  %2726 = vrot.lane.b32.xlu1 %v2649_v32, %s5609_s14  ;;  %3637 = vst.msk [vmem:[#allocation3 + $0x188] sm:$0xff] %vm223_vm0, %v3605_v41  ;;  %v2585_v33 = vld [vmem:[#allocation2 + $0x98] sm:$0xff]  ;;  %v2522_v63 = vmax.f32 %v2490_v22, 0.0  ;;  %v2140_v30 = vpop.f32.mrb[32].mxu0 }
 0x24c   : > { %5027 = vmatprep.mubr.msk.f32.mxu0 %vm223_vm0, %v3694_v43  ;;  %v7186_v56 = vld [vmem:[#allocation2 + $0x92] sm:$0xff]  ;;  %2617 = vst.msk [vmem:[#allocation3 + $0x208] sm:$0xff] %vm223_vm0, %v2585_v33  ;;  %v7195_v19 = vld [vmem:[#allocation2 + $0x9a] sm:$0xff]  ;;  %v2904_v37 = vld [vmem:[#allocation2 + $0xa8] sm:$0xff]  ;;  %v2491_v42 = vadd.f32 %v2459_v34, %v2361_v62  ;;  %v5314_v61 = vadd.f32 %v6977_v57, %v2140_v30  ;;  %v2142_v23 = vpop.f32.mrb[33].mxu0 }
 0x24d   : > { %v7188_v17 = vld [vmem:[#allocation2 + $0x99] sm:$0xff]  ;;  %5028 = vmatmul.mubr.msk.f32.gmra.mrb[70].mxu0 %vm223_vm0, %v3699_v36  ;;  %2872 = vst.msk [vmem:[#allocation3 + $0x1e8] sm:$0xff] %vm223_vm0, %v7186_v56  ;;  %v2650_v26 = vld [vmem:[#allocation2 + $0xa9] sm:$0xff]  ;;  %2873 = vst.msk [vmem:[#allocation3 + $0x210] sm:$0xff] %vm223_vm0, %v7195_v19 }
 0x24e   : > { %3127 = vst.msk [vmem:[#allocation3 + $0x1c8] sm:$0xff] %vm223_vm0, %v7188_v17  ;;  %v2586_v20 = vld [vmem:[#allocation2 + $0xa8] sm:$0xff]  ;;  %2554 = vst.msk [vmem:[#allocation2 + $0xc1] sm:$0xff] %vm223_vm0, %v2522_v63  ;;  %2980 = vrot.lane.b32.xlu0 %v2904_v37, %s5609_s14  ;;  %v3349_v50 = vld [vmem:[#allocation2 + $0x98] sm:$0xff]  ;;  %v2523_v14 = vmax.f32 %v2491_v42, 0.0  ;;  %v2366_v4 = vadd.f32 %v5314_v61, %v6854_v44 }
 0x24f   : > { %2618 = vst.msk [vmem:[#allocation3 + $0x230] sm:$0xff] %vm223_vm0, %v2586_v20  ;;  %v7205_v29 = vld [vmem:[#allocation2 + $0xa9] sm:$0xff]  ;;  %v2460_v13 = vld [vmem:[%s5765_s17 + $0x80] sm:$0xff]  ;;  %2728 = vrot.lane.b32.xlu1 %v2650_v26, %s5609_s14  ;;  %3381 = vst.msk [vmem:[#allocation3 + $0x180] sm:$0xff] %vm223_vm0, %v3349_v50  ;;  %v2145_v54 = vpop.f32.mrb[34].mxu0 }
 0x250   : > { %v3350_v21 = vld [vmem:[#allocation2 + $0xa8] sm:$0xff]  ;;  %3128 = vst.msk [vmem:[#allocation3 + $0x1f0] sm:$0xff] %vm223_vm0, %v7205_v29  ;;  %v2905_v32 = vld [vmem:[#allocation2 + $0xb0] sm:$0xff]  ;;  %2555 = vst.msk [vmem:[#allocation2 + $0xc9] sm:$0xff] %vm223_vm0, %v2523_v14  ;;  %v2492_v22 = vadd.f32 %v2460_v13, %v2366_v4  ;;  %v5315_v40 = vadd.f32 %v6977_v57, %v2145_v54  ;;  %v2147_v59 = vpop.f32.mrb[35].mxu0 }
 0x251   : > { %3382 = vst.msk [vmem:[#allocation3 + $0x1a8] sm:$0xff] %vm223_vm0, %v3350_v21  ;;  %v2461_v34 = vld [vmem:[%s5765_s17 + $0x88] sm:$0xff]  ;;  %v2651_v48 = vld [vmem:[#allocation2 + $0xb1] sm:$0xff] }
 0x252   : > { %v3704_v60 = vld [vmem:[#allocation3 + $0x160] sm:$0xff]  ;;  %2982 = vrot.lane.b32.xlu0 %v2905_v32, %s5609_s14  ;;  %v3709_v43 = vld [vmem:[#allocation3 + $0x188] sm:$0xff]  ;;  %v2524_v62 = vmax.f32 %v2492_v22, 0.0  ;;  %v2371_v30 = vadd.f32 %v5315_v40, %v6852_v46 }
 0x253   : > { %5030 = vmatprep.mubr.msk.f32.mxu0 %vm223_vm0, %v3704_v60  ;;  %v3606_v36 = vld [vmem:[#allocation2 + $0xaa] sm:$0xff]  ;;  %v3607_v41 = vld [vmem:[#allocation2 + $0xb2] sm:$0xff]  ;;  %2730 = vrot.lane.b32.xlu1 %v2651_v48, %s5609_s14  ;;  %v2150_v26 = vpop.f32.mrb[36].mxu0 }
 0x254   : > { %5031 = vmatmul.mubr.msk.f32.gmra.mrb[72].mxu0 %vm223_vm0, %v3709_v43  ;;  %3638 = vst.msk [vmem:[#allocation3 + $0x1b0] sm:$0xff] %vm223_vm0, %v3606_v36  ;;  %3639 = vst.msk [vmem:[#allocation3 + $0x1d8] sm:$0xff] %vm223_vm0, %v3607_v41  ;;  %v2587_v44 = vld [vmem:[#allocation2 + $0xb0] sm:$0xff]  ;;  %v2493_v46 = vadd.f32 %v2461_v34, %v2371_v30  ;;  %v5316_v23 = vadd.f32 %v6977_v57, %v2150_v26  ;;  %v2152_v50 = vpop.f32.mrb[37].mxu0  ;;  %v2463_v34 = vld [vmem:[%s5765_s17 + $0x98] sm:$0xff] }
 0x255   : > { %v7223_v33 = vld [vmem:[#allocation2 + $0xaa] sm:$0xff]  ;;  %2619 = vst.msk [vmem:[#allocation3 + $0x258] sm:$0xff] %vm223_vm0, %v2587_v44  ;;  %v7231_v37 = vld [vmem:[#allocation2 + $0xb2] sm:$0xff]  ;;  %3383 = vst.msk [vmem:[#allocation3 + $0x1d0] sm:$0xff] %vm223_vm0, %v2587_v44 }
 0x256   : > { %v7225_v63 = vld [vmem:[#allocation2 + $0xb1] sm:$0xff]  ;;  %2874 = vst.msk [vmem:[#allocation3 + $0x238] sm:$0xff] %vm223_vm0, %v7223_v33  ;;  %v2906_v20 = vld [vmem:[#allocation2 + $0xc0] sm:$0xff]  ;;  %2875 = vst.msk [vmem:[#allocation3 + $0x260] sm:$0xff] %vm223_vm0, %v7231_v37  ;;  %v2525_v14 = vmax.f32 %v2493_v46, 0.0  ;;  %v2376_v4 = vadd.f32 %v5316_v23, %v6858_v24 }
 0x257   : > { %3129 = vst.msk [vmem:[#allocation3 + $0x218] sm:$0xff] %vm223_vm0, %v7225_v63  ;;  %v2652_v42 = vld [vmem:[#allocation2 + $0xc1] sm:$0xff]  ;;  %2556 = vst.msk [vmem:[#allocation2 + $0xd9] sm:$0xff] %vm223_vm0, %v2524_v62  ;;  %2984 = vrot.lane.b32.xlu0 %v2906_v20, %s5609_s14  ;;  %v2462_v13 = vld [vmem:[%s5765_s17 + $0x90] sm:$0xff]  ;;  %v2155_v54 = vpop.f32.mrb[38].mxu0 }
 0x258   : > { %v2588_v61 = vld [vmem:[#allocation2 + $0xc0] sm:$0xff]  ;;  %2732 = vrot.lane.b32.xlu1 %v2652_v42, %s5609_s14  ;;  %v2907_v60 = vld [vmem:[#allocation2 + $0xc8] sm:$0xff]  ;;  %2557 = vst.msk [vmem:[#allocation2 + $0xe1] sm:$0xff] %vm223_vm0, %v2525_v14  ;;  %v2494_v22 = vadd.f32 %v2462_v13, %v2376_v4  ;;  %v5317_v40 = vadd.f32 %v6977_v57, %v2155_v54  ;;  %v2157_v59 = vpop.f32.mrb[39].mxu0 }
 0x259   : > { %2620 = vst.msk [vmem:[#allocation3 + $0x280] sm:$0xff] %vm223_vm0, %v2588_v61  ;;  %v7242_v21 = vld [vmem:[#allocation2 + $0xc1] sm:$0xff]  ;;  %3384 = vst.msk [vmem:[#allocation3 + $0x1f8] sm:$0xff] %vm223_vm0, %v2588_v61  ;;  %v2653_v32 = vld [vmem:[#allocation2 + $0xc9] sm:$0xff] }
 0x25a   : > { %3130 = vst.msk [vmem:[#allocation3 + $0x240] sm:$0xff] %vm223_vm0, %v7242_v21  ;;  %v3608_v48 = vld [vmem:[#allocation2 + $0xc2] sm:$0xff]  ;;  %v3609_v41 = vld [vmem:[#allocation2 + $0xca] sm:$0xff]  ;;  %v2526_v30 = vmax.f32 %v2494_v22, 0.0  ;;  %v2381_v26 = vadd.f32 %v5317_v40, %v6856_v51 }
 0x25b   : > { %v3714_v43 = vld [vmem:[#allocation3 + $0x1b0] sm:$0xff]  ;;  %2986 = vrot.lane.b32.xlu0 %v2907_v60, %s5609_s14  ;;  %v3719_v36 = vld [vmem:[#allocation3 + $0x1d8] sm:$0xff]  ;;  %3640 = vst.msk [vmem:[#allocation3 + $0x200] sm:$0xff] %vm223_vm0, %v3608_v48  ;;  %3641 = vst.msk [vmem:[#allocation3 + $0x228] sm:$0xff] %vm223_vm0, %v3609_v41  ;;  %v2160_v42 = vpop.f32.mrb[40].mxu0 }
 0x25c   : > { %5033 = vmatprep.mubr.msk.f32.mxu0 %vm223_vm0, %v3714_v43  ;;  %2734 = vrot.lane.b32.xlu1 %v2653_v32, %s5609_s14  ;;  %v2589_v24 = vld [vmem:[#allocation2 + $0xc8] sm:$0xff]  ;;  %2558 = vst.msk [vmem:[#allocation2 + $0xf1] sm:$0xff] %vm223_vm0, %v2526_v30  ;;  %v2495_v51 = vadd.f32 %v2463_v34, %v2381_v26  ;;  %v5318_v50 = vadd.f32 %v6977_v57, %v2160_v42  ;;  %v2162_v13 = vpop.f32.mrb[41].mxu0  ;;  %v2464_v4 = vld [vmem:[%s5765_s17 + $0xa0] sm:$0xff] }
 0x25d   : > { %v7258_v44 = vld [vmem:[#allocation2 + $0xc2] sm:$0xff]  ;;  %5034 = vmatmul.mubr.msk.f32.gmra.mrb[74].mxu0 %vm223_vm0, %v3719_v36  ;;  %2621 = vst.msk [vmem:[#allocation3 + $0x2a8] sm:$0xff] %vm223_vm0, %v2589_v24  ;;  %v7267_v20 = vld [vmem:[#allocation2 + $0xca] sm:$0xff]  ;;  %3385 = vst.msk [vmem:[#allocation3 + $0x220] sm:$0xff] %vm223_vm0, %v2589_v24 }
 0x25e   : > { %v7260_v62 = vld [vmem:[#allocation2 + $0xc9] sm:$0xff]  ;;  %2876 = vst.msk [vmem:[#allocation3 + $0x288] sm:$0xff] %vm223_vm0, %v7258_v44  ;;  %v2908_v61 = vld [vmem:[#allocation2 + $0xd8] sm:$0xff]  ;;  %2877 = vst.msk [vmem:[#allocation3 + $0x2b0] sm:$0xff] %vm223_vm0, %v7267_v20  ;;  %v2527_v54 = vmax.f32 %v2495_v51, 0.0  ;;  %v2386_v34 = vadd.f32 %v5318_v50, %v6875_v9 }
 0x25f   : > { %3131 = vst.msk [vmem:[#allocation3 + $0x268] sm:$0xff] %vm223_vm0, %v7260_v62  ;;  %v2654_v46 = vld [vmem:[#allocation2 + $0xd9] sm:$0xff]  ;;  %2988 = vrot.lane.b32.xlu0 %v2908_v61, %s5609_s14  ;;  %v2165_v60 = vpop.f32.mrb[42].mxu0  ;;  %v2465_v32 = vld [vmem:[%s5765_s17 + $0xa8] sm:$0xff] }
 0x260   : > { %v2590_v23 = vld [vmem:[#allocation2 + $0xd8] sm:$0xff]  ;;  %2736 = vrot.lane.b32.xlu1 %v2654_v46, %s5609_s14  ;;  %v2909_v22 = vld [vmem:[#allocation2 + $0xe0] sm:$0xff]  ;;  %2559 = vst.msk [vmem:[#allocation2 + $0xf9] sm:$0xff] %vm223_vm0, %v2527_v54  ;;  %v2496_v59 = vadd.f32 %v2464_v4, %v2386_v34  ;;  %v5319_v43 = vadd.f32 %v6977_v57, %v2165_v60  ;;  %v2167_v36 = vpop.f32.mrb[43].mxu0 }
 0x261   : > { %2622 = vst.msk [vmem:[#allocation3 + $0x2d0] sm:$0xff] %vm223_vm0, %v2590_v23  ;;  %v7278_v14 = vld [vmem:[#allocation2 + $0xd9] sm:$0xff]  ;;  %3386 = vst.msk [vmem:[#allocation3 + $0x248] sm:$0xff] %vm223_vm0, %v2590_v23  ;;  %v2655_v40 = vld [vmem:[#allocation2 + $0xe1] sm:$0xff] }
 0x262   : > { %3132 = vst.msk [vmem:[#allocation3 + $0x290] sm:$0xff] %vm223_vm0, %v7278_v14  ;;  %v3724_v48 = vld [vmem:[#allocation3 + $0x200] sm:$0xff]  ;;  %v3729_v41 = vld [vmem:[#allocation3 + $0x228] sm:$0xff]  ;;  %v3611_v30 = vld [vmem:[#allocation2 + $0xe2] sm:$0xff]  ;;  %v2528_v61 = vmax.f32 %v2496_v59, 0.0  ;;  %v2391_v46 = vadd.f32 %v5319_v43, %v6873_v25 }
 0x263   : > { %5036 = vmatprep.mubr.msk.f32.mxu0 %vm223_vm0, %v3724_v48  ;;  %2990 = vrot.lane.b32.xlu0 %v2909_v22, %s5609_s14  ;;  %v3610_v24 = vld [vmem:[#allocation2 + $0xda] sm:$0xff]  ;;  %3643 = vst.msk [vmem:[#allocation3 + $0x278] sm:$0xff] %vm223_vm0, %v3611_v30  ;;  %v7303_v23 = vld [vmem:[#allocation2 + $0xe2] sm:$0xff]  ;;  %v2170_v51 = vpop.f32.mrb[44].mxu0  ;;  %v2910_v50 = vld [vmem:[#allocation2 + $0xf0] sm:$0xff] }
 0x264   : > { %2738 = vrot.lane.b32.xlu1 %v2655_v40, %s5609_s14  ;;  %5037 = vmatmul.mubr.msk.f32.gmra.mrb[76].mxu0 %vm223_vm0, %v3729_v41  ;;  %3642 = vst.msk [vmem:[#allocation3 + $0x250] sm:$0xff] %vm223_vm0, %v3610_v24  ;;  %v2591_v9 = vld [vmem:[#allocation2 + $0xe0] sm:$0xff]  ;;  %v2656_v13 = vld [vmem:[#allocation2 + $0xf1] sm:$0xff]  ;;  %2879 = vst.msk [vmem:[#allocation3 + $0x300] sm:$0xff] %vm223_vm0, %v7303_v23  ;;  %v2497_v25 = vadd.f32 %v2465_v32, %v2391_v46  ;;  %v5320_v54 = vadd.f32 %v6977_v57, %v2170_v51  ;;  %v2172_v34 = vpop.f32.mrb[45].mxu0 }
 0x265   : > { %v7295_v26 = vld [vmem:[#allocation2 + $0xda] sm:$0xff]  ;;  %2623 = vst.msk [vmem:[#allocation3 + $0x2f8] sm:$0xff] %vm223_vm0, %v2591_v9  ;;  %3387 = vst.msk [vmem:[#allocation3 + $0x270] sm:$0xff] %vm223_vm0, %v2591_v9  ;;  %v2592_v4 = vld [vmem:[#allocation2 + $0xf0] sm:$0xff] }
 0x266   : > { %v7297_v42 = vld [vmem:[#allocation2 + $0xe1] sm:$0xff]  ;;  %2878 = vst.msk [vmem:[#allocation3 + $0x2d8] sm:$0xff] %vm223_vm0, %v7295_v26  ;;  %2560 = vst.msk [vmem:[#allocation2 + $0x109] sm:$0xff] %vm223_vm0, %v2528_v61  ;;  %v7314_v60 = vld [vmem:[#allocation2 + $0xf1] sm:$0xff]  ;;  %v2529_v22 = vmax.f32 %v2497_v25, 0.0  ;;  %v2396_v32 = vadd.f32 %v5320_v54, %v6893_v3 }
 0x267   : > { %3133 = vst.msk [vmem:[#allocation3 + $0x2b8] sm:$0xff] %vm223_vm0, %v7297_v42  ;;  %2992 = vrot.lane.b32.xlu0 %v2910_v50, %s5609_s14  ;;  %2624 = vst.msk [vmem:[#allocation3 + $0x320] sm:$0xff] %vm223_vm0, %v2592_v4  ;;  %v2466_v48 = vld [vmem:[%s5765_s17 + $0xb0] sm:$0xff]  ;;  %v2175_v40 = vpop.f32.mrb[46].mxu0  ;;  %v2467_v59 = vld [vmem:[%s5765_s17 + $0xb8] sm:$0xff] }
 0x268   : > { %3388 = vst.msk [vmem:[#allocation3 + $0x298] sm:$0xff] %vm223_vm0, %v2592_v4  ;;  %2740 = vrot.lane.b32.xlu1 %v2656_v13, %s5609_s14  ;;  %3134 = vst.msk [vmem:[#allocation3 + $0x2e0] sm:$0xff] %vm223_vm0, %v7314_v60  ;;  %v2911_v43 = vld [vmem:[#allocation2 + $0xf8] sm:$0xff]  ;;  %v2498_v24 = vadd.f32 %v2466_v48, %v2396_v32  ;;  %v5321_v30 = vadd.f32 %v6977_v57, %v2175_v40  ;;  %v2177_v9 = vpop.f32.mrb[47].mxu0 }
 0x269   : > { %v2657_v36 = vld [vmem:[#allocation2 + $0xf9] sm:$0xff]  ;;  %2561 = vst.msk [vmem:[#allocation2 + $0x111] sm:$0xff] %vm223_vm0, %v2529_v22  ;;  %v2469_v9 = vld [vmem:[%s5765_s17 + $0xc8] sm:$0xff] }
 0x26a   : > { %v7323_v41 = vld [vmem:[#allocation2 + $0xf2] sm:$0xff]  ;;  %v3739_v46 = vld [vmem:[#allocation3 + $0x278] sm:$0xff]  ;;  %v3613_v3 = vld [vmem:[#allocation2 + $0xfa] sm:$0xff]  ;;  %v2530_v13 = vmax.f32 %v2498_v24, 0.0  ;;  %v2401_v4 = vadd.f32 %v5321_v30, %v6891_v0 }
 0x26b   : > { %v3734_v61 = vld [vmem:[#allocation3 + $0x250] sm:$0xff]  ;;  %2994 = vrot.lane.b32.xlu0 %v2911_v43, %s5609_s14  ;;  %3644 = vst.msk [vmem:[#allocation3 + $0x2a0] sm:$0xff] %vm223_vm0, %v7323_v41  ;;  %2880 = vst.msk [vmem:[#allocation3 + $0x328] sm:$0xff] %vm223_vm0, %v7323_v41  ;;  %v2593_v51 = vld [vmem:[#allocation2 + $0xf8] sm:$0xff]  ;;  %v2180_v25 = vpop.f32.mrb[48].mxu0 }
 0x26c   : > { %5039 = vmatprep.mubr.msk.f32.mxu0 %vm223_vm0, %v3734_v61  ;;  %2742 = vrot.lane.b32.xlu1 %v2657_v36, %s5609_s14  ;;  %3645 = vst.msk [vmem:[#allocation3 + $0x2c8] sm:$0xff] %vm223_vm0, %v3613_v3  ;;  %v7335_v57 = vld [vmem:[#allocation2 + $0xf9] sm:$0xff]  ;;  %2625 = vst.msk [vmem:[#allocation3 + $0x348] sm:$0xff] %vm223_vm0, %v2593_v51  ;;  %v2499_v0 = vadd.f32 %v2467_v59, %v2401_v4  ;;  %v2182_v40 = vpop.f32.mrb[49].mxu0 }
 0x26d   : > { %v7337_v50 = vld [vmem:[#allocation2 + $0xfa] sm:$0xff]  ;;  %5040 = vmatmul.mubr.msk.f32.gmra.mrb[78].mxu0 %vm223_vm0, %v3739_v46  ;;  %3389 = vst.msk [vmem:[#allocation3 + $0x2c0] sm:$0xff] %vm223_vm0, %v2593_v51  ;;  %3135 = vst.msk [vmem:[#allocation3 + $0x308] sm:$0xff] %vm223_vm0, %v7335_v57  ;;  %v2912_v54 = vld [vmem:[#allocation2 + $0x108] sm:$0xff] }
 0x26e   : > { %2881 = vst.msk [vmem:[#allocation3 + $0x350] sm:$0xff] %vm223_vm0, %v7337_v50  ;;  %v2658_v34 = vld [vmem:[#allocation2 + $0x109] sm:$0xff]  ;;  %2562 = vst.msk [vmem:[#allocation2 + $0x121] sm:$0xff] %vm223_vm0, %v2530_v13  ;;  %v7351_v22 = vld [vmem:[%s8142_s2] ss:$0 sm:$0xff]  ;;  %v2531_v59 = vmax.f32 %v2499_v0, 0.0 }
 0x26f   : > { %v2594_v48 = vld [vmem:[#allocation2 + $0x108] sm:$0xff]  ;;  %v5322_v32 = vadd.f32 %v7351_v22, %v2180_v25  ;;  %2996 = vrot.lane.b32.xlu0 %v2912_v54, %s5609_s14  ;;  %v2468_v36 = vld [vmem:[%s5765_s17 + $0xc0] sm:$0xff]  ;;  %v2185_v30 = vpop.f32.mrb[50].mxu0 }
 0x270   : > { %2626 = vst.msk [vmem:[#allocation3 + $0x370] sm:$0xff] %vm223_vm0, %v2594_v48  ;;  %v7356_v43 = vld [vmem:[#allocation2 + $0x109] sm:$0xff]  ;;  %3390 = vst.msk [vmem:[#allocation3 + $0x2e8] sm:$0xff] %vm223_vm0, %v2594_v48  ;;  %2744 = vrot.lane.b32.xlu1 %v2658_v34, %s5609_s14  ;;  %v2659_v3 = vld [vmem:[#allocation2 + $0x111] sm:$0xff]  ;;  %v5323_v13 = vadd.f32 %v7351_v22, %v2185_v30  ;;  %v2187_v4 = vpop.f32.mrb[51].mxu0 }
 0x271   : > { %3136 = vst.msk [vmem:[#allocation3 + $0x330] sm:$0xff] %vm223_vm0, %v7356_v43  ;;  %v2406_v24 = vadd.f32 %v5322_v32, %v6911_v12  ;;  %v2913_v46 = vld [vmem:[#allocation2 + $0x110] sm:$0xff]  ;;  %2563 = vst.msk [vmem:[#allocation2 + $0x129] sm:$0xff] %vm223_vm0, %v2531_v59 }
 0x272   : > { %v3744_v61 = vld [vmem:[#allocation3 + $0x2a0] sm:$0xff]  ;;  %v2411_v40 = vadd.f32 %v5323_v13, %v6909_v58 }
 0x273   : > { %v2500_v51 = vadd.f32 %v2468_v36, %v2406_v24  ;;  %5042 = vmatprep.mubr.msk.f32.mxu0 %vm223_vm0, %v3744_v61  ;;  %2998 = vrot.lane.b32.xlu0 %v2913_v46, %s5609_s14  ;;  %v3749_v25 = vld [vmem:[#allocation3 + $0x2c8] sm:$0xff]  ;;  %v7369_v54 = vld [vmem:[#allocation2 + $0x10a] sm:$0xff]  ;;  %v2190_v36 = vpop.f32.mrb[52].mxu0 }
 0x274   : > { %v3615_v34 = vld [vmem:[#allocation2 + $0x112] sm:$0xff]  ;;  %2746 = vrot.lane.b32.xlu1 %v2659_v3, %s5609_s14  ;;  %5043 = vmatmul.mubr.msk.f32.gmra.mrb[80].mxu0 %vm223_vm0, %v3749_v25  ;;  %3646 = vst.msk [vmem:[#allocation3 + $0x2f0] sm:$0xff] %vm223_vm0, %v7369_v54  ;;  %2882 = vst.msk [vmem:[#allocation3 + $0x378] sm:$0xff] %vm223_vm0, %v7369_v54  ;;  %v2501_v61 = vadd.f32 %v2469_v9, %v2411_v40  ;;  %v5324_v58 = vadd.f32 %v7351_v22, %v2190_v36  ;;  %v2192_v46 = vpop.f32.mrb[53].mxu0 }
 0x275   : > { %3647 = vst.msk [vmem:[#allocation3 + $0x318] sm:$0xff] %vm223_vm0, %v3615_v34  ;;  %v2595_v12 = vld [vmem:[#allocation2 + $0x110] sm:$0xff]  ;;  %v2532_v32 = vmax.f32 %v2500_v51, 0.0  ;;  %v2914_v59 = vld [vmem:[#allocation2 + $0x120] sm:$0xff] }
 0x276   : > { %v7378_v48 = vld [vmem:[#allocation2 + $0x111] sm:$0xff]  ;;  %2627 = vst.msk [vmem:[#allocation3 + $0x398] sm:$0xff] %vm223_vm0, %v2595_v12  ;;  %3391 = vst.msk [vmem:[#allocation3 + $0x310] sm:$0xff] %vm223_vm0, %v2595_v12  ;;  %v2660_v24 = vld [vmem:[#allocation2 + $0x121] sm:$0xff]  ;;  %v2533_v13 = vmax.f32 %v2501_v61, 0.0  ;;  %v2416_v9 = vadd.f32 %v5324_v58, %v6929_v28 }
 0x277   : > { %v7380_v0 = vld [vmem:[#allocation2 + $0x112] sm:$0xff]  ;;  %3137 = vst.msk [vmem:[#allocation3 + $0x358] sm:$0xff] %vm223_vm0, %v7378_v48  ;;  %v2596_v30 = vld [vmem:[#allocation2 + $0x120] sm:$0xff]  ;;  %2564 = vst.msk [vmem:[#allocation2 + $0x139] sm:$0xff] %vm223_vm0, %v2532_v32  ;;  %3000 = vrot.lane.b32.xlu0 %v2914_v59, %s5609_s14  ;;  %v2195_v4 = vpop.f32.mrb[54].mxu0 }
 0x278   : > { %2883 = vst.msk [vmem:[#allocation3 + $0x3a0] sm:$0xff] %vm223_vm0, %v7380_v0  ;;  %2628 = vst.msk [vmem:[#allocation3 + $0x3c0] sm:$0xff] %vm223_vm0, %v2596_v30  ;;  %v7393_v3 = vld [vmem:[#allocation2 + $0x121] sm:$0xff]  ;;  %v2470_v51 = vld [vmem:[%s5765_s17 + $0xd0] sm:$0xff]  ;;  %2748 = vrot.lane.b32.xlu1 %v2660_v24, %s5609_s14  ;;  %v5325_v40 = vadd.f32 %v7351_v22, %v2195_v4  ;;  %v2197_v36 = vpop.f32.mrb[55].mxu0 }
 0x279   : > { %3392 = vst.msk [vmem:[#allocation3 + $0x338] sm:$0xff] %vm223_vm0, %v2596_v30  ;;  %3138 = vst.msk [vmem:[#allocation3 + $0x380] sm:$0xff] %vm223_vm0, %v7393_v3  ;;  %v2915_v25 = vld [vmem:[#allocation2 + $0x128] sm:$0xff]  ;;  %v2502_v32 = vadd.f32 %v2470_v51, %v2416_v9  ;;  %v2471_v28 = vld [vmem:[%s5765_s17 + $0xd8] sm:$0xff] }
 0x27a   : > { %v2661_v34 = vld [vmem:[#allocation2 + $0x129] sm:$0xff]  ;;  %2565 = vst.msk [vmem:[#allocation2 + $0x141] sm:$0xff] %vm223_vm0, %v2533_v13  ;;  %v2421_v51 = vadd.f32 %v5325_v40, %v6927_v11 }
 0x27b   : > { %v2597_v12 = vld [vmem:[#allocation2 + $0x128] sm:$0xff]  ;;  %v3754_v59 = vld [vmem:[#allocation3 + $0x2f0] sm:$0xff]  ;;  %3002 = vrot.lane.b32.xlu0 %v2915_v25, %s5609_s14  ;;  %v2534_v46 = vmax.f32 %v2502_v32, 0.0  ;;  %v2200_v4 = vpop.f32.mrb[56].mxu0 }
 0x27c   : > { %v3759_v24 = vld [vmem:[#allocation3 + $0x318] sm:$0xff]  ;;  %2629 = vst.msk [vmem:[#allocation3 + $0x3e8] sm:$0xff] %vm223_vm0, %v2597_v12  ;;  %3393 = vst.msk [vmem:[#allocation3 + $0x360] sm:$0xff] %vm223_vm0, %v2597_v12  ;;  %5045 = vmatprep.mubr.msk.f32.mxu0 %vm223_vm0, %v3754_v59  ;;  %2750 = vrot.lane.b32.xlu1 %v2661_v34, %s5609_s14  ;;  %v2503_v11 = vadd.f32 %v2471_v28, %v2421_v51  ;;  %v5326_v32 = vadd.f32 %v7351_v22, %v2200_v4  ;;  %v2202_v40 = vpop.f32.mrb[57].mxu0  ;;  %v2472_v59 = vld [vmem:[%s5765_s17 + $0xe0] sm:$0xff] }
 0x27d   : > { %v7405_v30 = vld [vmem:[#allocation2 + $0x122] sm:$0xff]  ;;  %v7415_v58 = vld [vmem:[#allocation2 + $0x12a] sm:$0xff]  ;;  %5046 = vmatmul.mubr.msk.f32.gmra.mrb[82].mxu0 %vm223_vm0, %v3759_v24  ;;  %2566 = vst.msk [vmem:[#allocation2 + $0x151] sm:$0xff] %vm223_vm0, %v2534_v46 }
 0x27e   : > { %2884 = vst.msk [vmem:[#allocation3 + $0x3c8] sm:$0xff] %vm223_vm0, %v7405_v30  ;;  %v7413_v61 = vld [vmem:[#allocation2 + $0x129] sm:$0xff]  ;;  %2885 = vst.msk [vmem:[#allocation3 + $0x3f0] sm:$0xff] %vm223_vm0, %v7415_v58  ;;  %v2916_v25 = vld [vmem:[#allocation2 + $0x138] sm:$0xff]  ;;  %v2535_v24 = vmax.f32 %v2503_v11, 0.0  ;;  %v2426_v28 = vadd.f32 %v5326_v32, %v6947_v55 }
 0x27f   : > { %3139 = vst.msk [vmem:[#allocation3 + $0x3a8] sm:$0xff] %vm223_vm0, %v7413_v61  ;;  %v3616_v13 = vld [vmem:[#allocation2 + $0x122] sm:$0xff]  ;;  %v3617_v9 = vld [vmem:[#allocation2 + $0x12a] sm:$0xff]  ;;  %v2662_v34 = vld [vmem:[#allocation2 + $0x139] sm:$0xff]  ;;  %3004 = vrot.lane.b32.xlu0 %v2916_v25, %s5609_s14  ;;  %v2205_v46 = vpop.f32.mrb[58].mxu0 }
 0x280   : > { %v2598_v12 = vld [vmem:[#allocation2 + $0x138] sm:$0xff]  ;;  %3648 = vst.msk [vmem:[#allocation3 + $0x340] sm:$0xff] %vm223_vm0, %v3616_v13  ;;  %3649 = vst.msk [vmem:[#allocation3 + $0x368] sm:$0xff] %vm223_vm0, %v3617_v9  ;;  %2752 = vrot.lane.b32.xlu1 %v2662_v34, %s5609_s14  ;;  %v2504_v4 = vadd.f32 %v2472_v59, %v2426_v28  ;;  %v5327_v25 = vadd.f32 %v7351_v22, %v2205_v46  ;;  %v2473_v55 = vld [vmem:[%s5765_s17 + $0xe8] sm:$0xff] }
 0x281   : > { %2630 = vst.msk [vmem:[#allocation3 + $0x410] sm:$0xff] %vm223_vm0, %v2598_v12  ;;  %v7429_v36 = vld [vmem:[#allocation2 + $0x139] sm:$0xff]  ;;  %3394 = vst.msk [vmem:[#allocation3 + $0x388] sm:$0xff] %vm223_vm0, %v2598_v12  ;;  %v2663_v13 = vld [vmem:[#allocation2 + $0x141] sm:$0xff]  ;;  %v2207_v12 = vpop.f32.mrb[59].mxu0 }
 0x282   : > { %3140 = vst.msk [vmem:[#allocation3 + $0x3d0] sm:$0xff] %vm223_vm0, %v7429_v36  ;;  %v2917_v51 = vld [vmem:[#allocation2 + $0x140] sm:$0xff]  ;;  %2567 = vst.msk [vmem:[#allocation2 + $0x159] sm:$0xff] %vm223_vm0, %v2535_v24  ;;  %v2536_v59 = vmax.f32 %v2504_v4, 0.0  ;;  %v2431_v24 = vadd.f32 %v5327_v25, %v6945_v2  ;;  %v2474_v4 = vld [vmem:[%s5765_s17 + $0xf0] sm:$0xff] }
 0x283   : > { %v2599_v9 = vld [vmem:[#allocation2 + $0x140] sm:$0xff]  ;;  %3006 = vrot.lane.b32.xlu0 %v2917_v51, %s5609_s14  ;;  %v2210_v46 = vpop.f32.mrb[60].mxu0 }
 0x284   : > { %2631 = vst.msk [vmem:[#allocation3 + $0x438] sm:$0xff] %vm223_vm0, %v2599_v9  ;;  %v7441_v34 = vld [vmem:[#allocation2 + $0x13a] sm:$0xff]  ;;  %v7445_v40 = vld [vmem:[#allocation2 + $0x142] sm:$0xff]  ;;  %3395 = vst.msk [vmem:[#allocation3 + $0x3b0] sm:$0xff] %vm223_vm0, %v2599_v9  ;;  %2754 = vrot.lane.b32.xlu1 %v2663_v13, %s5609_s14  ;;  %v2505_v12 = vadd.f32 %v2473_v55, %v2431_v24  ;;  %v5328_v1 = vadd.f32 %v7351_v22, %v2210_v46  ;;  %v2212_v35 = vpop.f32.mrb[61].mxu0 }
 0x285   : > { %v7443_v11 = vld [vmem:[#allocation2 + $0x141] sm:$0xff]  ;;  %2886 = vst.msk [vmem:[#allocation3 + $0x418] sm:$0xff] %vm223_vm0, %v7441_v34  ;;  %2887 = vst.msk [vmem:[#allocation3 + $0x440] sm:$0xff] %vm223_vm0, %v7445_v40  ;;  %v2918_v51 = vld [vmem:[#allocation2 + $0x150] sm:$0xff] }
 0x286   : > { %3141 = vst.msk [vmem:[#allocation3 + $0x3f8] sm:$0xff] %vm223_vm0, %v7443_v11  ;;  %v3618_v32 = vld [vmem:[#allocation2 + $0x13a] sm:$0xff]  ;;  %v3619_v28 = vld [vmem:[#allocation2 + $0x142] sm:$0xff]  ;;  %v2664_v13 = vld [vmem:[#allocation2 + $0x151] sm:$0xff]  ;;  %v2537_v25 = vmax.f32 %v2505_v12, 0.0  ;;  %v2436_v55 = vadd.f32 %v5328_v1, %v6965_v49 }
 0x287   : > { %3650 = vst.msk [vmem:[#allocation3 + $0x390] sm:$0xff] %vm223_vm0, %v3618_v32  ;;  %v2600_v9 = vld [vmem:[#allocation2 + $0x150] sm:$0xff]  ;;  %3651 = vst.msk [vmem:[#allocation3 + $0x3b8] sm:$0xff] %vm223_vm0, %v3619_v28  ;;  %3008 = vrot.lane.b32.xlu0 %v2918_v51, %s5609_s14  ;;  %v2215_v32 = vpop.f32.mrb[62].mxu0  ;;  %v2475_v1 = vld [vmem:[%s5765_s17 + $0xf8] sm:$0xff]  ;;  %s5547_s17 = sshll.u32 %s5610_s11, 4  ;;  %s5548_s17 = int_to_ptr.vmem [resolvable:$false] %s5547_s17 }
 0x288   : > { %2568 = vst.msk [vmem:[#allocation2 + $0x169] sm:$0xff] %vm223_vm0, %v2536_v59  ;;  %2632 = vst.msk [vmem:[#allocation3 + $0x460] sm:$0xff] %vm223_vm0, %v2600_v9  ;;  %v7463_v2 = vld [vmem:[#allocation2 + $0x151] sm:$0xff]  ;;  %2756 = vrot.lane.b32.xlu1 %v2664_v13, %s5609_s14  ;;  %v2506_v28 = vadd.f32 %v2474_v4, %v2436_v55  ;;  %v5329_v46 = vadd.f32 %v7351_v22, %v2215_v32  ;;  %v2217_v51 = vpop.f32.mrb[63].mxu0  ;;  %s5549_s12 = scalar_lea.vmem %s5548_s17, 8192 }
 0x289   : > { %3396 = vst.msk [vmem:[#allocation3 + $0x3d8] sm:$0xff] %vm223_vm0, %v2600_v9  ;;  %3142 = vst.msk [vmem:[#allocation3 + $0x420] sm:$0xff] %vm223_vm0, %v7463_v2  ;;  %v2919_v35 = vld [vmem:[#allocation2 + $0x158] sm:$0xff] }
 0x28a   : > { %v2665_v59 = vld [vmem:[#allocation2 + $0x159] sm:$0xff]  ;;  %2569 = vst.msk [vmem:[#allocation2 + $0x171] sm:$0xff] %vm223_vm0, %v2537_v25  ;;  %v2538_v49 = vmax.f32 %v2506_v28, 0.0  ;;  %v2441_v22 = vadd.f32 %v5329_v46, %v6963_v8 }
 0x28b   : > { %v2601_v24 = vld [vmem:[#allocation2 + $0x158] sm:$0xff]  ;;  %3010 = vrot.lane.b32.xlu0 %v2919_v35, %s5609_s14 }
 0x28c   : > { %2633 = vst.msk [vmem:[#allocation3 + $0x488] sm:$0xff] %vm223_vm0, %v2601_v24  ;;  %v7475_v13 = vld [vmem:[#allocation2 + $0x152] sm:$0xff]  ;;  %v7479_v12 = vld [vmem:[#allocation2 + $0x15a] sm:$0xff]  ;;  %3397 = vst.msk [vmem:[#allocation3 + $0x400] sm:$0xff] %vm223_vm0, %v2601_v24  ;;  %2758 = vrot.lane.b32.xlu1 %v2665_v59, %s5609_s14  ;;  %v2507_v35 = vadd.f32 %v2475_v1, %v2441_v22 }
 0x28d   : > { %v7477_v9 = vld [vmem:[#allocation2 + $0x159] sm:$0xff]  ;;  %2888 = vst.msk [vmem:[#allocation3 + $0x468] sm:$0xff] %vm223_vm0, %v7475_v13  ;;  %2889 = vst.msk [vmem:[#allocation3 + $0x490] sm:$0xff] %vm223_vm0, %v7479_v12 }
 0x28e   : > { %3143 = vst.msk [vmem:[#allocation3 + $0x448] sm:$0xff] %vm223_vm0, %v7477_v9  ;;  %3653 = vst.msk [vmem:[#allocation3 + $0x408] sm:$0xff] %vm223_vm0, %v7479_v12  ;;  %v3620_v4 = vld [vmem:[#allocation2 + $0x152] sm:$0xff]  ;;  %v2539_v8 = vmax.f32 %v2507_v35, 0.0  ;;  %v2957_v24 = vpop.permute.xlu0 %2956  ;;  %v3853_v35 = vld [vmem:[%s8143_s3 + $0x108] sm:$0xff] }
 0x28f   : > { %v2920_v25 = vld [vmem:[#allocation2 + $0x168] sm:$0xff]  ;;  %3652 = vst.msk [vmem:[#allocation3 + $0x3e0] sm:$0xff] %vm223_vm0, %v3620_v4  ;;  %2570 = vst.msk [vmem:[#allocation2 + $0x181] sm:$0xff] %vm223_vm0, %v2538_v49  ;;  %v2705_v28 = vpop.permute.xlu1 %2704 }
 0x290   : > { %v2666_v55 = vld [vmem:[#allocation2 + $0x169] sm:$0xff]  ;;  %3012 = vrot.lane.b32.xlu0 %v2920_v25, %s5609_s14  ;;  %3052 = vst.msk [vmem:[#allocation3 + $0x8] sm:$0xff] %vm568_vm2, %v2957_v24  ;;  %2798 = vst.msk [vmem:[#allocation3 + $0x50] sm:$0xff] %vm568_vm2, %v2705_v28 }
 0x291   : > { %v2602_v32 = vld [vmem:[#allocation2 + $0x168] sm:$0xff]  ;;  %2760 = vrot.lane.b32.xlu1 %v2666_v55, %s5609_s14  ;;  %v2921_v46 = vld [vmem:[#allocation2 + $0x170] sm:$0xff]  ;;  %2571 = vst.msk [vmem:[#allocation2 + $0x189] sm:$0xff] %vm223_vm0, %v2539_v8 }
 0x292   : > { %2634 = vst.msk [vmem:[#allocation3 + $0x4b0] sm:$0xff] %vm223_vm0, %v2602_v32  ;;  %v7497_v59 = vld [vmem:[#allocation2 + $0x169] sm:$0xff]  ;;  %3398 = vst.msk [vmem:[#allocation3 + $0x428] sm:$0xff] %vm223_vm0, %v2602_v32  ;;  %v2667_v51 = vld [vmem:[#allocation2 + $0x171] sm:$0xff]  ;;  %v2959_v25 = vpop.permute.xlu0 %2958 }
 0x293   : > { %3144 = vst.msk [vmem:[#allocation3 + $0x470] sm:$0xff] %vm223_vm0, %v7497_v59  ;;  %v2603_v1 = vld [vmem:[#allocation2 + $0x170] sm:$0xff]  ;;  %v2707_v55 = vpop.permute.xlu1 %2706  ;;  %v3852_v32 = vld [vmem:[%s8143_s3 + $0x100] sm:$0xff] }
 0x294   : > { %3014 = vrot.lane.b32.xlu0 %v2921_v46, %s5609_s14  ;;  %2635 = vst.msk [vmem:[#allocation3 + $0x4d8] sm:$0xff] %vm223_vm0, %v2603_v1  ;;  %v7508_v49 = vld [vmem:[#allocation2 + $0x16a] sm:$0xff]  ;;  %v7512_v4 = vld [vmem:[#allocation2 + $0x172] sm:$0xff]  ;;  %3399 = vst.msk [vmem:[#allocation3 + $0x450] sm:$0xff] %vm223_vm0, %v2603_v1 }
 0x295   : > { %v7510_v22 = vld [vmem:[#allocation2 + $0x171] sm:$0xff]  ;;  %2762 = vrot.lane.b32.xlu1 %v2667_v51, %s5609_s14  ;;  %2890 = vst.msk [vmem:[#allocation3 + $0x4b8] sm:$0xff] %vm223_vm0, %v7508_v49  ;;  %2891 = vst.msk [vmem:[#allocation3 + $0x4e0] sm:$0xff] %vm223_vm0, %v7512_v4  ;;  %v5227_v51 = vpack.c.bf16 %v3853_v35, %v3852_v32 }
 0x296   : > { %3145 = vst.msk [vmem:[#allocation3 + $0x498] sm:$0xff] %vm223_vm0, %v7510_v22  ;;  %3654 = vst.msk [vmem:[#allocation3 + $0x430] sm:$0xff] %vm223_vm0, %v7508_v49  ;;  %v2922_v8 = vld [vmem:[#allocation2 + $0x180] sm:$0xff]  ;;  %v3660_v46 = vld [vmem:[#allocation3] sm:$0xff]  ;;  %v2961_v1 = vpop.permute.xlu0 %2960 }
 0x297   : > { %3655 = vst.msk [vmem:[#allocation3 + $0x458] sm:$0xff] %vm223_vm0, %v7512_v4  ;;  %v7534_v24 = vld [vmem:[#allocation2 + $0x181] sm:$0xff]  ;;  %v3661_v31 = vld [vmem:[#allocation3 + $0x8] sm:$0xff] }
 0x298   : > { %3053 = vst.msk [vmem:[#allocation3 + $0x30] sm:$0xff] %vm568_vm2, %v2959_v25  ;;  %2799 = vst.msk [vmem:[#allocation3 + $0x78] sm:$0xff] %vm568_vm2, %v2707_v55  ;;  %v3368_v28 = vld [vmem:[#allocation2 + $0x180] sm:$0xff]  ;;  %3016 = vrot.lane.b32.xlu0 %v2922_v8, %s5609_s14  ;;  %v2709_v25 = vpop.permute.xlu1 %2708  ;;  %v3854_v55 = vld [vmem:[%s8143_s3 + $0x110] sm:$0xff]  ;;  %4059 = vmatprep.mubr.f32.mxu1 %v3661_v31 }
 0x299   : > { %8162 = vst [vmem:[#allocation10_spill] sm:$0xff] %v7534_v24  ;;  %3400 = vst.msk [vmem:[#allocation3 + $0x478] sm:$0xff] %vm223_vm0, %v3368_v28  ;;  %3212 = vrot.lane.b32.xlu1 %v7034_v45, %s5609_s14  ;;  %v3855_v8 = vld [vmem:[%s8143_s3 + $0x118] sm:$0xff]  ;;  %v2923_v28 = vld [vmem:[#allocation2 + $0x188] sm:$0xff]  ;;  %4060 = vmatmul.mubr.f32.vlgmr.msra.gmra.mrb[32].mxu1 %v3660_v46 }
 0x29a   : > { %3146 = vst.msk [vmem:[#allocation3 + $0x4c0] sm:$0xff] %vm223_vm0, %v7534_v24  ;;  %v7550_v45 = vld [vmem:[#allocation2 + $0x182] sm:$0xff]  ;;  %v7555_v35 = vld [vmem:[#allocation2 + $0x18a] sm:$0xff]  ;;  %5228 = vmatpush1.bf16.msra.mxu1 %v5227_v51  ;;  %v3665_v31 = vld [vmem:[#allocation3 + $0x28] sm:$0xff]  ;;  %v8165_v24 = vmov 0.0|0.0  }
 0x29b   : > { %3054 = vst.msk [vmem:[#allocation3 + $0x58] sm:$0xff] %vm568_vm2, %v2961_v1  ;;  %2800 = vst.msk [vmem:[#allocation3 + $0xa0] sm:$0xff] %vm568_vm2, %v2709_v25  ;;  %v7552_v32 = vld [vmem:[#allocation2 + $0x189] sm:$0xff]  ;;  %v5230_v1 = vpack.c.bf16 %v3855_v8, %v3854_v55  ;;  %v2963_v46 = vpop.permute.xlu0 %2962  ;;  %5229 = vmatprep.subr.bf16.mxu1 %v8165_v24 }
 0x29c   : > { %8163 = vst [vmem:[#allocation11_spill] sm:$0xff] %v7552_v32  ;;  %3018 = vrot.lane.b32.xlu0 %v2923_v28, %s5609_s14  ;;  %8164 = vst [vmem:[#allocation12_spill] sm:$0xff] %v7555_v35  ;;  %v3369_v39 = vld [vmem:[#allocation2 + $0x188] sm:$0xff]  ;;  %v2711_v25 = vpop.permute.xlu1 %2710 }
 0x29d   : > { %3147 = vst.msk [vmem:[#allocation3 + $0x4e8] sm:$0xff] %vm223_vm0, %v7552_v32  ;;  %3656 = vst.msk [vmem:[#allocation3 + $0x480] sm:$0xff] %vm223_vm0, %v7550_v45  ;;  %3214 = vrot.lane.b32.xlu1 %v7036_v5, %s5609_s14  ;;  %v3856_v32 = vld [vmem:[%s8143_s3 + $0x120] sm:$0xff]  ;;  %v3857_v5 = vld [vmem:[%s8143_s3 + $0x128] sm:$0xff] }
 0x29e   : > { %3401 = vst.msk [vmem:[#allocation3 + $0x4a0] sm:$0xff] %vm223_vm0, %v3369_v39  ;;  %3657 = vst.msk [vmem:[#allocation3 + $0x4a8] sm:$0xff] %vm223_vm0, %v7555_v35  ;;  %v3404_v39 = vld [vmem:[#allocation2 + $0x31] sm:$0xff]  ;;  %5231 = vmatpush1.bf16.msra.mxu1 %v5230_v1  ;;  %v5233_v51 = vpack.c.bf16 %v3857_v5, %v3856_v32  ;;  %v3670_v32 = vld [vmem:[#allocation3 + $0x50] sm:$0xff] }
 0x29f   : > { %v3666_v28 = vld [vmem:[#allocation3 + $0x30] sm:$0xff]  ;;  %3055 = vst.msk [vmem:[#allocation3 + $0x80] sm:$0xff] %vm568_vm2, %v2963_v46  ;;  %2801 = vst.msk [vmem:[#allocation3 + $0xc8] sm:$0xff] %vm568_vm2, %v2711_v25  ;;  %v2965_v55 = vpop.permute.xlu0 %2964  ;;  %5232 = vmatprep.subr.bf16.mxu1 %v8165_v24  ;;  %v3858_v46 = vld [vmem:[%s8143_s3 + $0x130] sm:$0xff] }
 0x2a0   : > { %4064 = vmatprep.mubr.f32.mxu1 %v3666_v28  ;;  %3468 = vrot.lane.b32.xlu0 %v3404_v39, %s5609_s14  ;;  %v2713_v8 = vpop.permute.xlu1 %2712  ;;  %v3859_v25 = vld [vmem:[%s8143_s3 + $0x138] sm:$0xff]  ;;  %3056 = vst.msk [vmem:[#allocation3 + $0xa8] sm:$0xff] %vm568_vm2, %v2965_v55  ;;  %v3860_v5 = vld [vmem:[%s8143_s3 + $0x140] sm:$0xff]  ;;  %v3406_v55 = vld [vmem:[#allocation2 + $0x49] sm:$0xff] }
 0x2a1   : > { %4065 = vmatmul.mubr.f32.gmra.mrb[34].mxu1 %v3665_v31  ;;  %3216 = vrot.lane.b32.xlu1 %v7059_v18, %s5609_s14  ;;  %2802 = vst.msk [vmem:[#allocation3 + $0xf0] sm:$0xff] %vm568_vm2, %v2713_v8  ;;  %v3405_v18 = vld [vmem:[#allocation2 + $0x39] sm:$0xff]  ;;  %v5236_v31 = vpack.c.bf16 %v3859_v25, %v3858_v46  ;;  %v3862_v25 = vld [vmem:[%s8143_s3 + $0x150] sm:$0xff] }
 0x2a2   : > { %v3671_v35 = vld [vmem:[#allocation3 + $0x58] sm:$0xff]  ;;  %5234 = vmatpush1.bf16.msra.mxu1 %v5233_v51 }
 0x2a3   : > { %4069 = vmatprep.mubr.f32.mxu1 %v3671_v35  ;;  %v2967_v1 = vpop.permute.xlu0 %2966  ;;  %5235 = vmatprep.subr.bf16.mxu1 %v8165_v24  ;;  %v3861_v35 = vld [vmem:[%s8143_s3 + $0x148] sm:$0xff] }
 0x2a4   : > { %3470 = vrot.lane.b32.xlu0 %v3405_v18, %s5609_s14  ;;  %3057 = vst.msk [vmem:[#allocation3 + $0xd0] sm:$0xff] %vm568_vm2, %v2967_v1  ;;  %v2715_v39 = vpop.permute.xlu1 %2714  ;;  %v5239_v51 = vpack.c.bf16 %v3861_v35, %v3860_v5  ;;  %v3863_v18 = vld [vmem:[%s8143_s3 + $0x158] sm:$0xff]  ;;  %v3864_v35 = vld [vmem:[%s8143_s3 + $0x160] sm:$0xff] }
 0x2a5   : > { %4070 = vmatmul.mubr.f32.gmra.mrb[36].mxu1 %v3670_v32  ;;  %3218 = vrot.lane.b32.xlu1 %v7066_v47, %s5609_s14  ;;  %v3675_v47 = vld [vmem:[#allocation3 + $0x78] sm:$0xff]  ;;  %2803 = vst.msk [vmem:[#allocation3 + $0x118] sm:$0xff] %vm568_vm2, %v2715_v39  ;;  %v3407_v1 = vld [vmem:[#allocation2 + $0x51] sm:$0xff] }
 0x2a6   : > { %v3676_v28 = vld [vmem:[#allocation3 + $0x80] sm:$0xff]  ;;  %5237 = vmatpush1.bf16.msra.mxu1 %v5236_v31  ;;  %v5242_v31 = vpack.c.bf16 %v3863_v18, %v3862_v25  ;;  %v3865_v39 = vld [vmem:[%s8143_s3 + $0x168] sm:$0xff]  ;;  %v3867_v18 = vld [vmem:[%s8143_s3 + $0x178] sm:$0xff] }
 0x2a7   : > { %4074 = vmatprep.mubr.f32.mxu1 %v3676_v28  ;;  %v2969_v8 = vpop.permute.xlu0 %2968  ;;  %v3681_v46 = vld [vmem:[#allocation3 + $0xa8] sm:$0xff]  ;;  %5238 = vmatprep.subr.bf16.mxu1 %v8165_v24  ;;  %v3866_v25 = vld [vmem:[%s8143_s3 + $0x170] sm:$0xff] }
 0x2a8   : > { %3472 = vrot.lane.b32.xlu0 %v3406_v55, %s5609_s14  ;;  %3058 = vst.msk [vmem:[#allocation3 + $0xf8] sm:$0xff] %vm568_vm2, %v2969_v8  ;;  %v2717_v32 = vpop.permute.xlu1 %2716 }
 0x2a9   : > { %4075 = vmatmul.mubr.f32.gmra.mrb[38].mxu1 %v3675_v47  ;;  %3220 = vrot.lane.b32.xlu1 %v7091_v10, %s5609_s14  ;;  %v3680_v10 = vld [vmem:[#allocation3 + $0xa0] sm:$0xff]  ;;  %2804 = vst.msk [vmem:[#allocation3 + $0x140] sm:$0xff] %vm568_vm2, %v2717_v32  ;;  %v3408_v47 = vld [vmem:[#allocation2 + $0x61] sm:$0xff] }
 0x2aa   : > { %4079 = vmatprep.mubr.f32.mxu1 %v3681_v46  ;;  %5240 = vmatpush1.bf16.msra.mxu1 %v5239_v51  ;;  %v5245_v51 = vpack.c.bf16 %v3865_v39, %v3864_v35  ;;  %v3869_v35 = vld [vmem:[%s8143_s3 + $0x188] sm:$0xff] }
 0x2ab   : > { %v2971_v28 = vpop.permute.xlu0 %2970  ;;  %v3686_v5 = vld [vmem:[#allocation3 + $0xd0] sm:$0xff]  ;;  %5241 = vmatprep.subr.bf16.mxu1 %v8165_v24 }
 0x2ac   : > { %3474 = vrot.lane.b32.xlu0 %v3407_v1, %s5609_s14  ;;  %3059 = vst.msk [vmem:[#allocation3 + $0x120] sm:$0xff] %vm568_vm2, %v2971_v28  ;;  %v2719_v55 = vpop.permute.xlu1 %2718  ;;  %v3409_v1 = vld [vmem:[#allocation2 + $0x69] sm:$0xff] }
 0x2ad   : > { %4080 = vmatmul.mubr.f32.gmra.mrb[40].mxu1 %v3680_v10  ;;  %3222 = vrot.lane.b32.xlu1 %v7097_v27, %s5609_s14  ;;  %v3685_v27 = vld [vmem:[#allocation3 + $0xc8] sm:$0xff]  ;;  %2805 = vst.msk [vmem:[#allocation3 + $0x168] sm:$0xff] %vm568_vm2, %v2719_v55  ;;  %v5248_v10 = vpack.c.bf16 %v3867_v18, %v3866_v25 }
 0x2ae   : > { %4084 = vmatprep.mubr.f32.mxu1 %v3686_v5  ;;  %5243 = vmatpush1.bf16.msra.mxu1 %v5242_v31  ;;  %v3868_v5 = vld [vmem:[%s8143_s3 + $0x180] sm:$0xff] }
 0x2af   : > { %v3691_v46 = vld [vmem:[#allocation3 + $0xf8] sm:$0xff]  ;;  %5244 = vmatprep.subr.bf16.mxu1 %v8165_v24  ;;  %v3410_v55 = vld [vmem:[#allocation2 + $0x79] sm:$0xff] }
 0x2b0   : > { %3476 = vrot.lane.b32.xlu0 %v3408_v47, %s5609_s14  ;;  %v2973_v8 = vpop.permute.xlu0 %2972  ;;  %v5251_v47 = vpack.c.bf16 %v3869_v35, %v3868_v5  ;;  %v3700_v18 = vld [vmem:[#allocation3 + $0x140] sm:$0xff] }
 0x2b1   : > { %4085 = vmatmul.mubr.f32.gmra.mrb[42].mxu1 %v3685_v27  ;;  %3224 = vrot.lane.b32.xlu1 %v7120_v7, %s5609_s14  ;;  %3060 = vst.msk [vmem:[#allocation3 + $0x148] sm:$0xff] %vm568_vm2, %v2973_v8  ;;  %v2721_v32 = vpop.permute.xlu1 %2720  ;;  %v3690_v7 = vld [vmem:[#allocation3 + $0xf0] sm:$0xff]  ;;  %v3870_v8 = vld [vmem:[%s8143_s3 + $0x190] sm:$0xff] }
 0x2b2   : > { %4089 = vmatprep.mubr.f32.mxu1 %v3691_v46  ;;  %2806 = vst.msk [vmem:[#allocation3 + $0x190] sm:$0xff] %vm568_vm2, %v2721_v32  ;;  %5246 = vmatpush1.bf16.msra.mxu1 %v5245_v51  ;;  %v3871_v46 = vld [vmem:[%s8143_s3 + $0x198] sm:$0xff]  ;;  %v3874_v35 = vld [vmem:[%s8143_s3 + $0x1b0] sm:$0xff] }
 0x2b3   : > { %v3696_v28 = vld [vmem:[#allocation3 + $0x120] sm:$0xff]  ;;  %5247 = vmatprep.subr.bf16.mxu1 %v8165_v24 }
 0x2b4   : > { %3478 = vrot.lane.b32.xlu0 %v3409_v1, %s5609_s14  ;;  %v2975_v31 = vpop.permute.xlu0 %2974 }
 0x2b5   : > { %4090 = vmatmul.mubr.f32.gmra.mrb[44].mxu1 %v3690_v7  ;;  %3226 = vrot.lane.b32.xlu1 %v7127_v38, %s5609_s14  ;;  %3061 = vst.msk [vmem:[#allocation3 + $0x170] sm:$0xff] %vm568_vm2, %v2975_v31  ;;  %v2723_v39 = vpop.permute.xlu1 %2722  ;;  %v3695_v38 = vld [vmem:[#allocation3 + $0x118] sm:$0xff]  ;;  %v3872_v7 = vld [vmem:[%s8143_s3 + $0x1a0] sm:$0xff]  ;;  %v3705_v31 = vld [vmem:[#allocation3 + $0x168] sm:$0xff] }
 0x2b6   : > { %4094 = vmatprep.mubr.f32.mxu1 %v3696_v28  ;;  %2807 = vst.msk [vmem:[#allocation3 + $0x1b8] sm:$0xff] %vm568_vm2, %v2723_v39  ;;  %5249 = vmatpush1.bf16.msra.mxu1 %v5248_v10  ;;  %v3873_v10 = vld [vmem:[%s8143_s3 + $0x1a8] sm:$0xff]  ;;  %v3875_v39 = vld [vmem:[%s8143_s3 + $0x1b8] sm:$0xff] }
 0x2b7   : > { %5250 = vmatprep.subr.bf16.mxu1 %v8165_v24 }
 0x2b8   : > { %3480 = vrot.lane.b32.xlu0 %v3410_v55, %s5609_s14  ;;  %v2977_v27 = vpop.permute.xlu0 %2976  ;;  %v3701_v51 = vld [vmem:[#allocation3 + $0x148] sm:$0xff] }
 0x2b9   : > { %4095 = vmatmul.mubr.f32.gmra.mrb[46].mxu1 %v3695_v38  ;;  %3228 = vrot.lane.b32.xlu1 %v7151_v15, %s5609_s14  ;;  %3062 = vst.msk [vmem:[#allocation3 + $0x198] sm:$0xff] %vm568_vm2, %v2977_v27  ;;  %v2725_v25 = vpop.permute.xlu1 %2724  ;;  %v5254_v15 = vpack.c.bf16 %v3871_v46, %v3870_v8  ;;  %v3710_v55 = vld [vmem:[#allocation3 + $0x190] sm:$0xff] }
 0x2ba   : > { %4099 = vmatprep.mubr.f32.mxu1 %v3701_v51  ;;  %2808 = vst.msk [vmem:[#allocation3 + $0x1e0] sm:$0xff] %vm568_vm2, %v2725_v25  ;;  %5252 = vmatpush1.bf16.msra.mxu1 %v5251_v47  ;;  %v3876_v27 = vld [vmem:[%s8143_s3 + $0x1c0] sm:$0xff]  ;;  %v3877_v51 = vld [vmem:[%s8143_s3 + $0x1c8] sm:$0xff] }
 0x2bb   : > { %5253 = vmatprep.subr.bf16.mxu1 %v8165_v24 }
 0x2bc   : > { %3482 = vrot.lane.b32.xlu0 %v7153_v53, %s5609_s14  ;;  %v2979_v32 = vpop.permute.xlu0 %2978  ;;  %v3706_v1 = vld [vmem:[#allocation3 + $0x170] sm:$0xff] }
 0x2bd   : > { %4100 = vmatmul.mubr.f32.gmra.mrb[48].mxu1 %v3700_v18  ;;  %3230 = vrot.lane.b32.xlu1 %v7159_v16, %s5609_s14  ;;  %3063 = vst.msk [vmem:[#allocation3 + $0x1c0] sm:$0xff] %vm568_vm2, %v2979_v32  ;;  %v2727_v53 = vpop.permute.xlu1 %2726  ;;  %v5257_v16 = vpack.c.bf16 %v3873_v10, %v3872_v7  ;;  %v3715_v8 = vld [vmem:[#allocation3 + $0x1b8] sm:$0xff]  ;;  %v3878_v18 = vld [vmem:[%s8143_s3 + $0x1d0] sm:$0xff]  ;;  %v3880_v10 = vld [vmem:[%s8143_s3 + $0x1e0] sm:$0xff] }
 0x2be   : > { %4104 = vmatprep.mubr.f32.mxu1 %v3706_v1  ;;  %2809 = vst.msk [vmem:[#allocation3 + $0x208] sm:$0xff] %vm568_vm2, %v2727_v53  ;;  %5255 = vmatpush1.bf16.msra.mxu1 %v5254_v15  ;;  %v3879_v15 = vld [vmem:[%s8143_s3 + $0x1d8] sm:$0xff]  ;;  %v3881_v53 = vld [vmem:[%s8143_s3 + $0x1e8] sm:$0xff] }
 0x2bf   : > { %5256 = vmatprep.subr.bf16.mxu1 %v8165_v24 }
 0x2c0   : > { %3484 = vrot.lane.b32.xlu0 %v7169_v6, %s5609_s14  ;;  %v2981_v28 = vpop.permute.xlu0 %2980  ;;  %v3711_v5 = vld [vmem:[#allocation3 + $0x198] sm:$0xff] }
 0x2c1   : > { %4105 = vmatmul.mubr.f32.gmra.mrb[50].mxu1 %v3705_v31  ;;  %3232 = vrot.lane.b32.xlu1 %v7186_v56, %s5609_s14  ;;  %3064 = vst.msk [vmem:[#allocation3 + $0x1e8] sm:$0xff] %vm568_vm2, %v2981_v28  ;;  %v2729_v6 = vpop.permute.xlu1 %2728  ;;  %v5260_v56 = vpack.c.bf16 %v3875_v39, %v3874_v35  ;;  %v3720_v32 = vld [vmem:[#allocation3 + $0x1e0] sm:$0xff]  ;;  %v3883_v35 = vld [vmem:[%s8143_s3 + $0x1f8] sm:$0xff] }
 0x2c2   : > { %4109 = vmatprep.mubr.f32.mxu1 %v3711_v5  ;;  %2810 = vst.msk [vmem:[#allocation3 + $0x230] sm:$0xff] %vm568_vm2, %v2729_v6  ;;  %5258 = vmatpush1.bf16.msra.mxu1 %v5257_v16  ;;  %v3882_v5 = vld [vmem:[%s8143_s3 + $0x1f0] sm:$0xff] }
 0x2c3   : > { %5259 = vmatprep.subr.bf16.mxu1 %v8165_v24 }
 0x2c4   : > { %3486 = vrot.lane.b32.xlu0 %v7188_v17, %s5609_s14  ;;  %v2983_v38 = vpop.permute.xlu0 %2982  ;;  %v3716_v47 = vld [vmem:[#allocation3 + $0x1c0] sm:$0xff] }
 0x2c5   : > { %4110 = vmatmul.mubr.f32.gmra.mrb[52].mxu1 %v3710_v55  ;;  %3234 = vrot.lane.b32.xlu1 %v7195_v19, %s5609_s14  ;;  %3065 = vst.msk [vmem:[#allocation3 + $0x210] sm:$0xff] %vm568_vm2, %v2983_v38  ;;  %v2731_v17 = vpop.permute.xlu1 %2730  ;;  %v5263_v19 = vpack.c.bf16 %v3877_v51, %v3876_v27  ;;  %v3725_v31 = vld [vmem:[#allocation3 + $0x208] sm:$0xff] }
 0x2c6   : > { %4114 = vmatprep.mubr.f32.mxu1 %v3716_v47  ;;  %2811 = vst.msk [vmem:[#allocation3 + $0x258] sm:$0xff] %vm568_vm2, %v2731_v17  ;;  %5261 = vmatpush1.bf16.msra.mxu1 %v5260_v56 }
 0x2c7   : > { %5262 = vmatprep.subr.bf16.mxu1 %v8165_v24 }
 0x2c8   : > { %3488 = vrot.lane.b32.xlu0 %v7205_v29, %s5609_s14  ;;  %v3721_v25 = vld [vmem:[#allocation3 + $0x1e8] sm:$0xff] }
 0x2c9   : > { %4115 = vmatmul.mubr.f32.gmra.mrb[54].mxu1 %v3715_v8  ;;  %3236 = vrot.lane.b32.xlu1 %v7223_v33, %s5609_s14  ;;  %v2985_v46 = vpop.permute.xlu0 %2984  ;;  %v5266_v33 = vpack.c.bf16 %v3879_v15, %v3878_v18  ;;  %v3730_v39 = vld [vmem:[#allocation3 + $0x230] sm:$0xff] }
 0x2ca   : > { %3066 = vst.msk [vmem:[#allocation3 + $0x238] sm:$0xff] %vm568_vm2, %v2985_v46  ;;  %v2733_v29 = vpop.permute.xlu1 %2732  ;;  %4119 = vmatprep.mubr.f32.mxu1 %v3721_v25  ;;  %5264 = vmatpush1.bf16.msra.mxu1 %v5263_v19 }
 0x2cb   : > { %2812 = vst.msk [vmem:[#allocation3 + $0x280] sm:$0xff] %vm568_vm2, %v2733_v29  ;;  %5265 = vmatprep.subr.bf16.mxu1 %v8165_v24 }
 0x2cc   : > { %3490 = vrot.lane.b32.xlu0 %v7225_v63, %s5609_s14  ;;  %v3726_v7 = vld [vmem:[#allocation3 + $0x210] sm:$0xff] }
 0x2cd   : > { %4120 = vmatmul.mubr.f32.gmra.mrb[56].mxu1 %v3720_v32  ;;  %3238 = vrot.lane.b32.xlu1 %v7231_v37, %s5609_s14  ;;  %v2987_v1 = vpop.permute.xlu0 %2986  ;;  %v5269_v37 = vpack.c.bf16 %v3881_v53, %v3880_v10  ;;  %v3735_v38 = vld [vmem:[#allocation3 + $0x258] sm:$0xff] }
 0x2ce   : > { %3067 = vst.msk [vmem:[#allocation3 + $0x260] sm:$0xff] %vm568_vm2, %v2987_v1  ;;  %v2735_v63 = vpop.permute.xlu1 %2734  ;;  %4124 = vmatprep.mubr.f32.mxu1 %v3726_v7  ;;  %5267 = vmatpush1.bf16.msra.mxu1 %v5266_v33 }
 0x2cf   : > { %2813 = vst.msk [vmem:[#allocation3 + $0x2a8] sm:$0xff] %vm568_vm2, %v2735_v63  ;;  %5268 = vmatprep.subr.bf16.mxu1 %v8165_v24 }
 0x2d0   : > { %3492 = vrot.lane.b32.xlu0 %v7242_v21, %s5609_s14 }
 0x2d1   : > { %4125 = vmatmul.mubr.f32.gmra.mrb[58].mxu1 %v3725_v31  ;;  %3240 = vrot.lane.b32.xlu1 %v7258_v44, %s5609_s14  ;;  %v2989_v16 = vpop.permute.xlu0 %2988  ;;  %v3731_v28 = vld [vmem:[#allocation3 + $0x238] sm:$0xff]  ;;  %v5272_v44 = vpack.c.bf16 %v3883_v35, %v3882_v5 }
 0x2d2   : > { %3068 = vst.msk [vmem:[#allocation3 + $0x288] sm:$0xff] %vm568_vm2, %v2989_v16  ;;  %v2737_v21 = vpop.permute.xlu1 %2736  ;;  %4129 = vmatprep.mubr.f32.mxu1 %v3731_v28  ;;  %5270 = vmatpush1.bf16.msra.mxu1 %v5269_v37  ;;  %v3740_v47 = vld [vmem:[#allocation3 + $0x280] sm:$0xff] }
 0x2d3   : > { %2814 = vst.msk [vmem:[#allocation3 + $0x2d0] sm:$0xff] %vm568_vm2, %v2737_v21  ;;  %5271 = vmatprep.subr.bf16.mxu1 %v8165_v24 }
 0x2d4   : > { %3494 = vrot.lane.b32.xlu0 %v7260_v62, %s5609_s14 }
 0x2d5   : > { %4130 = vmatmul.mubr.f32.gmra.mrb[60].mxu1 %v3730_v39  ;;  %3242 = vrot.lane.b32.xlu1 %v7267_v20, %s5609_s14  ;;  %v2991_v6 = vpop.permute.xlu0 %2990  ;;  %v3736_v55 = vld [vmem:[#allocation3 + $0x260] sm:$0xff] }
 0x2d6   : > { %3069 = vst.msk [vmem:[#allocation3 + $0x2b0] sm:$0xff] %vm568_vm2, %v2991_v6  ;;  %v2739_v56 = vpop.permute.xlu1 %2738  ;;  %4134 = vmatprep.mubr.f32.mxu1 %v3736_v55  ;;  %5273 = vmatpush1.bf16.msra.mxu1 %v5272_v44  ;;  %v3745_v51 = vld [vmem:[#allocation3 + $0x2a8] sm:$0xff] }
 0x2d7   : > { %2815 = vst.msk [vmem:[#allocation3 + $0x2f8] sm:$0xff] %vm568_vm2, %v2739_v56  ;;  %5290 = vmatprep.subr.bf16.mxu1 %v6792_v52 }
 0x2d8   : > { %3496 = vrot.lane.b32.xlu0 %v7278_v14, %s5609_s14 }
 0x2d9   : > { %4135 = vmatmul.mubr.f32.gmra.mrb[62].mxu1 %v3735_v38  ;;  %3244 = vrot.lane.b32.xlu1 %v7295_v26, %s5609_s14  ;;  %v2993_v62 = vpop.permute.xlu0 %2992  ;;  %v3741_v20 = vld [vmem:[#allocation3 + $0x288] sm:$0xff] }
 0x2da   : > { %3070 = vst.msk [vmem:[#allocation3 + $0x2d8] sm:$0xff] %vm568_vm2, %v2993_v62  ;;  %v2741_v24 = vpop.permute.xlu1 %2740  ;;  %4139 = vmatprep.mubr.f32.mxu1 %v3741_v20  ;;  %v3750_v8 = vld [vmem:[#allocation3 + $0x2d0] sm:$0xff]  ;;  %v8166_v62 = vld [vmem:[#allocation10_spill] sm:$0xff] }
 0x2db   : > { %2816 = vst.msk [vmem:[#allocation3 + $0x320] sm:$0xff] %vm568_vm2, %v2741_v24 }
 0x2dc   : > { %3498 = vrot.lane.b32.xlu0 %v7297_v42, %s5609_s14 }
 0x2dd   : > { %4140 = vmatmul.mubr.f32.gmra.mrb[64].mxu1 %v3740_v47  ;;  %3246 = vrot.lane.b32.xlu1 %v7303_v23, %s5609_s14  ;;  %v2995_v14 = vpop.permute.xlu0 %2994  ;;  %v3746_v26 = vld [vmem:[#allocation3 + $0x2b0] sm:$0xff] }
 0x2de   : > { %3071 = vst.msk [vmem:[#allocation3 + $0x300] sm:$0xff] %vm568_vm2, %v2995_v14  ;;  %v2743_v27 = vpop.permute.xlu1 %2742  ;;  %4144 = vmatprep.mubr.f32.mxu1 %v3746_v26  ;;  %v3755_v46 = vld [vmem:[#allocation3 + $0x2f8] sm:$0xff]  ;;  %v8167_v26 = vld [vmem:[#allocation11_spill] sm:$0xff] }
 0x2df   : > { %2817 = vst.msk [vmem:[#allocation3 + $0x348] sm:$0xff] %vm568_vm2, %v2743_v27  ;;  %v8168_v27 = vld [vmem:[#allocation12_spill] sm:$0xff] }
 0x2e0   : > { %3500 = vrot.lane.b32.xlu0 %v7314_v60, %s5609_s14 }
 0x2e1   : > { %4145 = vmatmul.mubr.f32.gmra.mrb[66].mxu1 %v3745_v51  ;;  %3248 = vrot.lane.b32.xlu1 %v7323_v41, %s5609_s14  ;;  %v2997_v42 = vpop.permute.xlu0 %2996  ;;  %v3751_v17 = vld [vmem:[#allocation3 + $0x2d8] sm:$0xff]  ;;  %v3434_v51 = vld [vmem:[#allocation2 + $0x199] sm:$0xff] }
 0x2e2   : > { %3072 = vst.msk [vmem:[#allocation3 + $0x328] sm:$0xff] %vm568_vm2, %v2997_v42  ;;  %v2745_v23 = vpop.permute.xlu1 %2744  ;;  %4149 = vmatprep.mubr.f32.mxu1 %v3751_v17  ;;  %v3760_v18 = vld [vmem:[#allocation3 + $0x320] sm:$0xff] }
 0x2e3   : > { %2818 = vst.msk [vmem:[#allocation3 + $0x370] sm:$0xff] %vm568_vm2, %v2745_v23 }
 0x2e4   : > { %3502 = vrot.lane.b32.xlu0 %v7335_v57, %s5609_s14 }
 0x2e5   : > { %4150 = vmatmul.mubr.f32.gmra.mrb[68].mxu1 %v3750_v8  ;;  %3250 = vrot.lane.b32.xlu1 %v7337_v50, %s5609_s14  ;;  %v2999_v60 = vpop.permute.xlu0 %2998  ;;  %v3756_v19 = vld [vmem:[#allocation3 + $0x300] sm:$0xff] }
 0x2e6   : > { %3073 = vst.msk [vmem:[#allocation3 + $0x350] sm:$0xff] %vm568_vm2, %v2999_v60  ;;  %v2747_v41 = vpop.permute.xlu1 %2746  ;;  %4154 = vmatprep.mubr.f32.mxu1 %v3756_v19  ;;  %v3765_v29 = vld [vmem:[#allocation3 + $0x348] sm:$0xff]  ;;  %v3435_v19 = vld [vmem:[#allocation2 + $0x1a1] sm:$0xff] }
 0x2e7   : > { %2819 = vst.msk [vmem:[#allocation3 + $0x398] sm:$0xff] %vm568_vm2, %v2747_v41 }
 0x2e8   : > { %3504 = vrot.lane.b32.xlu0 %v7356_v43, %s5609_s14 }
 0x2e9   : > { %4155 = vmatmul.mubr.f32.gmra.mrb[70].mxu1 %v3755_v46  ;;  %3252 = vrot.lane.b32.xlu1 %v7369_v54, %s5609_s14  ;;  %v3001_v57 = vpop.permute.xlu0 %3000  ;;  %v3761_v25 = vld [vmem:[#allocation3 + $0x328] sm:$0xff] }
 0x2ea   : > { %3074 = vst.msk [vmem:[#allocation3 + $0x378] sm:$0xff] %vm568_vm2, %v3001_v57  ;;  %v2749_v50 = vpop.permute.xlu1 %2748  ;;  %4159 = vmatprep.mubr.f32.mxu1 %v3761_v25  ;;  %v3770_v33 = vld [vmem:[#allocation3 + $0x370] sm:$0xff] }
 0x2eb   : > { %2820 = vst.msk [vmem:[#allocation3 + $0x3c0] sm:$0xff] %vm568_vm2, %v2749_v50 }
 0x2ec   : > { %3506 = vrot.lane.b32.xlu0 %v7378_v48, %s5609_s14 }
 0x2ed   : > { %4160 = vmatmul.mubr.f32.gmra.mrb[72].mxu1 %v3760_v18  ;;  %3254 = vrot.lane.b32.xlu1 %v7380_v0, %s5609_s14  ;;  %v3003_v43 = vpop.permute.xlu0 %3002  ;;  %v3766_v15 = vld [vmem:[#allocation3 + $0x350] sm:$0xff] }
 0x2ee   : > { %3075 = vst.msk [vmem:[#allocation3 + $0x3a0] sm:$0xff] %vm568_vm2, %v3003_v43  ;;  %v2751_v54 = vpop.permute.xlu1 %2750  ;;  %4164 = vmatprep.mubr.f32.mxu1 %v3766_v15  ;;  %v3775_v7 = vld [vmem:[#allocation3 + $0x398] sm:$0xff]  ;;  %v8169_v43 = vld [vmem:[#allocation7_spill] sm:$0xff] }
 0x2ef   : > { %2821 = vst.msk [vmem:[#allocation3 + $0x3e8] sm:$0xff] %vm568_vm2, %v2751_v54 }
 0x2f0   : > { %3508 = vrot.lane.b32.xlu0 %v7393_v3, %s5609_s14 }
 0x2f1   : > { %4165 = vmatmul.mubr.f32.gmra.mrb[74].mxu1 %v3765_v29  ;;  %3256 = vrot.lane.b32.xlu1 %v7405_v30, %s5609_s14  ;;  %v3005_v48 = vpop.permute.xlu0 %3004  ;;  %v3771_v32 = vld [vmem:[#allocation3 + $0x378] sm:$0xff] }
 0x2f2   : > { %3076 = vst.msk [vmem:[#allocation3 + $0x3c8] sm:$0xff] %vm568_vm2, %v3005_v48  ;;  %v2753_v0 = vpop.permute.xlu1 %2752  ;;  %4169 = vmatprep.mubr.f32.mxu1 %v3771_v32  ;;  %v3780_v53 = vld [vmem:[#allocation3 + $0x3c0] sm:$0xff] }
 0x2f3   : > { %2822 = vst.msk [vmem:[#allocation3 + $0x410] sm:$0xff] %vm568_vm2, %v2753_v0  ;;  %v8170_v0 = vld [vmem:[#allocation8_spill] sm:$0xff] }
 0x2f4   : > { %3510 = vrot.lane.b32.xlu0 %v7413_v61, %s5609_s14 }
 0x2f5   : > { %4170 = vmatmul.mubr.f32.gmra.mrb[76].mxu1 %v3770_v33  ;;  %3258 = vrot.lane.b32.xlu1 %v7415_v58, %s5609_s14  ;;  %v3007_v3 = vpop.permute.xlu0 %3006  ;;  %v3776_v1 = vld [vmem:[#allocation3 + $0x3a0] sm:$0xff] }
 0x2f6   : > { %3077 = vst.msk [vmem:[#allocation3 + $0x3f0] sm:$0xff] %vm568_vm2, %v3007_v3  ;;  %v2755_v30 = vpop.permute.xlu1 %2754  ;;  %4174 = vmatprep.mubr.f32.mxu1 %v3776_v1  ;;  %v3785_v31 = vld [vmem:[#allocation3 + $0x3e8] sm:$0xff] }
 0x2f7   : > { %2823 = vst.msk [vmem:[#allocation3 + $0x438] sm:$0xff] %vm568_vm2, %v2755_v30 }
 0x2f8   : > { %3512 = vrot.lane.b32.xlu0 %v7429_v36, %s5609_s14 }
 0x2f9   : > { %4175 = vmatmul.mubr.f32.gmra.mrb[78].mxu1 %v3775_v7  ;;  %3260 = vrot.lane.b32.xlu1 %v7441_v34, %s5609_s14  ;;  %v3009_v61 = vpop.permute.xlu0 %3008  ;;  %v3781_v10 = vld [vmem:[#allocation3 + $0x3c8] sm:$0xff]  ;;  %v8171_v7 = vld [vmem:[#allocation9_spill] sm:$0xff] }
 0x2fa   : > { %3078 = vst.msk [vmem:[#allocation3 + $0x418] sm:$0xff] %vm568_vm2, %v3009_v61  ;;  %v2757_v58 = vpop.permute.xlu1 %2756  ;;  %4179 = vmatprep.mubr.f32.mxu1 %v3781_v10  ;;  %v3790_v16 = vld [vmem:[#allocation3 + $0x410] sm:$0xff] }
 0x2fb   : > { %2824 = vst.msk [vmem:[#allocation3 + $0x460] sm:$0xff] %vm568_vm2, %v2757_v58 }
 0x2fc   : > { %3514 = vrot.lane.b32.xlu0 %v7443_v11, %s5609_s14 }
 0x2fd   : > { %4180 = vmatmul.mubr.f32.gmra.mrb[80].mxu1 %v3780_v53  ;;  %3262 = vrot.lane.b32.xlu1 %v7445_v40, %s5609_s14  ;;  %v3011_v36 = vpop.permute.xlu0 %3010  ;;  %v3786_v63 = vld [vmem:[#allocation3 + $0x3f0] sm:$0xff] }
 0x2fe   : > { %3079 = vst.msk [vmem:[#allocation3 + $0x440] sm:$0xff] %vm568_vm2, %v3011_v36  ;;  %v2759_v34 = vpop.permute.xlu1 %2758  ;;  %4184 = vmatprep.mubr.f32.mxu1 %v3786_v63  ;;  %v3795_v5 = vld [vmem:[#allocation3 + $0x438] sm:$0xff] }
 0x2ff   : > { %2825 = vst.msk [vmem:[#allocation3 + $0x488] sm:$0xff] %vm568_vm2, %v2759_v34 }
 0x300   : > { %3516 = vrot.lane.b32.xlu0 %v7463_v2, %s5609_s14 }
 0x301   : > { %4185 = vmatmul.mubr.f32.gmra.mrb[82].mxu1 %v3785_v31  ;;  %3264 = vrot.lane.b32.xlu1 %v7475_v13, %s5609_s14  ;;  %v3791_v37 = vld [vmem:[#allocation3 + $0x418] sm:$0xff] }
 0x302   : > { %v3013_v11 = vpop.permute.xlu0 %3012  ;;  %4189 = vmatprep.mubr.f32.mxu1 %v3791_v37  ;;  %v3800_v6 = vld [vmem:[#allocation3 + $0x460] sm:$0xff] }
 0x303   : > { %3080 = vst.msk [vmem:[#allocation3 + $0x468] sm:$0xff] %vm568_vm2, %v3013_v11  ;;  %v2761_v40 = vpop.permute.xlu1 %2760 }
 0x304   : > { %2826 = vst.msk [vmem:[#allocation3 + $0x4b0] sm:$0xff] %vm568_vm2, %v2761_v40  ;;  %3518 = vrot.lane.b32.xlu0 %v7477_v9, %s5609_s14  ;;  %v3370_v9 = vld [vmem:[#allocation2 + $0x198] sm:$0xff] }
 0x305   : > { %4190 = vmatmul.mubr.f32.gmra.mrb[84].mxu1 %v3790_v16  ;;  %3266 = vrot.lane.b32.xlu1 %v7479_v12, %s5609_s14  ;;  %v3796_v28 = vld [vmem:[#allocation3 + $0x440] sm:$0xff]  ;;  %3402 = vst.msk [vmem:[#allocation3 + $0x4c8] sm:$0xff] %vm223_vm0, %v3370_v9 }
 0x306   : > { %v3015_v2 = vpop.permute.xlu0 %3014  ;;  %4194 = vmatprep.mubr.f32.mxu1 %v3796_v28  ;;  %v7817_v35 = vpop.f32.mrb[64].mxu0  ;;  %v3805_v38 = vld [vmem:[#allocation3 + $0x488] sm:$0xff] }
 0x307   : > { %3081 = vst.msk [vmem:[#allocation3 + $0x490] sm:$0xff] %vm568_vm2, %v3015_v2  ;;  %v2763_v13 = vpop.permute.xlu1 %2762  ;;  %v7823_v12 = vpop.f32.mrb[65].mxu0 }
 0x308   : > { %2827 = vst.msk [vmem:[#allocation3 + $0x4d8] sm:$0xff] %vm568_vm2, %v2763_v13  ;;  %3520 = vrot.lane.b32.xlu0 %v7497_v59, %s5609_s14  ;;  %v3371_v59 = vld [vmem:[#allocation2 + $0x1a0] sm:$0xff] }
 0x309   : > { %4195 = vmatmul.mubr.f32.gmra.mrb[86].mxu1 %v3795_v5  ;;  %3268 = vrot.lane.b32.xlu1 %v7508_v49, %s5609_s14  ;;  %3403 = vst.msk [vmem:[#allocation3 + $0x4f0] sm:$0xff] %vm223_vm0, %v3371_v59 }
 0x30a   : > { %v3017_v21 = vpop.permute.xlu0 %3016  ;;  %v3801_v39 = vld [vmem:[#allocation3 + $0x468] sm:$0xff] }
 0x30b   : > { %3082 = vst.msk [vmem:[#allocation3 + $0x4b8] sm:$0xff] %vm568_vm2, %v3017_v21  ;;  %v3213_v44 = vpop.permute.xlu1 %3212  ;;  %4199 = vmatprep.mubr.f32.mxu1 %v3801_v39  ;;  %v3810_v14 = vld [vmem:[#allocation3 + $0x4b0] sm:$0xff] }
 0x30c   : > { %3308 = vst.msk [vmem:[#allocation3 + $0x10] sm:$0xff] %vm568_vm2, %v3213_v44  ;;  %3522 = vrot.lane.b32.xlu0 %v7510_v22, %s5609_s14 }
 0x30d   : > { %4200 = vmatmul.mubr.f32.gmra.mrb[88].mxu1 %v3800_v6  ;;  %3270 = vrot.lane.b32.xlu1 %v7512_v4, %s5609_s14 }
 0x30e   : > { %v3019_v49 = vpop.permute.xlu0 %3018  ;;  %v3806_v55 = vld [vmem:[#allocation3 + $0x490] sm:$0xff] }
 0x30f   : > { %3083 = vst.msk [vmem:[#allocation3 + $0x4e0] sm:$0xff] %vm568_vm2, %v3019_v49  ;;  %v3215_v56 = vpop.permute.xlu1 %3214  ;;  %4204 = vmatprep.mubr.f32.mxu1 %v3806_v55  ;;  %v7837_v22 = vpop.f32.mrb[66].mxu0  ;;  %v3815_v23 = vld [vmem:[#allocation3 + $0x4d8] sm:$0xff] }
 0x310   : > { %3309 = vst.msk [vmem:[#allocation3 + $0x38] sm:$0xff] %vm568_vm2, %v3215_v56  ;;  %3524 = vrot.lane.b32.xlu0 %v8166_v62, %s5609_s14  ;;  %v7841_v4 = vpop.f32.mrb[67].mxu0 }
 0x311   : > { %4205 = vmatmul.mubr.f32.gmra.mrb[90].mxu1 %v3805_v38  ;;  %3272 = vrot.lane.b32.xlu1 %v7550_v45, %s5609_s14 }
 0x312   : > { %v3469_v20 = vpop.permute.xlu0 %3468  ;;  %v3811_v24 = vld [vmem:[#allocation3 + $0x4b8] sm:$0xff] }
 0x313   : > { %3564 = vst.msk [vmem:[#allocation3 + $0x18] sm:$0xff] %vm568_vm2, %v3469_v20  ;;  %v3217_v47 = vpop.permute.xlu1 %3216  ;;  %4209 = vmatprep.mubr.f32.mxu1 %v3811_v24  ;;  %v3662_v25 = vld [vmem:[#allocation3 + $0x10] sm:$0xff] }
 0x314   : > { %3310 = vst.msk [vmem:[#allocation3 + $0x60] sm:$0xff] %vm568_vm2, %v3217_v47  ;;  %3526 = vrot.lane.b32.xlu0 %v8167_v26, %s5609_s14 }
 0x315   : > { %4210 = vmatmul.mubr.f32.gmra.mrb[92].mxu1 %v3810_v14  ;;  %3274 = vrot.lane.b32.xlu1 %v8168_v27, %s5609_s14 }
 0x316   : > { %v3471_v45 = vpop.permute.xlu0 %3470  ;;  %v3816_v42 = vld [vmem:[#allocation3 + $0x4e0] sm:$0xff]  ;;  %v7851_v8 = vpop.f32.mrb[68].mxu0 }
 0x317   : > { %3565 = vst.msk [vmem:[#allocation3 + $0x40] sm:$0xff] %vm568_vm2, %v3471_v45  ;;  %v3219_v17 = vpop.permute.xlu1 %3218  ;;  %4214 = vmatprep.mubr.f32.mxu1 %v3816_v42  ;;  %v7854_v60 = vpop.f32.mrb[69].mxu0  ;;  %v3667_v54 = vld [vmem:[#allocation3 + $0x38] sm:$0xff] }
 0x318   : > { %3311 = vst.msk [vmem:[#allocation3 + $0x88] sm:$0xff] %vm568_vm2, %v3219_v17  ;;  %3528 = vrot.lane.b32.xlu0 %v3434_v51, %s5609_s14 }
 0x319   : > { %4215 = vmatmul.mubr.f32.gmra.mrb[94].mxu1 %v3815_v23 }
 0x31a   : > { %v3473_v41 = vpop.permute.xlu0 %3472  ;;  %v3663_v46 = vld [vmem:[#allocation3 + $0x18] sm:$0xff] }
 0x31b   : > { %3566 = vst.msk [vmem:[#allocation3 + $0x68] sm:$0xff] %vm568_vm2, %v3473_v41  ;;  %v3221_v57 = vpop.permute.xlu1 %3220  ;;  %4284 = vmatprep.mubr.f32.mxu1 %v3663_v46  ;;  %v3672_v3 = vld [vmem:[#allocation3 + $0x60] sm:$0xff] }
 0x31c   : > { %3312 = vst.msk [vmem:[#allocation3 + $0xb0] sm:$0xff] %vm568_vm2, %v3221_v57  ;;  %3530 = vrot.lane.b32.xlu0 %v3435_v19, %s5609_s14  ;;  %s215_s14 = sand.u32 1, %s5597_s19  }
 0x31d   : > { %4285 = vmatmul.mubr.f32.vlgmr.msra.gmra.mrb[32].mxu1 %v3662_v25  ;;  %s4782_s25 = sshll.u32 %s215_s14, 8  ;;  %s8099_s22 = scalar_lea.sflag [#allocation5], %s215_s14 }
 0x31e   : > { %5294 = vmatpush3.bf16.msra.mxu1 %v6792_v52  ;;  %v3475_v50 = vpop.permute.xlu0 %3474  ;;  %v3668_v18 = vld [vmem:[#allocation3 + $0x40] sm:$0xff]  ;;  %s7972_s26 = scalar_lea.vmem [#allocation4], %s4782_s25 }
 0x31f   : > { %5291 = vmatprep.subr.bf16.mxu1 %v8169_v43  ;;  %3567 = vst.msk [vmem:[#allocation3 + $0x90] sm:$0xff] %vm568_vm2, %v3475_v50  ;;  %v3223_v15 = vpop.permute.xlu1 %3222  ;;  %4289 = vmatprep.mubr.f32.mxu1 %v3668_v18  ;;  %v3677_v10 = vld [vmem:[#allocation3 + $0x88] sm:$0xff]  ;;  %s4716_s6 = sshll.u32 %s7972_s26, 4  ;;  %s8091_s6 = int_to_ptr.vmem [resolvable:$true] %s4716_s6 }
 0x320   : > { %3313 = vst.msk [vmem:[#allocation3 + $0xd8] sm:$0xff] %vm568_vm2, %v3223_v15  ;;  %v7863_v29 = vpop.f32.mrb[70].mxu0  ;;  %s5543_s10 = scalar_lea.vmem %s8091_s6, 4096  ;;  %p5550_p0 = scmp.lt.s32.totalorder %s8091_s6, %s5548_s17 }
 0x321   : > { %4290 = vmatmul.mubr.f32.gmra.mrb[34].mxu1 %v3667_v54  ;;  %v7866_v48 = vpop.f32.mrb[71].mxu0  ;;  %p5544_p11 = scmp.ne.s32.totalorder %s8091_s6, %s5543_s10  ;;  %p5551_p1 = scmp.lt.s32.totalorder %s5549_s12, %s5543_s10 }
 0x322   : > { %5295 = vmatpush3.bf16.msra.mxu1 %v8169_v43  ;;  %v3477_v32 = vpop.permute.xlu0 %3476  ;;  %v3673_v52 = vld [vmem:[#allocation3 + $0x68] sm:$0xff] }
 0x323   : > { %5292 = vmatprep.subr.bf16.mxu1 %v8170_v0  ;;  %3568 = vst.msk [vmem:[#allocation3 + $0xb8] sm:$0xff] %vm568_vm2, %v3477_v32  ;;  %v3225_v33 = vpop.permute.xlu1 %3224  ;;  %4294 = vmatprep.mubr.f32.mxu1 %v3673_v52  ;;  %v3682_v31 = vld [vmem:[#allocation3 + $0xb0] sm:$0xff]  ;;  %p5545_p12 = pnand %p5544_p11, %p5681_p5  ;;  %p5552_p2 = por %p5551_p1, %p5550_p0 }
 0x324   : > { %3314 = vst.msk [vmem:[#allocation3 + $0x100] sm:$0xff] %vm568_vm2, %v3225_v33 }
 0x325   : > { %4295 = vmatmul.mubr.f32.gmra.mrb[36].mxu1 %v3672_v3  ;;  %p5546_p13 = pneg %p5545_p12 }
 0x326   : > { %5296 = vmatpush3.bf16.msra.mxu1 %v8170_v0  ;;  %v3479_v1 = vpop.permute.xlu0 %3478  ;;  %v3678_v30 = vld [vmem:[#allocation3 + $0x90] sm:$0xff] }
 0x327   : > { %5293 = vmatprep.subr.bf16.mxu1 %v8171_v7  ;;  %3569 = vst.msk [vmem:[#allocation3 + $0xe0] sm:$0xff] %vm568_vm2, %v3479_v1  ;;  %v3227_v61 = vpop.permute.xlu1 %3226  ;;  %4299 = vmatprep.mubr.f32.mxu1 %v3678_v30  ;;  %v7875_v58 = vpop.f32.mrb[72].mxu0  ;;  %v3687_v16 = vld [vmem:[#allocation3 + $0xd8] sm:$0xff]  ;;  %p5553_p3 = pnand %p5552_p2, %p5546_p13 }
 0x328   : > { %3315 = vst.msk [vmem:[#allocation3 + $0x128] sm:$0xff] %vm568_vm2, %v3227_v61  ;;  %v7877_v53 = vpop.f32.mrb[73].mxu0 }
 0x329   : > { %4300 = vmatmul.mubr.f32.gmra.mrb[38].mxu1 %v3677_v10 }
 0x32a   : > { %5297 = vmatpush3.bf16.msra.mxu1 %v8171_v7  ;;  %v3481_v36 = vpop.permute.xlu0 %3480  ;;  %v3683_v63 = vld [vmem:[#allocation3 + $0xb8] sm:$0xff] }
 0x32b   : > { %3570 = vst.msk [vmem:[#allocation3 + $0x108] sm:$0xff] %vm568_vm2, %v3481_v36  ;;  %v3229_v34 = vpop.permute.xlu1 %3228  ;;  %4304 = vmatprep.mubr.f32.mxu1 %v3683_v63  ;;  %v3692_v21 = vld [vmem:[#allocation3 + $0x100] sm:$0xff] }
 0x32c   : > { %3316 = vst.msk [vmem:[#allocation3 + $0x150] sm:$0xff] %vm568_vm2, %v3229_v34 }
 0x32d   : > { %4305 = vmatmul.mubr.f32.gmra.mrb[40].mxu1 %v3682_v31 }
 0x32e   : > { %v3483_v11 = vpop.permute.xlu0 %3482  ;;  %v3688_v37 = vld [vmem:[#allocation3 + $0xe0] sm:$0xff] }
 0x32f   : > { %3571 = vst.msk [vmem:[#allocation3 + $0x130] sm:$0xff] %vm568_vm2, %v3483_v11  ;;  %v3231_v40 = vpop.permute.xlu1 %3230  ;;  %4309 = vmatprep.mubr.f32.mxu1 %v3688_v37  ;;  %v3697_v59 = vld [vmem:[#allocation3 + $0x128] sm:$0xff] }
 0x330   : > { %3317 = vst.msk [vmem:[#allocation3 + $0x178] sm:$0xff] %vm568_vm2, %v3231_v40  ;;  %v7884_v2 = vpop.f32.mrb[74].mxu0 }
 0x331   : > { %4310 = vmatmul.mubr.f32.gmra.mrb[42].mxu1 %v3687_v16  ;;  %v7886_v28 = vpop.f32.mrb[75].mxu0 }
 0x332   : > { %v3485_v13 = vpop.permute.xlu0 %3484  ;;  %v3693_v5 = vld [vmem:[#allocation3 + $0x108] sm:$0xff] }
 0x333   : > { %3572 = vst.msk [vmem:[#allocation3 + $0x158] sm:$0xff] %vm568_vm2, %v3485_v13  ;;  %v3233_v9 = vpop.permute.xlu1 %3232  ;;  %4314 = vmatprep.mubr.f32.mxu1 %v3693_v5  ;;  %v3702_v20 = vld [vmem:[#allocation3 + $0x150] sm:$0xff] }
 0x334   : > { %3318 = vst.msk [vmem:[#allocation3 + $0x1a0] sm:$0xff] %vm568_vm2, %v3233_v9 }
 0x335   : > { %4315 = vmatmul.mubr.f32.gmra.mrb[44].mxu1 %v3692_v21 }
 0x336   : > { %v3487_v39 = vpop.permute.xlu0 %3486  ;;  %v3698_v44 = vld [vmem:[#allocation3 + $0x130] sm:$0xff] }
 0x337   : > { %3573 = vst.msk [vmem:[#allocation3 + $0x180] sm:$0xff] %vm568_vm2, %v3487_v39  ;;  %v3235_v6 = vpop.permute.xlu1 %3234  ;;  %4319 = vmatprep.mubr.f32.mxu1 %v3698_v44  ;;  %v7892_v49 = vpop.f32.mrb[76].mxu0  ;;  %v3707_v26 = vld [vmem:[#allocation3 + $0x178] sm:$0xff] }
 0x338   : > { %3319 = vst.msk [vmem:[#allocation3 + $0x1c8] sm:$0xff] %vm568_vm2, %v3235_v6  ;;  %v7894_v55 = vpop.f32.mrb[77].mxu0 }
 0x339   : > { %4320 = vmatmul.mubr.f32.gmra.mrb[46].mxu1 %v3697_v59 }
 0x33a   : > { %v3489_v56 = vpop.permute.xlu0 %3488  ;;  %v3703_v38 = vld [vmem:[#allocation3 + $0x158] sm:$0xff] }
 0x33b   : > { %3574 = vst.msk [vmem:[#allocation3 + $0x1a8] sm:$0xff] %vm568_vm2, %v3489_v56  ;;  %v3237_v62 = vpop.permute.xlu1 %3236  ;;  %4324 = vmatprep.mubr.f32.mxu1 %v3703_v38  ;;  %v3712_v23 = vld [vmem:[#allocation3 + $0x1a0] sm:$0xff] }
 0x33c   : > { %3320 = vst.msk [vmem:[#allocation3 + $0x1f0] sm:$0xff] %vm568_vm2, %v3237_v62 }
 0x33d   : > { %4325 = vmatmul.mubr.f32.gmra.mrb[48].mxu1 %v3702_v20 }
 0x33e   : > { %v3491_v24 = vpop.permute.xlu0 %3490  ;;  %v3708_v47 = vld [vmem:[#allocation3 + $0x180] sm:$0xff] }
 0x33f   : > { %3575 = vst.msk [vmem:[#allocation3 + $0x1d0] sm:$0xff] %vm568_vm2, %v3491_v24  ;;  %v3239_v14 = vpop.permute.xlu1 %3238  ;;  %4329 = vmatprep.mubr.f32.mxu1 %v3708_v47  ;;  %v3717_v57 = vld [vmem:[#allocation3 + $0x1c8] sm:$0xff] }
 0x340   : > { %3321 = vst.msk [vmem:[#allocation3 + $0x218] sm:$0xff] %vm568_vm2, %v3239_v14  ;;  %v7900_v27 = vpop.f32.mrb[78].mxu0 }
 0x341   : > { %4330 = vmatmul.mubr.f32.gmra.mrb[50].mxu1 %v3707_v26  ;;  %v7902_v51 = vpop.f32.mrb[79].mxu0 }
 0x342   : > { %v3493_v45 = vpop.permute.xlu0 %3492  ;;  %v3713_v42 = vld [vmem:[#allocation3 + $0x1a8] sm:$0xff] }
 0x343   : > { %3576 = vst.msk [vmem:[#allocation3 + $0x1f8] sm:$0xff] %vm568_vm2, %v3493_v45  ;;  %v3241_v17 = vpop.permute.xlu1 %3240  ;;  %4334 = vmatprep.mubr.f32.mxu1 %v3713_v42  ;;  %v3722_v54 = vld [vmem:[#allocation3 + $0x1f0] sm:$0xff] }
 0x344   : > { %3322 = vst.msk [vmem:[#allocation3 + $0x240] sm:$0xff] %vm568_vm2, %v3241_v17 }
 0x345   : > { %4335 = vmatmul.mubr.f32.gmra.mrb[52].mxu1 %v3712_v23 }
 0x346   : > { %v3495_v19 = vpop.permute.xlu0 %3494  ;;  %v3718_v41 = vld [vmem:[#allocation3 + $0x1d0] sm:$0xff] }
 0x347   : > { %3577 = vst.msk [vmem:[#allocation3 + $0x220] sm:$0xff] %vm568_vm2, %v3495_v19  ;;  %v3243_v46 = vpop.permute.xlu1 %3242  ;;  %4339 = vmatprep.mubr.f32.mxu1 %v3718_v41  ;;  %v7908_v25 = vpop.f32.mrb[80].mxu0  ;;  %v3727_v33 = vld [vmem:[#allocation3 + $0x218] sm:$0xff] }
 0x348   : > { %3323 = vst.msk [vmem:[#allocation3 + $0x268] sm:$0xff] %vm568_vm2, %v3243_v46  ;;  %v7910_v50 = vpop.f32.mrb[81].mxu0 }
 0x349   : > { %4340 = vmatmul.mubr.f32.gmra.mrb[54].mxu1 %v3717_v57 }
 0x34a   : > { %v3497_v18 = vpop.permute.xlu0 %3496  ;;  %v3723_v43 = vld [vmem:[#allocation3 + $0x1f8] sm:$0xff] }
 0x34b   : > { %3578 = vst.msk [vmem:[#allocation3 + $0x248] sm:$0xff] %vm568_vm2, %v3497_v18  ;;  %v3245_v15 = vpop.permute.xlu1 %3244  ;;  %4344 = vmatprep.mubr.f32.mxu1 %v3723_v43  ;;  %v3732_v10 = vld [vmem:[#allocation3 + $0x240] sm:$0xff] }
 0x34c   : > { %3324 = vst.msk [vmem:[#allocation3 + $0x290] sm:$0xff] %vm568_vm2, %v3245_v15 }
 0x34d   : > { %4345 = vmatmul.mubr.f32.gmra.mrb[56].mxu1 %v3722_v54 }
 0x34e   : > { %v3499_v32 = vpop.permute.xlu0 %3498  ;;  %v3728_v52 = vld [vmem:[#allocation3 + $0x220] sm:$0xff] }
 0x34f   : > { %3579 = vst.msk [vmem:[#allocation3 + $0x270] sm:$0xff] %vm568_vm2, %v3499_v32  ;;  %v3247_v0 = vpop.permute.xlu1 %3246  ;;  %4349 = vmatprep.mubr.f32.mxu1 %v3728_v52  ;;  %v3737_v31 = vld [vmem:[#allocation3 + $0x268] sm:$0xff] }
 0x350   : > { %3325 = vst.msk [vmem:[#allocation3 + $0x2b8] sm:$0xff] %vm568_vm2, %v3247_v0  ;;  %v7916_v3 = vpop.f32.mrb[82].mxu0 }
 0x351   : > { %4350 = vmatmul.mubr.f32.gmra.mrb[58].mxu1 %v3727_v33  ;;  %v7918_v1 = vpop.f32.mrb[83].mxu0 }
 0x352   : > { %v3501_v30 = vpop.permute.xlu0 %3500  ;;  %v3733_v7 = vld [vmem:[#allocation3 + $0x248] sm:$0xff] }
 0x353   : > { %3580 = vst.msk [vmem:[#allocation3 + $0x298] sm:$0xff] %vm568_vm2, %v3501_v30  ;;  %v3249_v61 = vpop.permute.xlu1 %3248  ;;  %4354 = vmatprep.mubr.f32.mxu1 %v3733_v7  ;;  %v3742_v16 = vld [vmem:[#allocation3 + $0x290] sm:$0xff] }
 0x354   : > { %3326 = vst.msk [vmem:[#allocation3 + $0x2e0] sm:$0xff] %vm568_vm2, %v3249_v61 }
 0x355   : > { %4355 = vmatmul.mubr.f32.gmra.mrb[60].mxu1 %v3732_v10 }
 0x356   : > { %v3503_v36 = vpop.permute.xlu0 %3502  ;;  %v3738_v63 = vld [vmem:[#allocation3 + $0x270] sm:$0xff] }
 0x357   : > { %3581 = vst.msk [vmem:[#allocation3 + $0x2c0] sm:$0xff] %vm568_vm2, %v3503_v36  ;;  %v3251_v34 = vpop.permute.xlu1 %3250  ;;  %4359 = vmatprep.mubr.f32.mxu1 %v3738_v63  ;;  %v3747_v21 = vld [vmem:[#allocation3 + $0x2b8] sm:$0xff] }
 0x358   : > { %3327 = vst.msk [vmem:[#allocation3 + $0x308] sm:$0xff] %vm568_vm2, %v3251_v34 }
 0x359   : > { %4360 = vmatmul.mubr.f32.gmra.mrb[62].mxu1 %v3737_v31 }
 0x35a   : > { %v3505_v11 = vpop.permute.xlu0 %3504  ;;  %v3743_v37 = vld [vmem:[#allocation3 + $0x298] sm:$0xff] }
 0x35b   : > { %3582 = vst.msk [vmem:[#allocation3 + $0x2e8] sm:$0xff] %vm568_vm2, %v3505_v11  ;;  %v3253_v40 = vpop.permute.xlu1 %3252  ;;  %4364 = vmatprep.mubr.f32.mxu1 %v3743_v37  ;;  %v3752_v59 = vld [vmem:[#allocation3 + $0x2e0] sm:$0xff] }
 0x35c   : > { %3328 = vst.msk [vmem:[#allocation3 + $0x330] sm:$0xff] %vm568_vm2, %v3253_v40 }
 0x35d   : > { %4365 = vmatmul.mubr.f32.gmra.mrb[64].mxu1 %v3742_v16 }
 0x35e   : > { %v3507_v13 = vpop.permute.xlu0 %3506  ;;  %v3748_v5 = vld [vmem:[#allocation3 + $0x2c0] sm:$0xff] }
 0x35f   : > { %3583 = vst.msk [vmem:[#allocation3 + $0x310] sm:$0xff] %vm568_vm2, %v3507_v13  ;;  %v3255_v9 = vpop.permute.xlu1 %3254  ;;  %4369 = vmatprep.mubr.f32.mxu1 %v3748_v5  ;;  %v3757_v20 = vld [vmem:[#allocation3 + $0x308] sm:$0xff] }
 0x360   : > { %3329 = vst.msk [vmem:[#allocation3 + $0x358] sm:$0xff] %vm568_vm2, %v3255_v9 }
 0x361   : > { %4370 = vmatmul.mubr.f32.gmra.mrb[66].mxu1 %v3747_v21 }
 0x362   : > { %v3509_v39 = vpop.permute.xlu0 %3508  ;;  %v3753_v44 = vld [vmem:[#allocation3 + $0x2e8] sm:$0xff] }
 0x363   : > { %3584 = vst.msk [vmem:[#allocation3 + $0x338] sm:$0xff] %vm568_vm2, %v3509_v39  ;;  %v3257_v6 = vpop.permute.xlu1 %3256  ;;  %4374 = vmatprep.mubr.f32.mxu1 %v3753_v44  ;;  %v3762_v26 = vld [vmem:[#allocation3 + $0x330] sm:$0xff] }
 0x364   : > { %3330 = vst.msk [vmem:[#allocation3 + $0x380] sm:$0xff] %vm568_vm2, %v3257_v6 }
 0x365   : > { %4375 = vmatmul.mubr.f32.gmra.mrb[68].mxu1 %v3752_v59 }
 0x366   : > { %v3511_v56 = vpop.permute.xlu0 %3510  ;;  %v3758_v38 = vld [vmem:[#allocation3 + $0x310] sm:$0xff] }
 0x367   : > { %3585 = vst.msk [vmem:[#allocation3 + $0x360] sm:$0xff] %vm568_vm2, %v3511_v56  ;;  %v3259_v62 = vpop.permute.xlu1 %3258  ;;  %4379 = vmatprep.mubr.f32.mxu1 %v3758_v38  ;;  %v3767_v23 = vld [vmem:[#allocation3 + $0x358] sm:$0xff] }
 0x368   : > { %3331 = vst.msk [vmem:[#allocation3 + $0x3a8] sm:$0xff] %vm568_vm2, %v3259_v62  ;;  %v3764_v62 = vld [vmem:[#allocation3 + $0x340] sm:$0xff] }
 0x369   : > { %4380 = vmatmul.mubr.f32.gmra.mrb[70].mxu1 %v3757_v20  ;;  %v3769_v20 = vld [vmem:[#allocation3 + $0x368] sm:$0xff] }
 0x36a   : > { %v3513_v24 = vpop.permute.xlu0 %3512  ;;  %v3763_v47 = vld [vmem:[#allocation3 + $0x338] sm:$0xff] }
 0x36b   : > { %3586 = vst.msk [vmem:[#allocation3 + $0x388] sm:$0xff] %vm568_vm2, %v3513_v24  ;;  %v3261_v14 = vpop.permute.xlu1 %3260  ;;  %4384 = vmatprep.mubr.f32.mxu1 %v3763_v47  ;;  %v3772_v57 = vld [vmem:[#allocation3 + $0x380] sm:$0xff]  ;;  %v3774_v24 = vld [vmem:[#allocation3 + $0x390] sm:$0xff]  ;;  %v3779_v47 = vld [vmem:[#allocation3 + $0x3b8] sm:$0xff] }
 0x36c   : > { %3332 = vst.msk [vmem:[#allocation3 + $0x3d0] sm:$0xff] %vm568_vm2, %v3261_v14  ;;  %v3784_v14 = vld [vmem:[#allocation3 + $0x3e0] sm:$0xff] }
 0x36d   : > { %4385 = vmatmul.mubr.f32.gmra.mrb[72].mxu1 %v3762_v26  ;;  %v3789_v26 = vld [vmem:[#allocation3 + $0x408] sm:$0xff] }
 0x36e   : > { %v3515_v45 = vpop.permute.xlu0 %3514  ;;  %v3768_v42 = vld [vmem:[#allocation3 + $0x360] sm:$0xff] }
 0x36f   : > { %3587 = vst.msk [vmem:[#allocation3 + $0x3b0] sm:$0xff] %vm568_vm2, %v3515_v45  ;;  %v3263_v17 = vpop.permute.xlu1 %3262  ;;  %4389 = vmatprep.mubr.f32.mxu1 %v3768_v42  ;;  %v3777_v54 = vld [vmem:[#allocation3 + $0x3a8] sm:$0xff]  ;;  %v3794_v45 = vld [vmem:[#allocation3 + $0x430] sm:$0xff]  ;;  %v3799_v42 = vld [vmem:[#allocation3 + $0x458] sm:$0xff] }
 0x370   : > { %3333 = vst.msk [vmem:[#allocation3 + $0x3f8] sm:$0xff] %vm568_vm2, %v3263_v17  ;;  %v3804_v17 = vld [vmem:[#allocation3 + $0x480] sm:$0xff] }
 0x371   : > { %4390 = vmatmul.mubr.f32.gmra.mrb[74].mxu1 %v3767_v23  ;;  %v3814_v23 = vld [vmem:[#allocation3 + $0x4d0] sm:$0xff] }
 0x372   : > { %v3517_v19 = vpop.permute.xlu0 %3516  ;;  %v3773_v41 = vld [vmem:[#allocation3 + $0x388] sm:$0xff] }
 0x373   : > { %3588 = vst.msk [vmem:[#allocation3 + $0x3d8] sm:$0xff] %vm568_vm2, %v3517_v19  ;;  %v3265_v46 = vpop.permute.xlu1 %3264  ;;  %4394 = vmatprep.mubr.f32.mxu1 %v3773_v41  ;;  %v3782_v33 = vld [vmem:[#allocation3 + $0x3d0] sm:$0xff]  ;;  %v3809_v19 = vld [vmem:[#allocation3 + $0x4a8] sm:$0xff]  ;;  %v3819_v41 = vld [vmem:[#allocation3 + $0x4f8] sm:$0xff] }
 0x374   : > { %3334 = vst.msk [vmem:[#allocation3 + $0x420] sm:$0xff] %vm568_vm2, %v3265_v46  ;;  %v7966_v46 = vld [vmem:[%s8144_s4] ss:$0 sm:$0xff] }
 0x375   : > { %4395 = vmatmul.mubr.f32.gmra.mrb[76].mxu1 %v3772_v57 }
 0x376   : > { %v3519_v18 = vpop.permute.xlu0 %3518  ;;  %v3778_v43 = vld [vmem:[#allocation3 + $0x3b0] sm:$0xff] }
 0x377   : > { %3589 = vst.msk [vmem:[#allocation3 + $0x400] sm:$0xff] %vm568_vm2, %v3519_v18  ;;  %v3267_v15 = vpop.permute.xlu1 %3266  ;;  %4399 = vmatprep.mubr.f32.mxu1 %v3778_v43  ;;  %v3787_v10 = vld [vmem:[#allocation3 + $0x3f8] sm:$0xff] }
 0x378   : > { %3335 = vst.msk [vmem:[#allocation3 + $0x448] sm:$0xff] %vm568_vm2, %v3267_v15 }
 0x379   : > { %4400 = vmatmul.mubr.f32.gmra.mrb[78].mxu1 %v3777_v54 }
 0x37a   : > { %v3521_v32 = vpop.permute.xlu0 %3520  ;;  %v3783_v52 = vld [vmem:[#allocation3 + $0x3d8] sm:$0xff] }
 0x37b   : > { %3590 = vst.msk [vmem:[#allocation3 + $0x428] sm:$0xff] %vm568_vm2, %v3521_v32  ;;  %v3269_v0 = vpop.permute.xlu1 %3268  ;;  %4404 = vmatprep.mubr.f32.mxu1 %v3783_v52  ;;  %v3792_v31 = vld [vmem:[#allocation3 + $0x420] sm:$0xff] }
 0x37c   : > { %3336 = vst.msk [vmem:[#allocation3 + $0x470] sm:$0xff] %vm568_vm2, %v3269_v0 }
 0x37d   : > { %4405 = vmatmul.mubr.f32.gmra.mrb[80].mxu1 %v3782_v33 }
 0x37e   : > { %v3523_v30 = vpop.permute.xlu0 %3522  ;;  %v3788_v7 = vld [vmem:[#allocation3 + $0x400] sm:$0xff] }
 0x37f   : > { %3591 = vst.msk [vmem:[#allocation3 + $0x450] sm:$0xff] %vm568_vm2, %v3523_v30  ;;  %v3271_v61 = vpop.permute.xlu1 %3270  ;;  %4409 = vmatprep.mubr.f32.mxu1 %v3788_v7  ;;  %v3797_v16 = vld [vmem:[#allocation3 + $0x448] sm:$0xff] }
 0x380   : > { %3337 = vst.msk [vmem:[#allocation3 + $0x498] sm:$0xff] %vm568_vm2, %v3271_v61 }
 0x381   : > { %4410 = vmatmul.mubr.f32.gmra.mrb[82].mxu1 %v3787_v10 }
 0x382   : > { %v3525_v36 = vpop.permute.xlu0 %3524  ;;  %v3793_v63 = vld [vmem:[#allocation3 + $0x428] sm:$0xff] }
 0x383   : > { %3592 = vst.msk [vmem:[#allocation3 + $0x478] sm:$0xff] %vm568_vm2, %v3525_v36  ;;  %v3273_v34 = vpop.permute.xlu1 %3272  ;;  %4414 = vmatprep.mubr.f32.mxu1 %v3793_v63  ;;  %v3802_v9 = vld [vmem:[#allocation3 + $0x470] sm:$0xff] }
 0x384   : > { %3338 = vst.msk [vmem:[#allocation3 + $0x4c0] sm:$0xff] %vm568_vm2, %v3273_v34 }
 0x385   : > { %4415 = vmatmul.mubr.f32.gmra.mrb[84].mxu1 %v3792_v31 }
 0x386   : > { %v3527_v11 = vpop.permute.xlu0 %3526  ;;  %v3798_v37 = vld [vmem:[#allocation3 + $0x450] sm:$0xff] }
 0x387   : > { %3593 = vst.msk [vmem:[#allocation3 + $0x4a0] sm:$0xff] %vm568_vm2, %v3527_v11  ;;  %v3275_v40 = vpop.permute.xlu1 %3274  ;;  %4419 = vmatprep.mubr.f32.mxu1 %v3798_v37  ;;  %v3807_v44 = vld [vmem:[#allocation3 + $0x498] sm:$0xff] }
 0x388   : > { %3339 = vst.msk [vmem:[#allocation3 + $0x4e8] sm:$0xff] %vm568_vm2, %v3275_v40 }
 0x389   : > { %4420 = vmatmul.mubr.f32.gmra.mrb[86].mxu1 %v3797_v16 }
 0x38a   : > { %v3529_v13 = vpop.permute.xlu0 %3528  ;;  %v3803_v5 = vld [vmem:[#allocation3 + $0x478] sm:$0xff] }
 0x38b   : > { %3594 = vst.msk [vmem:[#allocation3 + $0x4c8] sm:$0xff] %vm568_vm2, %v3529_v13  ;;  %4424 = vmatprep.mubr.f32.mxu1 %v3803_v5  ;;  %v3812_v59 = vld [vmem:[#allocation3 + $0x4c0] sm:$0xff] }
 0x38d   : > { %4425 = vmatmul.mubr.f32.gmra.mrb[88].mxu1 %v3802_v9 }
 0x38e   : > { %v3531_v21 = vpop.permute.xlu0 %3530  ;;  %v3808_v39 = vld [vmem:[#allocation3 + $0x4a0] sm:$0xff] }
 0x38f   : > { %3595 = vst.msk [vmem:[#allocation3 + $0x4f0] sm:$0xff] %vm568_vm2, %v3531_v21  ;;  %4429 = vmatprep.mubr.f32.mxu1 %v3808_v39  ;;  %v3817_v38 = vld [vmem:[#allocation3 + $0x4e8] sm:$0xff] }
 0x391   : > { %4430 = vmatmul.mubr.f32.gmra.mrb[90].mxu1 %v3807_v44 }
 0x392   : > { %v3813_v6 = vld [vmem:[#allocation3 + $0x4c8] sm:$0xff] }
 0x393   : > { %4434 = vmatprep.mubr.f32.mxu1 %v3813_v6 }
 0x395   : > { %4435 = vmatmul.mubr.f32.gmra.mrb[92].mxu1 %v3812_v59 }
 0x396   : > { %v3818_v56 = vld [vmem:[#allocation3 + $0x4f0] sm:$0xff] }
 0x397   : > { %4439 = vmatprep.mubr.f32.mxu1 %v3818_v56 }
 0x399   : > { %4440 = vmatmul.mubr.f32.gmra.mrb[94].mxu1 %v3817_v38 }
 0x39a   : > { %5048 = vmatprep.mubr.msk.f32.mxu1 %vm223_vm0, %v3764_v62 }
 0x39d   : > { %5049 = vmatmul.mubr.msk.f32.vlgmr.msra.gmra.mrb[96].mxu1 %vm223_vm0, %v3769_v20 }
 0x39e   : > { %5051 = vmatprep.mubr.msk.f32.mxu1 %vm223_vm0, %v3774_v24 }
 0x3a1   : > { %5052 = vmatmul.mubr.msk.f32.gmra.mrb[98].mxu1 %vm223_vm0, %v3779_v47 }
 0x3a2   : > { %5054 = vmatprep.mubr.msk.f32.mxu1 %vm223_vm0, %v3784_v14 }
 0x3a5   : > { %5055 = vmatmul.mubr.msk.f32.gmra.mrb[100].mxu1 %vm223_vm0, %v3789_v26 }
 0x3a6   : > { %5057 = vmatprep.mubr.msk.f32.mxu1 %vm223_vm0, %v3794_v45 }
 0x3a9   : > { %5058 = vmatmul.mubr.msk.f32.gmra.mrb[102].mxu1 %vm223_vm0, %v3799_v42 }
 0x3aa   : > { %5060 = vmatprep.mubr.msk.f32.mxu1 %vm223_vm0, %v3804_v17 }
 0x3ad   : > { %5061 = vmatmul.mubr.msk.f32.gmra.mrb[104].mxu1 %vm223_vm0, %v3809_v19 }
 0x3ae   : > { %5063 = vmatprep.mubr.msk.f32.mxu1 %vm223_vm0, %v3814_v23 }
 0x3b1   : > { %5064 = vmatmul.mubr.msk.f32.gmra.mrb[106].mxu1 %vm223_vm0, %v3819_v41 }
 0x3f0   : > { %v4286_v57 = vpop.f32.mrb[32].mxu1 }
 0x3f1   : > { %v5330_v18 = vadd.f32 %v7966_v46, %v4286_v57  ;;  %v4288_v43 = vpop.f32.mrb[33].mxu1 }
 0x3f3   : > { %v4512_v15 = vadd.f32 %v5330_v18, %v7823_v12 }
 0x3f4   : > { %v4291_v54 = vpop.f32.mrb[34].mxu1 }
 0x3f5   : > { %4670 = vst.msk [vmem:[%s7972_s26] sm:$0xff] %vm223_vm0, %v4512_v15  ;;  %v5331_v32 = vadd.f32 %v7966_v46, %v4291_v54  ;;  %v4293_v52 = vpop.f32.mrb[35].mxu1 }
 0x3f7   : > { %v4517_v0 = vadd.f32 %v5331_v32, %v7817_v35 }
 0x3f8   : > { %v4296_v33 = vpop.f32.mrb[36].mxu1 }
 0x3f9   : > { %4671 = vst.msk [vmem:[%s7972_s26 + $0x8] sm:$0xff] %vm223_vm0, %v4517_v0  ;;  %v5332_v12 = vadd.f32 %v7966_v46, %v4296_v33  ;;  %v4298_v30 = vpop.f32.mrb[37].mxu1 }
 0x3fb   : > { %v4522_v7 = vadd.f32 %v5332_v12, %v7841_v4 }
 0x3fc   : > { %v4301_v61 = vpop.f32.mrb[38].mxu1 }
 0x3fd   : > { %4672 = vst.msk [vmem:[%s7972_s26 + $0x10] sm:$0xff] %vm223_vm0, %v4522_v7  ;;  %v5333_v10 = vadd.f32 %v7966_v46, %v4301_v61  ;;  %v4303_v36 = vpop.f32.mrb[39].mxu1 }
 0x3ff   : > { %v4527_v63 = vadd.f32 %v5333_v10, %v7837_v22 }
 0x400   : > { %v4306_v34 = vpop.f32.mrb[40].mxu1 }
 0x401   : > { %4673 = vst.msk [vmem:[%s7972_s26 + $0x18] sm:$0xff] %vm223_vm0, %v4527_v63  ;;  %v5334_v35 = vadd.f32 %v7966_v46, %v4306_v34  ;;  %v4308_v31 = vpop.f32.mrb[41].mxu1 }
 0x403   : > { %v4532_v11 = vadd.f32 %v5334_v35, %v7854_v60 }
 0x404   : > { %v4311_v37 = vpop.f32.mrb[42].mxu1 }
 0x405   : > { %4674 = vst.msk [vmem:[%s7972_s26 + $0x20] sm:$0xff] %vm223_vm0, %v4532_v11  ;;  %v5335_v4 = vadd.f32 %v7966_v46, %v4311_v37  ;;  %v4313_v40 = vpop.f32.mrb[43].mxu1 }
 0x407   : > { %v4537_v16 = vadd.f32 %v5335_v4, %v7851_v8 }
 0x408   : > { %v4316_v13 = vpop.f32.mrb[44].mxu1 }
 0x409   : > { %4675 = vst.msk [vmem:[%s7972_s26 + $0x28] sm:$0xff] %vm223_vm0, %v4537_v16  ;;  %v5336_v22 = vadd.f32 %v7966_v46, %v4316_v13  ;;  %v4318_v5 = vpop.f32.mrb[45].mxu1 }
 0x40b   : > { %v4542_v9 = vadd.f32 %v5336_v22, %v7866_v48 }
 0x40c   : > { %v4321_v21 = vpop.f32.mrb[46].mxu1 }
 0x40d   : > { %4676 = vst.msk [vmem:[%s7972_s26 + $0x30] sm:$0xff] %vm223_vm0, %v4542_v9  ;;  %v5337_v60 = vadd.f32 %v7966_v46, %v4321_v21  ;;  %v4323_v39 = vpop.f32.mrb[47].mxu1 }
 0x40f   : > { %v4547_v44 = vadd.f32 %v5337_v60, %v7863_v29 }
 0x410   : > { %v4326_v6 = vpop.f32.mrb[48].mxu1 }
 0x411   : > { %4677 = vst.msk [vmem:[%s7972_s26 + $0x38] sm:$0xff] %vm223_vm0, %v4547_v44  ;;  %v5338_v8 = vadd.f32 %v7966_v46, %v4326_v6  ;;  %v4328_v59 = vpop.f32.mrb[49].mxu1 }
 0x413   : > { %v4552_v56 = vadd.f32 %v5338_v8, %v7877_v53 }
 0x414   : > { %v4331_v38 = vpop.f32.mrb[50].mxu1 }
 0x415   : > { %4678 = vst.msk [vmem:[%s7972_s26 + $0x40] sm:$0xff] %vm223_vm0, %v4552_v56  ;;  %v5339_v48 = vadd.f32 %v7966_v46, %v4331_v38  ;;  %v4333_v62 = vpop.f32.mrb[51].mxu1 }
 0x417   : > { %v4557_v20 = vadd.f32 %v5339_v48, %v7875_v58 }
 0x418   : > { %v4336_v24 = vpop.f32.mrb[52].mxu1 }
 0x419   : > { %4679 = vst.msk [vmem:[%s7972_s26 + $0x48] sm:$0xff] %vm223_vm0, %v4557_v20  ;;  %v5340_v29 = vadd.f32 %v7966_v46, %v4336_v24  ;;  %v4338_v47 = vpop.f32.mrb[53].mxu1 }
 0x41b   : > { %v4562_v14 = vadd.f32 %v5340_v29, %v7886_v28 }
 0x41c   : > { %v4341_v26 = vpop.f32.mrb[54].mxu1 }
 0x41d   : > { %4680 = vst.msk [vmem:[%s7972_s26 + $0x50] sm:$0xff] %vm223_vm0, %v4562_v14  ;;  %v5341_v53 = vadd.f32 %v7966_v46, %v4341_v26  ;;  %v4343_v45 = vpop.f32.mrb[55].mxu1 }
 0x41f   : > { %v4567_v42 = vadd.f32 %v5341_v53, %v7884_v2 }
 0x420   : > { %v4346_v17 = vpop.f32.mrb[56].mxu1 }
 0x421   : > { %4681 = vst.msk [vmem:[%s7972_s26 + $0x58] sm:$0xff] %vm223_vm0, %v4567_v42  ;;  %v5342_v58 = vadd.f32 %v7966_v46, %v4346_v17  ;;  %v4348_v23 = vpop.f32.mrb[57].mxu1 }
 0x423   : > { %v4572_v19 = vadd.f32 %v5342_v58, %v7894_v55 }
 0x424   : > { %v4351_v41 = vpop.f32.mrb[58].mxu1 }
 0x425   : > { %4682 = vst.msk [vmem:[%s7972_s26 + $0x60] sm:$0xff] %vm223_vm0, %v4572_v19  ;;  %v5343_v28 = vadd.f32 %v7966_v46, %v4351_v41  ;;  %v4353_v57 = vpop.f32.mrb[59].mxu1 }
 0x427   : > { %v4577_v18 = vadd.f32 %v5343_v28, %v7892_v49 }
 0x428   : > { %v4356_v43 = vpop.f32.mrb[60].mxu1 }
 0x429   : > { %4683 = vst.msk [vmem:[%s7972_s26 + $0x68] sm:$0xff] %vm223_vm0, %v4577_v18  ;;  %v5344_v2 = vadd.f32 %v7966_v46, %v4356_v43  ;;  %v4358_v15 = vpop.f32.mrb[61].mxu1 }
 0x42b   : > { %v4582_v54 = vadd.f32 %v5344_v2, %v7902_v51 }
 0x42c   : > { %v4361_v32 = vpop.f32.mrb[62].mxu1 }
 0x42d   : > { %4684 = vst.msk [vmem:[%s7972_s26 + $0x70] sm:$0xff] %vm223_vm0, %v4582_v54  ;;  %v5345_v55 = vadd.f32 %v7966_v46, %v4361_v32  ;;  %v4363_v52 = vpop.f32.mrb[63].mxu1 }
 0x42f   : > { %v4587_v0 = vadd.f32 %v5345_v55, %v7900_v27 }
 0x430   : > { %v4366_v33 = vpop.f32.mrb[64].mxu1 }
 0x431   : > { %4685 = vst.msk [vmem:[%s7972_s26 + $0x78] sm:$0xff] %vm223_vm0, %v4587_v0  ;;  %v5346_v49 = vadd.f32 %v7966_v46, %v4366_v33  ;;  %v4368_v12 = vpop.f32.mrb[65].mxu1 }
 0x433   : > { %v4592_v30 = vadd.f32 %v5346_v49, %v7910_v50 }
 0x434   : > { %v4371_v7 = vpop.f32.mrb[66].mxu1 }
 0x435   : > { %4686 = vst.msk [vmem:[%s7972_s26 + $0x80] sm:$0xff] %vm223_vm0, %v4592_v30  ;;  %v5347_v51 = vadd.f32 %v7966_v46, %v4371_v7  ;;  %v4373_v61 = vpop.f32.mrb[67].mxu1 }
 0x437   : > { %v4597_v10 = vadd.f32 %v5347_v51, %v7908_v25 }
 0x438   : > { %v4376_v36 = vpop.f32.mrb[68].mxu1 }
 0x439   : > { %4687 = vst.msk [vmem:[%s7972_s26 + $0x88] sm:$0xff] %vm223_vm0, %v4597_v10  ;;  %v5348_v27 = vadd.f32 %v7966_v46, %v4376_v36  ;;  %v4378_v63 = vpop.f32.mrb[69].mxu1 }
 0x43b   : > { %v4602_v34 = vadd.f32 %v5348_v27, %v7918_v1 }
 0x43c   : > { %v4381_v35 = vpop.f32.mrb[70].mxu1 }
 0x43d   : > { %4688 = vst.msk [vmem:[%s7972_s26 + $0x90] sm:$0xff] %vm223_vm0, %v4602_v34  ;;  %v5349_v50 = vadd.f32 %v7966_v46, %v4381_v35  ;;  %v4383_v31 = vpop.f32.mrb[71].mxu1 }
 0x43f   : > { %v4607_v11 = vadd.f32 %v5349_v50, %v7916_v3 }
 0x440   : > { %v4386_v37 = vpop.f32.mrb[72].mxu1 }
 0x441   : > { %4689 = vst.msk [vmem:[%s7972_s26 + $0x98] sm:$0xff] %vm223_vm0, %v4607_v11  ;;  %v4388_v25 = vpop.f32.mrb[73].mxu1  ;;  %v5350_v47 = vadd.f32 %v7966_v46, %v4386_v37 }
 0x444   : > { %v4391_v4 = vpop.f32.mrb[74].mxu1 }
 0x445   : > { %v4393_v40 = vpop.f32.mrb[75].mxu1  ;;  %v5351_v29 = vadd.f32 %v7966_v46, %v4391_v4 }
 0x448   : > { %v4396_v16 = vpop.f32.mrb[76].mxu1 }
 0x449   : > { %v4398_v13 = vpop.f32.mrb[77].mxu1  ;;  %v5352_v17 = vadd.f32 %v7966_v46, %v4396_v16 }
 0x44c   : > { %v4401_v22 = vpop.f32.mrb[78].mxu1 }
 0x44d   : > { %v4403_v5 = vpop.f32.mrb[79].mxu1  ;;  %v5353_v42 = vadd.f32 %v7966_v46, %v4401_v22 }
 0x450   : > { %v4406_v9 = vpop.f32.mrb[80].mxu1 }
 0x451   : > { %v4408_v1 = vpop.f32.mrb[81].mxu1  ;;  %v5354_v57 = vadd.f32 %v7966_v46, %v4406_v9 }
 0x454   : > { %v4411_v21 = vpop.f32.mrb[82].mxu1 }
 0x455   : > { %v4413_v60 = vpop.f32.mrb[83].mxu1  ;;  %v5355_v28 = vadd.f32 %v7966_v46, %v4411_v21 }
 0x458   : > { %v4416_v39 = vpop.f32.mrb[84].mxu1 }
 0x459   : > { %v4418_v44 = vpop.f32.mrb[85].mxu1  ;;  %v5356_v32 = vadd.f32 %v7966_v46, %v4416_v39 }
 0x45c   : > { %v4421_v6 = vpop.f32.mrb[86].mxu1 }
 0x45d   : > { %v4423_v8 = vpop.f32.mrb[87].mxu1  ;;  %v5357_v54 = vadd.f32 %v7966_v46, %v4421_v6 }
 0x460   : > { %v4426_v3 = vpop.f32.mrb[88].mxu1 }
 0x461   : > { %v4428_v59 = vpop.f32.mrb[89].mxu1  ;;  %v5358_v12 = vadd.f32 %v7966_v46, %v4426_v3 }
 0x464   : > { %v4431_v56 = vpop.f32.mrb[90].mxu1 }
 0x465   : > { %v4433_v38 = vpop.f32.mrb[91].mxu1  ;;  %v5359_v49 = vadd.f32 %v7966_v46, %v4431_v56 }
 0x468   : > { %v4436_v48 = vpop.f32.mrb[92].mxu1 }
 0x469   : > { %v4438_v62 = vpop.f32.mrb[93].mxu1  ;;  %v5360_v36 = vadd.f32 %v7966_v46, %v4436_v48 }
 0x46c   : > { %v4441_v20 = vpop.f32.mrb[94].mxu1 }
 0x46d   : > { %v4443_v24 = vpop.f32.mrb[95].mxu1  ;;  %v5361_v10 = vadd.f32 %v7966_v46, %v4441_v20 }
 0x470   : > { %v5050_v14 = vpop.f32.mrb[96].mxu1 }
 0x471   : > { %v4617_v26 = vadd.f32 %v5351_v29, %v5050_v14  ;;  %v4611_v53 = vpop.f32.mrb[97].mxu1 }
 0x472   : > { %v4612_v45 = vadd.f32 %v5350_v47, %v4611_v53 }
 0x473   : > { %4691 = vst.msk [vmem:[%s7972_s26 + $0xa8] sm:$0xff] %vm223_vm0, %v4617_v26 }
 0x474   : > { %4690 = vst.msk [vmem:[%s7972_s26 + $0xa0] sm:$0xff] %vm223_vm0, %v4612_v45  ;;  %v5053_v58 = vpop.f32.mrb[98].mxu1 }
 0x475   : > { %v4627_v23 = vadd.f32 %v5353_v42, %v5053_v58  ;;  %v4621_v19 = vpop.f32.mrb[99].mxu1 }
 0x476   : > { %v4622_v41 = vadd.f32 %v5352_v17, %v4621_v19 }
 0x477   : > { %4693 = vst.msk [vmem:[%s7972_s26 + $0xb8] sm:$0xff] %vm223_vm0, %v4627_v23 }
 0x478   : > { %4692 = vst.msk [vmem:[%s7972_s26 + $0xb0] sm:$0xff] %vm223_vm0, %v4622_v41  ;;  %v5056_v18 = vpop.f32.mrb[100].mxu1 }
 0x479   : > { %v4637_v43 = vadd.f32 %v5355_v28, %v5056_v18  ;;  %v4631_v2 = vpop.f32.mrb[101].mxu1 }
 0x47a   : > { %v4632_v15 = vadd.f32 %v5354_v57, %v4631_v2 }
 0x47b   : > { %4695 = vst.msk [vmem:[%s7972_s26 + $0xc8] sm:$0xff] %vm223_vm0, %v4637_v43 }
 0x47c   : > { %4694 = vst.msk [vmem:[%s7972_s26 + $0xc0] sm:$0xff] %vm223_vm0, %v4632_v15  ;;  %v5059_v55 = vpop.f32.mrb[102].mxu1 }
 0x47d   : > { %v4647_v52 = vadd.f32 %v5357_v54, %v5059_v55  ;;  %v4641_v0 = vpop.f32.mrb[103].mxu1 }
 0x47e   : > { %v4642_v33 = vadd.f32 %v5356_v32, %v4641_v0 }
 0x47f   : > { %4697 = vst.msk [vmem:[%s7972_s26 + $0xd8] sm:$0xff] %vm223_vm0, %v4647_v52 }
 0x480   : > { %4696 = vst.msk [vmem:[%s7972_s26 + $0xd0] sm:$0xff] %vm223_vm0, %v4642_v33  ;;  %v5062_v30 = vpop.f32.mrb[104].mxu1 }
 0x481   : > { %v4657_v7 = vadd.f32 %v5359_v49, %v5062_v30  ;;  %v4651_v51 = vpop.f32.mrb[105].mxu1 }
 0x482   : > { %v4652_v61 = vadd.f32 %v5358_v12, %v4651_v51 }
 0x483   : > { %4699 = vst.msk [vmem:[%s7972_s26 + $0xe8] sm:$0xff] %vm223_vm0, %v4657_v7 }
 0x484   : > { %4698 = vst.msk [vmem:[%s7972_s26 + $0xe0] sm:$0xff] %vm223_vm0, %v4652_v61  ;;  %v5065_v27 = vpop.f32.mrb[106].mxu1 }
 0x485   : > { %v4667_v63 = vadd.f32 %v5361_v10, %v5065_v27  ;;  %v4661_v34 = vpop.f32.mrb[107].mxu1 }
 0x486   : > { %v4662_v35 = vadd.f32 %v5360_v36, %v4661_v34 }
 0x487   : > { %4701 = vst.msk [vmem:[%s7972_s26 + $0xf8] sm:$0xff] %vm223_vm0, %v4667_v63 }
 0x488   : > { %4700 = vst.msk [vmem:[%s7972_s26 + $0xf0] sm:$0xff] %vm223_vm0, %v4662_v35 }
 0x489   : > { %5556 = shalt.err (!%p5553_p3)
}
 0x48a   : > { %s5557_s13 = scalar_lea.hbm %s8089_s9, 4096  ;;  %s5561_s16 = scalar_lea.hbm %s8145_s5, 8192 }
 0x48b   : > { %p5558_p4 = scmp.ne.s32.totalorder %s8089_s9, %s5557_s13  ;;  %p5562_p9 = scmp.lt.u32.totalorder %s8089_s9, %s8145_s5 }
 0x48c   : > { %p5563_p10 = scmp.lt.u32.totalorder %s5561_s16, %s5557_s13  ;;  %p5565_p12 = scmp.lt.u32.totalorder %s5557_s13, %s8089_s9 }
 0x48d   : > { %p5559_p7 = pnand %p5558_p4, %p5681_p5 }
 0x48e   : > { %p5564_p11 = por %p5563_p10, %p5562_p9 }
 0x48f   : > { %p5560_p8 = pneg %p5559_p7 }
 0x490   : > { %p5566_p13 = por %p5565_p12, %p5564_p11 }
 0x492   : > { %p5567_p0 = pnand %p5566_p13, %p5560_p8 }
 0x494   : > { %5570 = shalt.err (!%p5567_p0)
}
 0x495   : > { %s5611_s26 = smov 128   ;;  %s5612_s30 = smov 8  }
 0x496   : > { %5490 = dma.vmem_to_hbm [thread:$0]  (%p5681_p5), %s8091_s6, 4096, %s8089_s9, %s8099_s22, %s5611_s26, %s5611_s26, %s5612_s30  }
 0x497 PF: > { %p5496_p1 = scmp.ge.s32.totalorder %s5605_s21, 2  ;;  %s4731_s7 = sand.u32 1, %s5593_s18  }
 0x498   : > { %s4732_s8 = scalar_lea.sflag [#allocation5], %s4731_s7 }
 0x499   : > { %p5493_p2 = pnand %p5496_p1, %p5685_p6 }
 0x49b   : > { %5588 = dma.done.wait (!%p5493_p2), %s4732_s8, 4096  }
 0x49c   : > { %5590 = vsyncadd (!%p5493_p2), %s4732_s8, 4294963200  ;;  %p15_p3 = scmp.ge.s32.totalorder %s5668_s24, 4   ;;  %s8172_s18 = smov %s5597_s19 }
 0x49d   : > { %s8173_s19 = smov %s5601_s20  ;;  %s8174_s20 = smov %s5679_s27 }
 0x49e   : > { %s8175_s21 = smov %s5668_s24  ;;  %17 = sbr.rel (!%p15_p3) target bundleno = 3 (0x3), region = 77 }
 0x4a5   :  { %4737 = vsyncpa [#allocation5], 1 }
 0x4a6   :  { %4739 = vsyncpa [#allocation5 + $0x1], 1 }

</bundles_post_ra>
